<compile_context>
chip_gen: v6e
topology: v6e:2x2x1
jax: 0.10.0
libtpu: 0.0.40
codegen_flags: <defaults>
</compile_context>

<pallas_src>
import functools

import jax
import jax.numpy as jnp
from jax.experimental import pallas as pl
from jax.experimental.pallas import tpu as pltpu


# ----------------------------------------------------------------------------
# Pallas kernels
# ----------------------------------------------------------------------------
def matmul_bias_kernel(a_ref, b_ref, bias_ref, o_ref, *, relu):
    """o = [relu](A @ B + bias)   (BN scale already folded into B)."""
    acc = jnp.dot(a_ref[...], b_ref[...], preferred_element_type=jnp.float32)
    out = acc + bias_ref[...]
    if relu:
        out = jnp.maximum(out, 0.0)
    o_ref[...] = out.astype(o_ref.dtype)


def _conv3x3_accumulate(x_ref, w_ref):
    """Fused im2col: 9 unrolled taps over the padded VMEM activation.

    x_ref: (1, H+2, W+2, C) f32 zero-padded activation (one image)
    w_ref: (9, C, Cout) bf16 weights, tap-major, BN scale folded in
    returns f32 (H*W, Cout) accumulator.
    """
    _, Hp, Wp, C = x_ref.shape
    Ho, Wo = Hp - 2, Wp - 2
    Cout = w_ref.shape[2]
    xv = x_ref[0]                                     # read x once: (Hp, Wp, C)
    acc = jnp.zeros((Ho * Wo, Cout), jnp.float32)
    for t in range(9):
        dy, dx = divmod(t, 3)
        tap = xv[dy:dy + Ho, dx:dx + Wo, :].reshape(Ho * Wo, C)
        acc = acc + jnp.dot(tap.astype(jnp.bfloat16), w_ref[t],
                            preferred_element_type=jnp.float32)
    return acc


def conv3x3_bn_kernel(x_ref, w_ref, bias_ref, o_ref, *, relu):
    out = _conv3x3_accumulate(x_ref, w_ref) + bias_ref[...]
    if relu:
        out = jnp.maximum(out, 0.0)
    o_ref[0] = out.astype(o_ref.dtype)


def conv3x3_bn_res_kernel(x_ref, w_ref, bias_ref, res_ref, o_ref, *, relu):
    out = _conv3x3_accumulate(x_ref, w_ref) + bias_ref[...] + res_ref[0]
    if relu:
        out = jnp.maximum(out, 0.0)
    o_ref[0] = out.astype(o_ref.dtype)


def maxpool3x3s2_kernel(x_ref, o_ref):
    """3x3/s2/p1 max pool over a parity de-interleaved, -inf padded map.

    x_ref: (4, H2, W2, C) where index (pH*2+pW, h2, w2) is padded pixel
           (2*h2+pH, 2*w2+pW); o_ref: (1, Ho, Wo, C).
    """
    Ho, Wo = o_ref.shape[1], o_ref.shape[2]
    xv = x_ref[...]                                   # read x once
    out = None
    for dy in range(3):
        for dx in range(3):
            p = (dy % 2) * 2 + (dx % 2)
            tap = xv[p, dy // 2:dy // 2 + Ho, dx // 2:dx // 2 + Wo, :]
            out = tap if out is None else jnp.maximum(out, tap)
    o_ref[0] = out.astype(o_ref.dtype)


def relu_avgpool_heads_kernel(x_ref, w_ref, bias_ref, o_ref):
    """ReLU + global avg pool + merged (classifier|bb) linear heads.

    x_ref: (B, HW, C) f32; w_ref: (C, 8) folded head weights; bias: (1, 8).
    """
    feat = jnp.mean(jnp.maximum(x_ref[...], 0.0), axis=1)          # (B, C)
    out = jnp.dot(feat, w_ref[...], preferred_element_type=jnp.float32)
    o_ref[...] = (out + bias_ref[...]).astype(o_ref.dtype)


# ----------------------------------------------------------------------------
# Pallas wrappers
# ----------------------------------------------------------------------------
def fused_matmul_bias(a, b, bias, relu=False):
    """a: (M, K) bf16 patches, b: (K, N) bf16 weights (scale folded), bias: (N,)."""
    M, K = a.shape
    N = b.shape[1]
    # Keep >=2 grid steps when M allows so both v7x TensorCores get work; on
    # v5e/v6e the extra step only costs ~0.35us vs. a single fat tile.
    if M >= 64 and M % 32 == 0:
        tm, grid_m = M // 2, 2
    else:
        tm, grid_m = ((M + 15) // 16) * 16, 1
        if tm != M:
            a = jnp.pad(a, ((0, tm - M), (0, 0)))
    bias2 = bias.reshape(1, N).astype(jnp.float32)
    cost = pl.CostEstimate(
        flops=2 * M * K * N, transcendentals=0,
        bytes_accessed=(a.size * a.dtype.itemsize + b.size * b.dtype.itemsize
                        + bias2.size * 4 + M * N * 4))
    out = pl.pallas_call(
        functools.partial(matmul_bias_kernel, relu=relu),
        out_shape=jax.ShapeDtypeStruct((tm * grid_m, N), jnp.float32),
        grid=(grid_m,),
        in_specs=[
            pl.BlockSpec((tm, K), lambda i: (i, 0)),
            pl.BlockSpec((K, N), lambda i: (0, 0)),
            pl.BlockSpec((1, N), lambda i: (0, 0)),
        ],
        out_specs=pl.BlockSpec((tm, N), lambda i: (i, 0)),
        compiler_params=pltpu.CompilerParams(dimension_semantics=("parallel",)),
        cost_estimate=cost,
    )(a, b, bias2)
    return out[:M]


def conv3x3_bn(x, w9, bias, relu, residual=None):
    """3x3/s1/p1 Conv + folded BN [+ residual] [+ ReLU]; im2col fused in-kernel."""
    B, H, W, C = x.shape
    Cout = w9.shape[2]
    HW = H * W
    xp = jnp.pad(x, ((0, 0), (1, 1), (1, 1), (0, 0)))               # zero pad
    bias2 = bias.reshape(1, Cout).astype(jnp.float32)
    bytes_accessed = (xp.size * 4 + w9.size * w9.dtype.itemsize + bias2.size * 4
                      + (0 if residual is None else B * HW * C * 4)
                      + B * HW * Cout * 4)
    cost = pl.CostEstimate(flops=2 * B * HW * 9 * C * Cout,
                           transcendentals=0, bytes_accessed=bytes_accessed)

    in_specs = [
        pl.BlockSpec((1, H + 2, W + 2, C), lambda b: (b, 0, 0, 0)),
        pl.BlockSpec((9, C, Cout), lambda b: (0, 0, 0)),
        pl.BlockSpec((1, Cout), lambda b: (0, 0)),
    ]
    operands = [xp, w9, bias2]
    if residual is None:
        kern = functools.partial(conv3x3_bn_kernel, relu=relu)
    else:
        in_specs.append(pl.BlockSpec((1, HW, C), lambda b: (b, 0, 0)))
        operands.append(residual.reshape(B, HW, C).astype(jnp.float32))
        kern = functools.partial(conv3x3_bn_res_kernel, relu=relu)

    out = pl.pallas_call(
        kern,
        out_shape=jax.ShapeDtypeStruct((B, HW, Cout), jnp.float32),
        grid=(B,),                      # batch-parallel: feeds both v7x cores
        in_specs=in_specs,
        out_specs=pl.BlockSpec((1, HW, Cout), lambda b: (b, 0, 0)),
        compiler_params=pltpu.CompilerParams(dimension_semantics=("parallel",)),
        cost_estimate=cost,
    )(*operands)
    return out.reshape(B, H, W, Cout)


def deinterleave2x2(x, pad, pad_value):
    """(B,H,W,C) -> (B*4, (H+2p)/2, (W+2p)/2, C) parity planes of the padded map."""
    B, H, W, C = x.shape
    Hp, Wp = H + 2 * pad, W + 2 * pad
    assert Hp % 2 == 0 and Wp % 2 == 0
    xp = jnp.pad(x, ((0, 0), (pad, pad), (pad, pad), (0, 0)),
                 constant_values=pad_value)
    xp = xp.reshape(B, Hp // 2, 2, Wp // 2, 2, C)
    xp = jnp.transpose(xp, (0, 2, 4, 1, 3, 5))          # (B, pH, pW, H2, W2, C)
    return xp.reshape(B * 4, Hp // 2, Wp // 2, C)


def maxpool_3x3_s2(x):
    """nn.MaxPool2d(3, stride=2, padding=1) on NHWC, single-pass kernel."""
    B, H, W, C = x.shape
    Ho, Wo = (H + 2 - 3) // 2 + 1, (W + 2 - 3) // 2 + 1
    xd = deinterleave2x2(x, pad=1, pad_value=-jnp.inf)  # (B*4, H2, W2, C)
    H2, W2 = xd.shape[1], xd.shape[2]
    return pl.pallas_call(
        maxpool3x3s2_kernel,
        out_shape=jax.ShapeDtypeStruct((B, Ho, Wo, C), jnp.float32),
        grid=(B,),
        in_specs=[pl.BlockSpec((4, H2, W2, C), lambda b: (b, 0, 0, 0))],
        out_specs=pl.BlockSpec((1, Ho, Wo, C), lambda b: (b, 0, 0, 0)),
        compiler_params=pltpu.CompilerParams(dimension_semantics=("parallel",)),
    )(xd)


def relu_avgpool_heads(x_bhwc, w_all, b_all):
    """F.relu + AdaptiveAvgPool2d((1,1)) + flatten + both (BN1d+Linear) heads."""
    B, H, W, C = x_bhwc.shape
    N = w_all.shape[1]
    xf = x_bhwc.reshape(B, H * W, C)
    return pl.pallas_call(
        relu_avgpool_heads_kernel,
        out_shape=jax.ShapeDtypeStruct((B, N), jnp.float32),
        in_specs=[
            pl.BlockSpec((B, H * W, C), lambda: (0, 0, 0)),
            pl.BlockSpec((C, N), lambda: (0, 0)),
            pl.BlockSpec((1, N), lambda: (0, 0)),
        ],
        out_specs=pl.BlockSpec((B, N), lambda: (0, 0)),
    )(xf, w_all, b_all.reshape(1, N).astype(jnp.float32))


# ----------------------------------------------------------------------------
# im2col glue for the 7x7/s2 stem (plain JAX, bf16, ~150 KB at 32x32 input)
# ----------------------------------------------------------------------------
def im2col(x, kh, kw, stride, pad):
    """x: (B,H,W,C) NHWC -> ((B*Ho*Wo, kh*kw*C), Ho, Wo). Tap order (dy, dx, cin)."""
    B, H, W, C = x.shape
    Ho = (H + 2 * pad - kh) // stride + 1
    Wo = (W + 2 * pad - kw) // stride + 1
    xp = jnp.pad(x, ((0, 0), (pad, pad), (pad, pad), (0, 0)))
    cols = []
    for dy in range(kh):
        for dx in range(kw):
            cols.append(xp[:, dy:dy + stride * Ho:stride,
                           dx:dx + stride * Wo:stride, :])
    patches = jnp.stack(cols, axis=3)                   # (B, Ho, Wo, kh*kw, C)
    return patches.reshape(B * Ho * Wo, kh * kw * C), Ho, Wo


# ----------------------------------------------------------------------------
# Deterministic synthetic parameters (shapes match resnet34 stem + layer1)
# ----------------------------------------------------------------------------
def init_params(key):
    keys = iter(jax.random.split(key, 64))

    def nrm(shape, s=0.05):
        return s * jax.random.normal(next(keys), shape, jnp.float32)

    def bn(c):
        gamma = 1.0 + nrm((c,), 0.1)
        beta = nrm((c,), 0.1)
        mean = nrm((c,), 0.1)
        var = 1.0 + jnp.abs(nrm((c,), 0.1))
        scale = gamma / jnp.sqrt(var + 1e-5)
        bias = beta - mean * scale
        return scale, bias

    params = {}
    # stem: Conv(3->64, 7x7, s2, p3) + BN + ReLU   (weights in HWIO)
    params["conv1_w"] = nrm((7, 7, 3, 64))
    params["bn1_s"], params["bn1_b"] = bn(64)
    # layer1: 3 BasicBlocks (64 -> 64, stride 1)
    blocks = []
    for _ in range(3):
        blk = {"w1": nrm((3, 3, 64, 64)), "w2": nrm((3, 3, 64, 64))}
        blk["s1"], blk["b1"] = bn(64)
        blk["s2"], blk["b2"] = bn(64)
        blocks.append(blk)
    params["layer1"] = blocks
    # heads: BatchNorm1d(64) + Linear(64, 4), twice
    for name in ("cls", "bb"):
        s, b = bn(64)
        params[name] = {"bn_s": s, "bn_b": b, "W": nrm((4, 64)), "b": nrm((4,))}
    return params


def fold_params(p):
    """Fold BN scale into conv/linear weights (exact for inference), cast the
    GEMM operands to bf16, and merge both heads into one (64, 8) GEMM."""
    f = {}
    f["conv1_w"] = (p["conv1_w"].reshape(7 * 7 * 3, 64)
                    * p["bn1_s"][None, :]).astype(jnp.bfloat16)
    f["conv1_b"] = p["bn1_b"].astype(jnp.float32)
    blocks = []
    for blk in p["layer1"]:
        blocks.append({
            "w1": (blk["w1"].reshape(9, 64, 64)
                   * blk["s1"][None, None, :]).astype(jnp.bfloat16),
            "b1": blk["b1"].astype(jnp.float32),
            "w2": (blk["w2"].reshape(9, 64, 64)
                   * blk["s2"][None, None, :]).astype(jnp.bfloat16),
            "b2": blk["b2"].astype(jnp.float32),
        })
    f["layer1"] = blocks
    wts, bs = [], []
    for name in ("cls", "bb"):
        hp = p[name]
        wts.append(hp["W"].T * hp["bn_s"][:, None])            # (64, 4)
        bs.append(hp["bn_b"] @ hp["W"].T + hp["b"])            # (4,)
    f["head_w"] = jnp.concatenate(wts, axis=1).astype(jnp.float32)   # (64, 8)
    f["head_b"] = jnp.concatenate(bs, axis=0).astype(jnp.float32)    # (8,)
    return f


# ----------------------------------------------------------------------------
# Forward pass
# ----------------------------------------------------------------------------
def basic_block(x, blk):
    h = conv3x3_bn(x, blk["w1"], blk["b1"], relu=True)
    return conv3x3_bn(h, blk["w2"], blk["b2"], relu=True, residual=x)


@jax.jit
def bb_model_forward(x_nchw, fp):
    x = jnp.transpose(x_nchw, (0, 2, 3, 1)).astype(jnp.float32)   # NCHW -> NHWC
    B = x.shape[0]
    cout = fp["conv1_w"].shape[1]
    # features1: conv7x7/s2/p3 + folded BN + ReLU (bf16 patches, f32 accumulate)
    a, Ho, Wo = im2col(x.astype(jnp.bfloat16), 7, 7, 2, 3)
    x = fused_matmul_bias(a, fp["conv1_w"], fp["conv1_b"], relu=True)
    x = x.reshape(B, Ho, Wo, cout)
    # features2: maxpool 3x3/s2/p1 + layer1 (3 basic blocks, im2col fused)
    x = maxpool_3x3_s2(x)
    for blk in fp["layer1"]:
        x = basic_block(x, blk)
    # F.relu + AdaptiveAvgPool2d((1,1)) + flatten + both heads (merged GEMM)
    out = relu_avgpool_heads(x, fp["head_w"], fp["head_b"])       # (B, 8)
    return out[:, :4], out[:, 4:]


# ----------------------------------------------------------------------------
if __name__ == "__main__":
    key = jax.random.PRNGKey(0)
    pkey, xkey = jax.random.split(key)
    params = fold_params(init_params(pkey))
    # small image input consistent with the ResNet stem (3-channel NCHW)
    x = jax.random.normal(xkey, (2, 3, 32, 32), jnp.float32)
    cls_out, bb_out = bb_model_forward(x, params)
    jax.block_until_ready((cls_out, bb_out))
    assert cls_out.shape == (2, 4) and bb_out.shape == (2, 4)
    assert bool(jnp.all(jnp.isfinite(cls_out)) & jnp.all(jnp.isfinite(bb_out)))
    print("KERNEL_OK")
</pallas_src>

<mosaic_0001>
module attributes {stable_mosaic.version = 11 : i64} {
  func.func @matmul_bias_kernel(%arg0: i32, %arg1: memref<256x147xbf16, #tpu.memory_space<vmem>>, %arg2: memref<147x64xbf16, #tpu.memory_space<vmem>>, %arg3: memref<1x64xf32, #tpu.memory_space<vmem>>, %arg4: memref<256x64xf32, #tpu.memory_space<vmem>>) attributes {dimension_semantics = [#tpu.dimension_semantics<parallel>], iteration_bounds = array<i64: 2>, scalar_prefetch = 0 : i64, scratch_operands = 0 : i64, tpu.core_type = #tpu.core_type<tc>, window_params = [{transform_indices = @transform_0, window_bounds = array<i64: 256, 147>}, {pipeline_mode = #tpu.pipeline_mode<synchronous>, transform_indices = @transform_1, window_bounds = array<i64: 147, 64>}, {pipeline_mode = #tpu.pipeline_mode<synchronous>, transform_indices = @transform_2, window_bounds = array<i64: 1, 64>}, {transform_indices = @transform_3, window_bounds = array<i64: 256, 64>}]} {
    %c0 = arith.constant 0 : index
    %c0_0 = arith.constant 0 : index
    %0 = vector.load %arg1[%c0, %c0_0] : memref<256x147xbf16, #tpu.memory_space<vmem>>, vector<256x147xbf16>
    %c0_1 = arith.constant 0 : index
    %c0_2 = arith.constant 0 : index
    %1 = vector.load %arg2[%c0_1, %c0_2] : memref<147x64xbf16, #tpu.memory_space<vmem>>, vector<147x64xbf16>
    %cst = arith.constant dense<0.000000e+00> : vector<256x64xf32>
    %2 = tpu.matmul %0, %1, %cst {dimension_numbers = #tpu.dot_dimension_numbers<[1], [0], [0], [1], [0, 0, 1, 1], [], []>} : vector<256x147xbf16>, vector<147x64xbf16>, vector<256x64xf32> -> vector<256x64xf32>
    %c0_3 = arith.constant 0 : index
    %c0_4 = arith.constant 0 : index
    %3 = vector.load %arg3[%c0_3, %c0_4] : memref<1x64xf32, #tpu.memory_space<vmem>>, vector<1x64xf32>
    %4 = vector.broadcast %3 : vector<1x64xf32> to vector<256x64xf32>
    %5 = arith.addf %2, %4 : vector<256x64xf32>
    %cst_5 = arith.constant 0.000000e+00 : f32
    %6 = vector.broadcast %cst_5 : f32 to vector<256x64xf32>
    %7 = arith.maximumf %5, %6 : vector<256x64xf32>
    %c0_6 = arith.constant 0 : index
    %c0_7 = arith.constant 0 : index
    %8 = vector.load %arg4[%c0_6, %c0_7] : memref<256x64xf32, #tpu.memory_space<vmem>>, vector<256x64xf32>
    tpu.vector_store %arg4[%c0_6, %c0_7], %7 {strides = array<i32>} : memref<256x64xf32, #tpu.memory_space<vmem>>, vector<256x64xf32>,
    return
  }
  func.func @transform_0(%arg0: i32) -> (i32, i32) {
    %c0_i32 = arith.constant 0 : i32
    %c0_i32_0 = arith.constant 0 : i32
    return %arg0, %c0_i32 : i32, i32
  }
  func.func @transform_1(%arg0: i32) -> (i32, i32) {
    %c0_i32 = arith.constant 0 : i32
    %c0_i32_0 = arith.constant 0 : i32
    %c0_i32_1 = arith.constant 0 : i32
    return %c0_i32, %c0_i32_0 : i32, i32
  }
  func.func @transform_2(%arg0: i32) -> (i32, i32) {
    %c0_i32 = arith.constant 0 : i32
    %c0_i32_0 = arith.constant 0 : i32
    %c0_i32_1 = arith.constant 0 : i32
    return %c0_i32, %c0_i32_0 : i32, i32
  }
  func.func @transform_3(%arg0: i32) -> (i32, i32) {
    %c0_i32 = arith.constant 0 : i32
    %c0_i32_0 = arith.constant 0 : i32
    return %arg0, %c0_i32 : i32, i32
  }
}

module attributes {stable_mosaic.version = 11 : i64} {
  func.func @maxpool3x3s2_kernel(%arg0: i32, %arg1: memref<4x9x9x64xf32, #tpu.memory_space<vmem>>, %arg2: memref<1x8x8x64xf32, #tpu.memory_space<vmem>>) attributes {dimension_semantics = [#tpu.dimension_semantics<parallel>], iteration_bounds = array<i64: 2>, scalar_prefetch = 0 : i64, scratch_operands = 0 : i64, tpu.core_type = #tpu.core_type<tc>, window_params = [{transform_indices = @transform_0, window_bounds = array<i64: 4, 9, 9, 64>}, {transform_indices = @transform_1, window_bounds = array<i64: 1, 8, 8, 64>}]} {
    %c0 = arith.constant 0 : index
    %c0_0 = arith.constant 0 : index
    %c0_1 = arith.constant 0 : index
    %c0_2 = arith.constant 0 : index
    %0 = vector.load %arg1[%c0, %c0_0, %c0_1, %c0_2] : memref<4x9x9x64xf32, #tpu.memory_space<vmem>>, vector<4x9x9x64xf32>
    %1 = vector.extract_strided_slice %0 {offsets = [0, 0, 0, 0], sizes = [1, 8, 8, 64], strides = [1, 1, 1, 1]} : vector<4x9x9x64xf32> to vector<1x8x8x64xf32>
    %2 = vector.shape_cast %1 : vector<1x8x8x64xf32> to vector<8x8x64xf32>
    %3 = vector.extract_strided_slice %0 {offsets = [1, 0, 0, 0], sizes = [1, 8, 8, 64], strides = [1, 1, 1, 1]} : vector<4x9x9x64xf32> to vector<1x8x8x64xf32>
    %4 = vector.shape_cast %3 : vector<1x8x8x64xf32> to vector<8x8x64xf32>
    %5 = arith.maximumf %2, %4 : vector<8x8x64xf32>
    %6 = vector.extract_strided_slice %0 {offsets = [0, 0, 1, 0], sizes = [1, 8, 8, 64], strides = [1, 1, 1, 1]} : vector<4x9x9x64xf32> to vector<1x8x8x64xf32>
    %7 = vector.shape_cast %6 : vector<1x8x8x64xf32> to vector<8x8x64xf32>
    %8 = arith.maximumf %5, %7 : vector<8x8x64xf32>
    %9 = vector.extract_strided_slice %0 {offsets = [2, 0, 0, 0], sizes = [1, 8, 8, 64], strides = [1, 1, 1, 1]} : vector<4x9x9x64xf32> to vector<1x8x8x64xf32>
    %10 = vector.shape_cast %9 : vector<1x8x8x64xf32> to vector<8x8x64xf32>
    %11 = arith.maximumf %8, %10 : vector<8x8x64xf32>
    %12 = vector.extract_strided_slice %0 {offsets = [3, 0, 0, 0], sizes = [1, 8, 8, 64], strides = [1, 1, 1, 1]} : vector<4x9x9x64xf32> to vector<1x8x8x64xf32>
    %13 = vector.shape_cast %12 : vector<1x8x8x64xf32> to vector<8x8x64xf32>
    %14 = arith.maximumf %11, %13 : vector<8x8x64xf32>
    %15 = vector.extract_strided_slice %0 {offsets = [2, 0, 1, 0], sizes = [1, 8, 8, 64], strides = [1, 1, 1, 1]} : vector<4x9x9x64xf32> to vector<1x8x8x64xf32>
    %16 = vector.shape_cast %15 : vector<1x8x8x64xf32> to vector<8x8x64xf32>
    %17 = arith.maximumf %14, %16 : vector<8x8x64xf32>
    %18 = vector.extract_strided_slice %0 {offsets = [0, 1, 0, 0], sizes = [1, 8, 8, 64], strides = [1, 1, 1, 1]} : vector<4x9x9x64xf32> to vector<1x8x8x64xf32>
    %19 = vector.shape_cast %18 : vector<1x8x8x64xf32> to vector<8x8x64xf32>
    %20 = arith.maximumf %17, %19 : vector<8x8x64xf32>
    %21 = vector.extract_strided_slice %0 {offsets = [1, 1, 0, 0], sizes = [1, 8, 8, 64], strides = [1, 1, 1, 1]} : vector<4x9x9x64xf32> to vector<1x8x8x64xf32>
    %22 = vector.shape_cast %21 : vector<1x8x8x64xf32> to vector<8x8x64xf32>
    %23 = arith.maximumf %20, %22 : vector<8x8x64xf32>
    %24 = vector.extract_strided_slice %0 {offsets = [0, 1, 1, 0], sizes = [1, 8, 8, 64], strides = [1, 1, 1, 1]} : vector<4x9x9x64xf32> to vector<1x8x8x64xf32>
    %25 = vector.shape_cast %24 : vector<1x8x8x64xf32> to vector<8x8x64xf32>
    %26 = arith.maximumf %23, %25 : vector<8x8x64xf32>
    %c0_3 = arith.constant 0 : index
    %c0_4 = arith.constant 0 : index
    %c0_5 = arith.constant 0 : index
    %c0_6 = arith.constant 0 : index
    %27 = vector.load %arg2[%c0_3, %c0_4, %c0_5, %c0_6] : memref<1x8x8x64xf32, #tpu.memory_space<vmem>>, vector<1x8x8x64xf32>
    %28 = vector.shape_cast %27 : vector<1x8x8x64xf32> to vector<8x8x64xf32>
    %29 = vector.shape_cast %26 : vector<8x8x64xf32> to vector<1x8x8x64xf32>
    tpu.vector_store %arg2[%c0_3, %c0_4, %c0_5, %c0_6], %29 {strides = array<i32>} : memref<1x8x8x64xf32, #tpu.memory_space<vmem>>, vector<1x8x8x64xf32>,
    return
  }
  func.func @transform_0(%arg0: i32) -> (i32, i32, i32, i32) {
    %c0_i32 = arith.constant 0 : i32
    %c0_i32_0 = arith.constant 0 : i32
    %c0_i32_1 = arith.constant 0 : i32
    %c0_i32_2 = arith.constant 0 : i32
    return %arg0, %c0_i32, %c0_i32_0, %c0_i32_1 : i32, i32, i32, i32
  }
  func.func @transform_1(%arg0: i32) -> (i32, i32, i32, i32) {
    %c0_i32 = arith.constant 0 : i32
    %c0_i32_0 = arith.constant 0 : i32
    %c0_i32_1 = arith.constant 0 : i32
    %c0_i32_2 = arith.constant 0 : i32
    return %arg0, %c0_i32, %c0_i32_0, %c0_i32_1 : i32, i32, i32, i32
  }
}

module attributes {stable_mosaic.version = 11 : i64} {
  func.func @conv3x3_bn_kernel(%arg0: i32, %arg1: memref<1x10x10x64xf32, #tpu.memory_space<vmem>>, %arg2: memref<9x64x64xbf16, #tpu.memory_space<vmem>>, %arg3: memref<1x64xf32, #tpu.memory_space<vmem>>, %arg4: memref<1x64x64xf32, #tpu.memory_space<vmem>>) attributes {dimension_semantics = [#tpu.dimension_semantics<parallel>], iteration_bounds = array<i64: 2>, scalar_prefetch = 0 : i64, scratch_operands = 0 : i64, tpu.core_type = #tpu.core_type<tc>, window_params = [{transform_indices = @transform_0, window_bounds = array<i64: 1, 10, 10, 64>}, {pipeline_mode = #tpu.pipeline_mode<synchronous>, transform_indices = @transform_1, window_bounds = array<i64: 9, 64, 64>}, {pipeline_mode = #tpu.pipeline_mode<synchronous>, transform_indices = @transform_2, window_bounds = array<i64: 1, 64>}, {transform_indices = @transform_3, window_bounds = array<i64: 1, 64, 64>}]} {
    %c0 = arith.constant 0 : index
    %c0_0 = arith.constant 0 : index
    %c0_1 = arith.constant 0 : index
    %c0_2 = arith.constant 0 : index
    %0 = vector.load %arg1[%c0, %c0_0, %c0_1, %c0_2] : memref<1x10x10x64xf32, #tpu.memory_space<vmem>>, vector<1x10x10x64xf32>
    %1 = vector.shape_cast %0 : vector<1x10x10x64xf32> to vector<10x10x64xf32>
    %cst = arith.constant 0.000000e+00 : f32
    %2 = vector.broadcast %cst : f32 to vector<64x64xf32>
    %3 = vector.extract_strided_slice %1 {offsets = [0, 0, 0], sizes = [8, 8, 64], strides = [1, 1, 1]} : vector<10x10x64xf32> to vector<8x8x64xf32>
    %4 = vector.shape_cast %3 : vector<8x8x64xf32> to vector<64x64xf32>
    %5 = arith.truncf %4 : vector<64x64xf32> to vector<64x64xbf16>
    %c0_3 = arith.constant 0 : index
    %c0_4 = arith.constant 0 : index
    %c0_5 = arith.constant 0 : index
    %6 = vector.load %arg2[%c0_3, %c0_4, %c0_5] : memref<9x64x64xbf16, #tpu.memory_space<vmem>>, vector<1x64x64xbf16>
    %7 = vector.shape_cast %6 : vector<1x64x64xbf16> to vector<64x64xbf16>
    %cst_6 = arith.constant dense<0.000000e+00> : vector<64x64xf32>
    %8 = tpu.matmul %5, %7, %cst_6 {dimension_numbers = #tpu.dot_dimension_numbers<[1], [0], [0], [1], [0, 0, 1, 1], [], []>} : vector<64x64xbf16>, vector<64x64xbf16>, vector<64x64xf32> -> vector<64x64xf32>
    %9 = arith.addf %2, %8 : vector<64x64xf32>
    %10 = vector.extract_strided_slice %1 {offsets = [0, 1, 0], sizes = [8, 8, 64], strides = [1, 1, 1]} : vector<10x10x64xf32> to vector<8x8x64xf32>
    %11 = vector.shape_cast %10 : vector<8x8x64xf32> to vector<64x64xf32>
    %12 = arith.truncf %11 : vector<64x64xf32> to vector<64x64xbf16>
    %c1 = arith.constant 1 : index
    %c0_7 = arith.constant 0 : index
    %c0_8 = arith.constant 0 : index
    %13 = vector.load %arg2[%c1, %c0_7, %c0_8] : memref<9x64x64xbf16, #tpu.memory_space<vmem>>, vector<1x64x64xbf16>
    %14 = vector.shape_cast %13 : vector<1x64x64xbf16> to vector<64x64xbf16>
    %cst_9 = arith.constant dense<0.000000e+00> : vector<64x64xf32>
    %15 = tpu.matmul %12, %14, %cst_9 {dimension_numbers = #tpu.dot_dimension_numbers<[1], [0], [0], [1], [0, 0, 1, 1], [], []>} : vector<64x64xbf16>, vector<64x64xbf16>, vector<64x64xf32> -> vector<64x64xf32>
    %16 = arith.addf %9, %15 : vector<64x64xf32>
    %17 = vector.extract_strided_slice %1 {offsets = [0, 2, 0], sizes = [8, 8, 64], strides = [1, 1, 1]} : vector<10x10x64xf32> to vector<8x8x64xf32>
    %18 = vector.shape_cast %17 : vector<8x8x64xf32> to vector<64x64xf32>
    %19 = arith.truncf %18 : vector<64x64xf32> to vector<64x64xbf16>
    %c2 = arith.constant 2 : index
    %c0_10 = arith.constant 0 : index
    %c0_11 = arith.constant 0 : index
    %20 = vector.load %arg2[%c2, %c0_10, %c0_11] : memref<9x64x64xbf16, #tpu.memory_space<vmem>>, vector<1x64x64xbf16>
    %21 = vector.shape_cast %20 : vector<1x64x64xbf16> to vector<64x64xbf16>
    %cst_12 = arith.constant dense<0.000000e+00> : vector<64x64xf32>
    %22 = tpu.matmul %19, %21, %cst_12 {dimension_numbers = #tpu.dot_dimension_numbers<[1], [0], [0], [1], [0, 0, 1, 1], [], []>} : vector<64x64xbf16>, vector<64x64xbf16>, vector<64x64xf32> -> vector<64x64xf32>
    %23 = arith.addf %16, %22 : vector<64x64xf32>
    %24 = vector.extract_strided_slice %1 {offsets = [1, 0, 0], sizes = [8, 8, 64], strides = [1, 1, 1]} : vector<10x10x64xf32> to vector<8x8x64xf32>
    %25 = vector.shape_cast %24 : vector<8x8x64xf32> to vector<64x64xf32>
    %26 = arith.truncf %25 : vector<64x64xf32> to vector<64x64xbf16>
    %c3 = arith.constant 3 : index
    %c0_13 = arith.constant 0 : index
    %c0_14 = arith.constant 0 : index
    %27 = vector.load %arg2[%c3, %c0_13, %c0_14] : memref<9x64x64xbf16, #tpu.memory_space<vmem>>, vector<1x64x64xbf16>
    %28 = vector.shape_cast %27 : vector<1x64x64xbf16> to vector<64x64xbf16>
    %cst_15 = arith.constant dense<0.000000e+00> : vector<64x64xf32>
    %29 = tpu.matmul %26, %28, %cst_15 {dimension_numbers = #tpu.dot_dimension_numbers<[1], [0], [0], [1], [0, 0, 1, 1], [], []>} : vector<64x64xbf16>, vector<64x64xbf16>, vector<64x64xf32> -> vector<64x64xf32>
    %30 = arith.addf %23, %29 : vector<64x64xf32>
    %31 = vector.extract_strided_slice %1 {offsets = [1, 1, 0], sizes = [8, 8, 64], strides = [1, 1, 1]} : vector<10x10x64xf32> to vector<8x8x64xf32>
    %32 = vector.shape_cast %31 : vector<8x8x64xf32> to vector<64x64xf32>
    %33 = arith.truncf %32 : vector<64x64xf32> to vector<64x64xbf16>
    %c4 = arith.constant 4 : index
    %c0_16 = arith.constant 0 : index
    %c0_17 = arith.constant 0 : index
    %34 = vector.load %arg2[%c4, %c0_16, %c0_17] : memref<9x64x64xbf16, #tpu.memory_space<vmem>>, vector<1x64x64xbf16>
    %35 = vector.shape_cast %34 : vector<1x64x64xbf16> to vector<64x64xbf16>
    %cst_18 = arith.constant dense<0.000000e+00> : vector<64x64xf32>
    %36 = tpu.matmul %33, %35, %cst_18 {dimension_numbers = #tpu.dot_dimension_numbers<[1], [0], [0], [1], [0, 0, 1, 1], [], []>} : vector<64x64xbf16>, vector<64x64xbf16>, vector<64x64xf32> -> vector<64x64xf32>
    %37 = arith.addf %30, %36 : vector<64x64xf32>
    %38 = vector.extract_strided_slice %1 {offsets = [1, 2, 0], sizes = [8, 8, 64], strides = [1, 1, 1]} : vector<10x10x64xf32> to vector<8x8x64xf32>
    %39 = vector.shape_cast %38 : vector<8x8x64xf32> to vector<64x64xf32>
    %40 = arith.truncf %39 : vector<64x64xf32> to vector<64x64xbf16>
    %c5 = arith.constant 5 : index
    %c0_19 = arith.constant 0 : index
    %c0_20 = arith.constant 0 : index
    %41 = vector.load %arg2[%c5, %c0_19, %c0_20] : memref<9x64x64xbf16, #tpu.memory_space<vmem>>, vector<1x64x64xbf16>
    %42 = vector.shape_cast %41 : vector<1x64x64xbf16> to vector<64x64xbf16>
    %cst_21 = arith.constant dense<0.000000e+00> : vector<64x64xf32>
    %43 = tpu.matmul %40, %42, %cst_21 {dimension_numbers = #tpu.dot_dimension_numbers<[1], [0], [0], [1], [0, 0, 1, 1], [], []>} : vector<64x64xbf16>, vector<64x64xbf16>, vector<64x64xf32> -> vector<64x64xf32>
    %44 = arith.addf %37, %43 : vector<64x64xf32>
    %45 = vector.extract_strided_slice %1 {offsets = [2, 0, 0], sizes = [8, 8, 64], strides = [1, 1, 1]} : vector<10x10x64xf32> to vector<8x8x64xf32>
    %46 = vector.shape_cast %45 : vector<8x8x64xf32> to vector<64x64xf32>
    %47 = arith.truncf %46 : vector<64x64xf32> to vector<64x64xbf16>
    %c6 = arith.constant 6 : index
    %c0_22 = arith.constant 0 : index
    %c0_23 = arith.constant 0 : index
    %48 = vector.load %arg2[%c6, %c0_22, %c0_23] : memref<9x64x64xbf16, #tpu.memory_space<vmem>>, vector<1x64x64xbf16>
    %49 = vector.shape_cast %48 : vector<1x64x64xbf16> to vector<64x64xbf16>
    %cst_24 = arith.constant dense<0.000000e+00> : vector<64x64xf32>
    %50 = tpu.matmul %47, %49, %cst_24 {dimension_numbers = #tpu.dot_dimension_numbers<[1], [0], [0], [1], [0, 0, 1, 1], [], []>} : vector<64x64xbf16>, vector<64x64xbf16>, vector<64x64xf32> -> vector<64x64xf32>
    %51 = arith.addf %44, %50 : vector<64x64xf32>
    %52 = vector.extract_strided_slice %1 {offsets = [2, 1, 0], sizes = [8, 8, 64], strides = [1, 1, 1]} : vector<10x10x64xf32> to vector<8x8x64xf32>
    %53 = vector.shape_cast %52 : vector<8x8x64xf32> to vector<64x64xf32>
    %54 = arith.truncf %53 : vector<64x64xf32> to vector<64x64xbf16>
    %c7 = arith.constant 7 : index
    %c0_25 = arith.constant 0 : index
    %c0_26 = arith.constant 0 : index
    %55 = vector.load %arg2[%c7, %c0_25, %c0_26] : memref<9x64x64xbf16, #tpu.memory_space<vmem>>, vector<1x64x64xbf16>
    %56 = vector.shape_cast %55 : vector<1x64x64xbf16> to vector<64x64xbf16>
    %cst_27 = arith.constant dense<0.000000e+00> : vector<64x64xf32>
    %57 = tpu.matmul %54, %56, %cst_27 {dimension_numbers = #tpu.dot_dimension_numbers<[1], [0], [0], [1], [0, 0, 1, 1], [], []>} : vector<64x64xbf16>, vector<64x64xbf16>, vector<64x64xf32> -> vector<64x64xf32>
    %58 = arith.addf %51, %57 : vector<64x64xf32>
    %59 = vector.extract_strided_slice %1 {offsets = [2, 2, 0], sizes = [8, 8, 64], strides = [1, 1, 1]} : vector<10x10x64xf32> to vector<8x8x64xf32>
    %60 = vector.shape_cast %59 : vector<8x8x64xf32> to vector<64x64xf32>
    %61 = arith.truncf %60 : vector<64x64xf32> to vector<64x64xbf16>
    %c8 = arith.constant 8 : index
    %c0_28 = arith.constant 0 : index
    %c0_29 = arith.constant 0 : index
    %62 = vector.load %arg2[%c8, %c0_28, %c0_29] : memref<9x64x64xbf16, #tpu.memory_space<vmem>>, vector<1x64x64xbf16>
    %63 = vector.shape_cast %62 : vector<1x64x64xbf16> to vector<64x64xbf16>
    %cst_30 = arith.constant dense<0.000000e+00> : vector<64x64xf32>
    %64 = tpu.matmul %61, %63, %cst_30 {dimension_numbers = #tpu.dot_dimension_numbers<[1], [0], [0], [1], [0, 0, 1, 1], [], []>} : vector<64x64xbf16>, vector<64x64xbf16>, vector<64x64xf32> -> vector<64x64xf32>
    %65 = arith.addf %58, %64 : vector<64x64xf32>
    %c0_31 = arith.constant 0 : index
    %c0_32 = arith.constant 0 : index
    %66 = vector.load %arg3[%c0_31, %c0_32] : memref<1x64xf32, #tpu.memory_space<vmem>>, vector<1x64xf32>
    %67 = vector.broadcast %66 : vector<1x64xf32> to vector<64x64xf32>
    %68 = arith.addf %65, %67 : vector<64x64xf32>
    %cst_33 = arith.constant 0.000000e+00 : f32
    %69 = vector.broadcast %cst_33 : f32 to vector<64x64xf32>
    %70 = arith.maximumf %68, %69 : vector<64x64xf32>
    %c0_34 = arith.constant 0 : index
    %c0_35 = arith.constant 0 : index
    %c0_36 = arith.constant 0 : index
    %71 = vector.load %arg4[%c0_34, %c0_35, %c0_36] : memref<1x64x64xf32, #tpu.memory_space<vmem>>, vector<1x64x64xf32>
    %72 = vector.shape_cast %71 : vector<1x64x64xf32> to vector<64x64xf32>
    %73 = vector.shape_cast %70 : vector<64x64xf32> to vector<1x64x64xf32>
    tpu.vector_store %arg4[%c0_34, %c0_35, %c0_36], %73 {strides = array<i32>} : memref<1x64x64xf32, #tpu.memory_space<vmem>>, vector<1x64x64xf32>,
    return
  }
  func.func @transform_0(%arg0: i32) -> (i32, i32, i32, i32) {
    %c0_i32 = arith.constant 0 : i32
    %c0_i32_0 = arith.constant 0 : i32
    %c0_i32_1 = arith.constant 0 : i32
    %c0_i32_2 = arith.constant 0 : i32
    return %arg0, %c0_i32, %c0_i32_0, %c0_i32_1 : i32, i32, i32, i32
  }
  func.func @transform_1(%arg0: i32) -> (i32, i32, i32) {
    %c0_i32 = arith.constant 0 : i32
    %c0_i32_0 = arith.constant 0 : i32
    %c0_i32_1 = arith.constant 0 : i32
    %c0_i32_2 = arith.constant 0 : i32
    return %c0_i32, %c0_i32_0, %c0_i32_1 : i32, i32, i32
  }
  func.func @transform_2(%arg0: i32) -> (i32, i32) {
    %c0_i32 = arith.constant 0 : i32
    %c0_i32_0 = arith.constant 0 : i32
    %c0_i32_1 = arith.constant 0 : i32
    return %c0_i32, %c0_i32_0 : i32, i32
  }
  func.func @transform_3(%arg0: i32) -> (i32, i32, i32) {
    %c0_i32 = arith.constant 0 : i32
    %c0_i32_0 = arith.constant 0 : i32
    %c0_i32_1 = arith.constant 0 : i32
    return %arg0, %c0_i32, %c0_i32_0 : i32, i32, i32
  }
}

module attributes {stable_mosaic.version = 11 : i64} {
  func.func @conv3x3_bn_res_kernel(%arg0: i32, %arg1: memref<1x10x10x64xf32, #tpu.memory_space<vmem>>, %arg2: memref<9x64x64xbf16, #tpu.memory_space<vmem>>, %arg3: memref<1x64xf32, #tpu.memory_space<vmem>>, %arg4: memref<1x64x64xf32, #tpu.memory_space<vmem>>, %arg5: memref<1x64x64xf32, #tpu.memory_space<vmem>>) attributes {dimension_semantics = [#tpu.dimension_semantics<parallel>], iteration_bounds = array<i64: 2>, scalar_prefetch = 0 : i64, scratch_operands = 0 : i64, tpu.core_type = #tpu.core_type<tc>, window_params = [{transform_indices = @transform_0, window_bounds = array<i64: 1, 10, 10, 64>}, {pipeline_mode = #tpu.pipeline_mode<synchronous>, transform_indices = @transform_1, window_bounds = array<i64: 9, 64, 64>}, {pipeline_mode = #tpu.pipeline_mode<synchronous>, transform_indices = @transform_2, window_bounds = array<i64: 1, 64>}, {transform_indices = @transform_3, window_bounds = array<i64: 1, 64, 64>}, {transform_indices = @transform_4, window_bounds = array<i64: 1, 64, 64>}]} {
    %c0 = arith.constant 0 : index
    %c0_0 = arith.constant 0 : index
    %c0_1 = arith.constant 0 : index
    %c0_2 = arith.constant 0 : index
    %0 = vector.load %arg1[%c0, %c0_0, %c0_1, %c0_2] : memref<1x10x10x64xf32, #tpu.memory_space<vmem>>, vector<1x10x10x64xf32>
    %1 = vector.shape_cast %0 : vector<1x10x10x64xf32> to vector<10x10x64xf32>
    %cst = arith.constant 0.000000e+00 : f32
    %2 = vector.broadcast %cst : f32 to vector<64x64xf32>
    %3 = vector.extract_strided_slice %1 {offsets = [0, 0, 0], sizes = [8, 8, 64], strides = [1, 1, 1]} : vector<10x10x64xf32> to vector<8x8x64xf32>
    %4 = vector.shape_cast %3 : vector<8x8x64xf32> to vector<64x64xf32>
    %5 = arith.truncf %4 : vector<64x64xf32> to vector<64x64xbf16>
    %c0_3 = arith.constant 0 : index
    %c0_4 = arith.constant 0 : index
    %c0_5 = arith.constant 0 : index
    %6 = vector.load %arg2[%c0_3, %c0_4, %c0_5] : memref<9x64x64xbf16, #tpu.memory_space<vmem>>, vector<1x64x64xbf16>
    %7 = vector.shape_cast %6 : vector<1x64x64xbf16> to vector<64x64xbf16>
    %cst_6 = arith.constant dense<0.000000e+00> : vector<64x64xf32>
    %8 = tpu.matmul %5, %7, %cst_6 {dimension_numbers = #tpu.dot_dimension_numbers<[1], [0], [0], [1], [0, 0, 1, 1], [], []>} : vector<64x64xbf16>, vector<64x64xbf16>, vector<64x64xf32> -> vector<64x64xf32>
    %9 = arith.addf %2, %8 : vector<64x64xf32>
    %10 = vector.extract_strided_slice %1 {offsets = [0, 1, 0], sizes = [8, 8, 64], strides = [1, 1, 1]} : vector<10x10x64xf32> to vector<8x8x64xf32>
    %11 = vector.shape_cast %10 : vector<8x8x64xf32> to vector<64x64xf32>
    %12 = arith.truncf %11 : vector<64x64xf32> to vector<64x64xbf16>
    %c1 = arith.constant 1 : index
    %c0_7 = arith.constant 0 : index
    %c0_8 = arith.constant 0 : index
    %13 = vector.load %arg2[%c1, %c0_7, %c0_8] : memref<9x64x64xbf16, #tpu.memory_space<vmem>>, vector<1x64x64xbf16>
    %14 = vector.shape_cast %13 : vector<1x64x64xbf16> to vector<64x64xbf16>
    %cst_9 = arith.constant dense<0.000000e+00> : vector<64x64xf32>
    %15 = tpu.matmul %12, %14, %cst_9 {dimension_numbers = #tpu.dot_dimension_numbers<[1], [0], [0], [1], [0, 0, 1, 1], [], []>} : vector<64x64xbf16>, vector<64x64xbf16>, vector<64x64xf32> -> vector<64x64xf32>
    %16 = arith.addf %9, %15 : vector<64x64xf32>
    %17 = vector.extract_strided_slice %1 {offsets = [0, 2, 0], sizes = [8, 8, 64], strides = [1, 1, 1]} : vector<10x10x64xf32> to vector<8x8x64xf32>
    %18 = vector.shape_cast %17 : vector<8x8x64xf32> to vector<64x64xf32>
    %19 = arith.truncf %18 : vector<64x64xf32> to vector<64x64xbf16>
    %c2 = arith.constant 2 : index
    %c0_10 = arith.constant 0 : index
    %c0_11 = arith.constant 0 : index
    %20 = vector.load %arg2[%c2, %c0_10, %c0_11] : memref<9x64x64xbf16, #tpu.memory_space<vmem>>, vector<1x64x64xbf16>
    %21 = vector.shape_cast %20 : vector<1x64x64xbf16> to vector<64x64xbf16>
    %cst_12 = arith.constant dense<0.000000e+00> : vector<64x64xf32>
    %22 = tpu.matmul %19, %21, %cst_12 {dimension_numbers = #tpu.dot_dimension_numbers<[1], [0], [0], [1], [0, 0, 1, 1], [], []>} : vector<64x64xbf16>, vector<64x64xbf16>, vector<64x64xf32> -> vector<64x64xf32>
    %23 = arith.addf %16, %22 : vector<64x64xf32>
    %24 = vector.extract_strided_slice %1 {offsets = [1, 0, 0], sizes = [8, 8, 64], strides = [1, 1, 1]} : vector<10x10x64xf32> to vector<8x8x64xf32>
    %25 = vector.shape_cast %24 : vector<8x8x64xf32> to vector<64x64xf32>
    %26 = arith.truncf %25 : vector<64x64xf32> to vector<64x64xbf16>
    %c3 = arith.constant 3 : index
    %c0_13 = arith.constant 0 : index
    %c0_14 = arith.constant 0 : index
    %27 = vector.load %arg2[%c3, %c0_13, %c0_14] : memref<9x64x64xbf16, #tpu.memory_space<vmem>>, vector<1x64x64xbf16>
    %28 = vector.shape_cast %27 : vector<1x64x64xbf16> to vector<64x64xbf16>
    %cst_15 = arith.constant dense<0.000000e+00> : vector<64x64xf32>
    %29 = tpu.matmul %26, %28, %cst_15 {dimension_numbers = #tpu.dot_dimension_numbers<[1], [0], [0], [1], [0, 0, 1, 1], [], []>} : vector<64x64xbf16>, vector<64x64xbf16>, vector<64x64xf32> -> vector<64x64xf32>
    %30 = arith.addf %23, %29 : vector<64x64xf32>
    %31 = vector.extract_strided_slice %1 {offsets = [1, 1, 0], sizes = [8, 8, 64], strides = [1, 1, 1]} : vector<10x10x64xf32> to vector<8x8x64xf32>
    %32 = vector.shape_cast %31 : vector<8x8x64xf32> to vector<64x64xf32>
    %33 = arith.truncf %32 : vector<64x64xf32> to vector<64x64xbf16>
    %c4 = arith.constant 4 : index
    %c0_16 = arith.constant 0 : index
    %c0_17 = arith.constant 0 : index
    %34 = vector.load %arg2[%c4, %c0_16, %c0_17] : memref<9x64x64xbf16, #tpu.memory_space<vmem>>, vector<1x64x64xbf16>
    %35 = vector.shape_cast %34 : vector<1x64x64xbf16> to vector<64x64xbf16>
    %cst_18 = arith.constant dense<0.000000e+00> : vector<64x64xf32>
    %36 = tpu.matmul %33, %35, %cst_18 {dimension_numbers = #tpu.dot_dimension_numbers<[1], [0], [0], [1], [0, 0, 1, 1], [], []>} : vector<64x64xbf16>, vector<64x64xbf16>, vector<64x64xf32> -> vector<64x64xf32>
    %37 = arith.addf %30, %36 : vector<64x64xf32>
    %38 = vector.extract_strided_slice %1 {offsets = [1, 2, 0], sizes = [8, 8, 64], strides = [1, 1, 1]} : vector<10x10x64xf32> to vector<8x8x64xf32>
    %39 = vector.shape_cast %38 : vector<8x8x64xf32> to vector<64x64xf32>
    %40 = arith.truncf %39 : vector<64x64xf32> to vector<64x64xbf16>
    %c5 = arith.constant 5 : index
    %c0_19 = arith.constant 0 : index
    %c0_20 = arith.constant 0 : index
    %41 = vector.load %arg2[%c5, %c0_19, %c0_20] : memref<9x64x64xbf16, #tpu.memory_space<vmem>>, vector<1x64x64xbf16>
    %42 = vector.shape_cast %41 : vector<1x64x64xbf16> to vector<64x64xbf16>
    %cst_21 = arith.constant dense<0.000000e+00> : vector<64x64xf32>
    %43 = tpu.matmul %40, %42, %cst_21 {dimension_numbers = #tpu.dot_dimension_numbers<[1], [0], [0], [1], [0, 0, 1, 1], [], []>} : vector<64x64xbf16>, vector<64x64xbf16>, vector<64x64xf32> -> vector<64x64xf32>
    %44 = arith.addf %37, %43 : vector<64x64xf32>
    %45 = vector.extract_strided_slice %1 {offsets = [2, 0, 0], sizes = [8, 8, 64], strides = [1, 1, 1]} : vector<10x10x64xf32> to vector<8x8x64xf32>
    %46 = vector.shape_cast %45 : vector<8x8x64xf32> to vector<64x64xf32>
    %47 = arith.truncf %46 : vector<64x64xf32> to vector<64x64xbf16>
    %c6 = arith.constant 6 : index
    %c0_22 = arith.constant 0 : index
    %c0_23 = arith.constant 0 : index
    %48 = vector.load %arg2[%c6, %c0_22, %c0_23] : memref<9x64x64xbf16, #tpu.memory_space<vmem>>, vector<1x64x64xbf16>
    %49 = vector.shape_cast %48 : vector<1x64x64xbf16> to vector<64x64xbf16>
    %cst_24 = arith.constant dense<0.000000e+00> : vector<64x64xf32>
    %50 = tpu.matmul %47, %49, %cst_24 {dimension_numbers = #tpu.dot_dimension_numbers<[1], [0], [0], [1], [0, 0, 1, 1], [], []>} : vector<64x64xbf16>, vector<64x64xbf16>, vector<64x64xf32> -> vector<64x64xf32>
    %51 = arith.addf %44, %50 : vector<64x64xf32>
    %52 = vector.extract_strided_slice %1 {offsets = [2, 1, 0], sizes = [8, 8, 64], strides = [1, 1, 1]} : vector<10x10x64xf32> to vector<8x8x64xf32>
    %53 = vector.shape_cast %52 : vector<8x8x64xf32> to vector<64x64xf32>
    %54 = arith.truncf %53 : vector<64x64xf32> to vector<64x64xbf16>
    %c7 = arith.constant 7 : index
    %c0_25 = arith.constant 0 : index
    %c0_26 = arith.constant 0 : index
    %55 = vector.load %arg2[%c7, %c0_25, %c0_26] : memref<9x64x64xbf16, #tpu.memory_space<vmem>>, vector<1x64x64xbf16>
    %56 = vector.shape_cast %55 : vector<1x64x64xbf16> to vector<64x64xbf16>
    %cst_27 = arith.constant dense<0.000000e+00> : vector<64x64xf32>
    %57 = tpu.matmul %54, %56, %cst_27 {dimension_numbers = #tpu.dot_dimension_numbers<[1], [0], [0], [1], [0, 0, 1, 1], [], []>} : vector<64x64xbf16>, vector<64x64xbf16>, vector<64x64xf32> -> vector<64x64xf32>
    %58 = arith.addf %51, %57 : vector<64x64xf32>
    %59 = vector.extract_strided_slice %1 {offsets = [2, 2, 0], sizes = [8, 8, 64], strides = [1, 1, 1]} : vector<10x10x64xf32> to vector<8x8x64xf32>
    %60 = vector.shape_cast %59 : vector<8x8x64xf32> to vector<64x64xf32>
    %61 = arith.truncf %60 : vector<64x64xf32> to vector<64x64xbf16>
    %c8 = arith.constant 8 : index
    %c0_28 = arith.constant 0 : index
    %c0_29 = arith.constant 0 : index
    %62 = vector.load %arg2[%c8, %c0_28, %c0_29] : memref<9x64x64xbf16, #tpu.memory_space<vmem>>, vector<1x64x64xbf16>
    %63 = vector.shape_cast %62 : vector<1x64x64xbf16> to vector<64x64xbf16>
    %cst_30 = arith.constant dense<0.000000e+00> : vector<64x64xf32>
    %64 = tpu.matmul %61, %63, %cst_30 {dimension_numbers = #tpu.dot_dimension_numbers<[1], [0], [0], [1], [0, 0, 1, 1], [], []>} : vector<64x64xbf16>, vector<64x64xbf16>, vector<64x64xf32> -> vector<64x64xf32>
    %65 = arith.addf %58, %64 : vector<64x64xf32>
    %c0_31 = arith.constant 0 : index
    %c0_32 = arith.constant 0 : index
    %66 = vector.load %arg3[%c0_31, %c0_32] : memref<1x64xf32, #tpu.memory_space<vmem>>, vector<1x64xf32>
    %67 = vector.broadcast %66 : vector<1x64xf32> to vector<64x64xf32>
    %68 = arith.addf %65, %67 : vector<64x64xf32>
    %c0_33 = arith.constant 0 : index
    %c0_34 = arith.constant 0 : index
    %c0_35 = arith.constant 0 : index
    %69 = vector.load %arg4[%c0_33, %c0_34, %c0_35] : memref<1x64x64xf32, #tpu.memory_space<vmem>>, vector<1x64x64xf32>
    %70 = vector.shape_cast %69 : vector<1x64x64xf32> to vector<64x64xf32>
    %71 = arith.addf %68, %70 : vector<64x64xf32>
    %cst_36 = arith.constant 0.000000e+00 : f32
    %72 = vector.broadcast %cst_36 : f32 to vector<64x64xf32>
    %73 = arith.maximumf %71, %72 : vector<64x64xf32>
    %c0_37 = arith.constant 0 : index
    %c0_38 = arith.constant 0 : index
    %c0_39 = arith.constant 0 : index
    %74 = vector.load %arg5[%c0_37, %c0_38, %c0_39] : memref<1x64x64xf32, #tpu.memory_space<vmem>>, vector<1x64x64xf32>
    %75 = vector.shape_cast %74 : vector<1x64x64xf32> to vector<64x64xf32>
    %76 = vector.shape_cast %73 : vector<64x64xf32> to vector<1x64x64xf32>
    tpu.vector_store %arg5[%c0_37, %c0_38, %c0_39], %76 {strides = array<i32>} : memref<1x64x64xf32, #tpu.memory_space<vmem>>, vector<1x64x64xf32>,
    return
  }
  func.func @transform_0(%arg0: i32) -> (i32, i32, i32, i32) {
    %c0_i32 = arith.constant 0 : i32
    %c0_i32_0 = arith.constant 0 : i32
    %c0_i32_1 = arith.constant 0 : i32
    %c0_i32_2 = arith.constant 0 : i32
    return %arg0, %c0_i32, %c0_i32_0, %c0_i32_1 : i32, i32, i32, i32
  }
  func.func @transform_1(%arg0: i32) -> (i32, i32, i32) {
    %c0_i32 = arith.constant 0 : i32
    %c0_i32_0 = arith.constant 0 : i32
    %c0_i32_1 = arith.constant 0 : i32
    %c0_i32_2 = arith.constant 0 : i32
    return %c0_i32, %c0_i32_0, %c0_i32_1 : i32, i32, i32
  }
  func.func @transform_2(%arg0: i32) -> (i32, i32) {
    %c0_i32 = arith.constant 0 : i32
    %c0_i32_0 = arith.constant 0 : i32
    %c0_i32_1 = arith.constant 0 : i32
    return %c0_i32, %c0_i32_0 : i32, i32
  }
  func.func @transform_3(%arg0: i32) -> (i32, i32, i32) {
    %c0_i32 = arith.constant 0 : i32
    %c0_i32_0 = arith.constant 0 : i32
    %c0_i32_1 = arith.constant 0 : i32
    return %arg0, %c0_i32, %c0_i32_0 : i32, i32, i32
  }
  func.func @transform_4(%arg0: i32) -> (i32, i32, i32) {
    %c0_i32 = arith.constant 0 : i32
    %c0_i32_0 = arith.constant 0 : i32
    %c0_i32_1 = arith.constant 0 : i32
    return %arg0, %c0_i32, %c0_i32_0 : i32, i32, i32
  }
}

module attributes {stable_mosaic.version = 11 : i64} {
  func.func @relu_avgpool_heads_kernel(%arg0: memref<2x64x64xf32, #tpu.memory_space<vmem>>, %arg1: memref<64x8xf32, #tpu.memory_space<vmem>>, %arg2: memref<1x8xf32, #tpu.memory_space<vmem>>, %arg3: memref<2x8xf32, #tpu.memory_space<vmem>>) attributes {dimension_semantics = [], scalar_prefetch = 0 : i64, scratch_operands = 0 : i64, tpu.core_type = #tpu.core_type<tc>} {
    %c0 = arith.constant 0 : index
    %c0_0 = arith.constant 0 : index
    %c0_1 = arith.constant 0 : index
    %0 = vector.load %arg0[%c0, %c0_0, %c0_1] : memref<2x64x64xf32, #tpu.memory_space<vmem>>, vector<2x64x64xf32>
    %cst = arith.constant 0.000000e+00 : f32
    %1 = vector.broadcast %cst : f32 to vector<2x64x64xf32>
    %2 = arith.maximumf %0, %1 : vector<2x64x64xf32>
    %cst_2 = arith.constant dense<0.000000e+00> : vector<2x64xf32>
    %3 = vector.multi_reduction <add>, %2, %cst_2 [1] : vector<2x64x64xf32> to vector<2x64xf32>
    %cst_3 = arith.constant 6.400000e+01 : f32
    %4 = vector.broadcast %cst_3 : f32 to vector<2x64xf32>
    %5 = arith.divf %3, %4 : vector<2x64xf32>
    %c0_4 = arith.constant 0 : index
    %c0_5 = arith.constant 0 : index
    %6 = vector.load %arg1[%c0_4, %c0_5] : memref<64x8xf32, #tpu.memory_space<vmem>>, vector<64x8xf32>
    %cst_6 = arith.constant dense<0.000000e+00> : vector<2x8xf32>
    %7 = tpu.matmul %5, %6, %cst_6 {dimension_numbers = #tpu.dot_dimension_numbers<[1], [0], [0], [1], [0, 0, 1, 1], [], []>} : vector<2x64xf32>, vector<64x8xf32>, vector<2x8xf32> -> vector<2x8xf32>
    %c0_7 = arith.constant 0 : index
    %c0_8 = arith.constant 0 : index
    %8 = vector.load %arg2[%c0_7, %c0_8] : memref<1x8xf32, #tpu.memory_space<vmem>>, vector<1x8xf32>
    %9 = vector.broadcast %8 : vector<1x8xf32> to vector<2x8xf32>
    %10 = arith.addf %7, %9 : vector<2x8xf32>
    %c0_9 = arith.constant 0 : index
    %c0_10 = arith.constant 0 : index
    %11 = vector.load %arg3[%c0_9, %c0_10] : memref<2x8xf32, #tpu.memory_space<vmem>>, vector<2x8xf32>
    tpu.vector_store %arg3[%c0_9, %c0_10], %10 {strides = array<i32>} : memref<2x8xf32, #tpu.memory_space<vmem>>, vector<2x8xf32>,
    return
  }
}

</mosaic_0001>

<bundles_post_ra>
// kernel: bb_model_forward.9
= control target key start
LH: loop header
LB: loop body
LE: loop exit
PB: predicated region body
PF: predicated region fallthrough
CT: control target
= control target key end

     0   :  { %s965_s12 = smov 0   ;;  %s1172_s0 = inlined_call_operand.vmem [shape: bf16[512,147], index: 0, kind: input, shape index: {}]   ;;  %s1173_s1 = inlined_call_operand.vmem [shape: bf16[147,64], index: 1, kind: input, shape index: {}]   ;;  %s1174_s2 = inlined_call_operand.vmem [shape: f32[1,64], index: 2, kind: input, shape index: {}]   ;;  %s1175_s3 = inlined_call_operand.vmem [shape: f32[512,64], index: 3, kind: output, shape index: {}]  }
   0x1 LB: > { %s775_s13 = sadd.s32 4294967295, %s941_s12   ;;  %p779_p0 = scmp.ge.s32.totalorder %s941_s12, 1  ;;  %s941_s12 = sphi %s965_s12, %s13_s12  }
   0x2   : > { %p139_p1 = scmp.lt.s32.totalorder %s941_s12, 3 }
   0x4   : > { %p140_p2 = pnand %p779_p0, %p139_p1 }
   0x5   : > { %s780_s20 = sshll.u32 (!%p140_p2), %s775_s13, 5 }
   0x6   : > { %143 = sbr.rel (%p140_p2) target bundleno = 310 (0x136), region = 32  ;;  %p165_p3 = scmp.lt.s32.totalorder (!%p140_p2), %s780_s20, 63 }
   0xb   : > { %v877_v0 = vld [vmem:[%s1173_s1 + $0x38] sm:$0xff]   ;;  %v943_v1 = vmov 0   ;;  %v878_v2 = vld [vmem:[%s1173_s1 + $0x30] sm:$0xff]   ;;  %v879_v3 = vld [vmem:[%s1173_s1 + $0x28] sm:$0xff]   ;;  %s1177_s20 = smov (!%p165_p3, %s780_s20), 63  ;;  %vm437_vm0 = vcmask 154624  }
   0xc   : > { %493 = vmatprep.subr.bf16.mxu0 %v943_v1  ;;  %847 = vmatprep.subr.bf16.mxu1 %v943_v1  ;;  %v880_v4 = vld [vmem:[%s1173_s1 + $0x20] sm:$0xff]   ;;  %s846_s23 = sshll.u32 %s1177_s20, 3  ;;  %v881_v5 = vld [vmem:[%s1173_s1 + $0x18] sm:$0xff]   ;;  %v882_v8 = vld [vmem:[%s1173_s1 + $0x10] sm:$0xff]   ;;  %vm486_vm1 = vcmask 1040384   ;;  %vm487_vm2 = vcmask 1041408  }
   0xd   : > { %494 = vmatpush1.bf16.msra.mxu0 %v877_v0  ;;  %857 = vmatpush1.bf16.msra.mxu1 %v877_v0  ;;  %s993_s26 = scalar_lea.vmem %s1172_s0, %s846_s23  ;;  %v883_v9 = vld [vmem:[%s1173_s1 + $0x8] sm:$0xff]   ;;  %v944_v10 = vmov 65535   ;;  %v884_v12 = vld [vmem:[%s1173_s1] sm:$0xff]   ;;  %s1073_s17 = scalar_lea.vmem %s1175_s3, %s846_s23  ;;  %vm686_vm3 = vcmask 523264  }
   0xe   : > { %495 = vmatprep.subr.bf16.mxu0 %v943_v1  ;;  %848 = vmatprep.subr.bf16.mxu1 %v943_v1  ;;  %v889_v6 = vld [vmem:[%s993_s26 + $0x4] ss:$8 sps:$4 sm:$0xff]   ;;  %v488_v11 = vsel %vm486_vm1, 4294967295, %v944_v10  ;;  %v885_v13 = vld [vmem:[%s1173_s1 + $0x48] ss:$0 sps:$4 sm:$0x33]  }
   0xf   : > { %v892_v7 = vld [vmem:[%s993_s26 + $0x84] ss:$8 sps:$4 sm:$0xff]   ;;  %828 = vmatprep.mubr.msk.bf16.mxu0 %vm437_vm0, %v889_v6  ;;  %v489_v14 = vsel %vm487_vm2, %v488_v11, 0  ;;  %v887_v17 = vld [vmem:[%s993_s26] ss:$8 sps:$4 sm:$0xff]  }
  0x10   : > { %836 = vmatprep.mubr.msk.bf16.mxu1 %vm437_vm0, %v892_v7  ;;  %v491_v15 = vand.u32 %v885_v13, %v489_v14  ;;  %v886_v16 = vld [vmem:[%s1173_s1 + $0x40] sm:$0xff]   ;;  %v893_v19 = vld [vmem:[%s993_s26 + $0x14] ss:$8 sps:$4 sm:$0xff]   ;;  %v897_v21 = vld [vmem:[%s993_s26 + $0x10] ss:$8 sps:$4 sm:$0xff]  }
  0x11   : > { %496 = vmatpush1.bf16.msra.mxu0 %v878_v2  ;;  %858 = vmatpush1.bf16.msra.mxu1 %v878_v2  ;;  %v890_v18 = vld [vmem:[%s993_s26 + $0x80] ss:$8 sps:$4 sm:$0xff]   ;;  %v895_v20 = vld [vmem:[%s993_s26 + $0x94] ss:$8 sps:$4 sm:$0xff]   ;;  %v898_v22 = vld [vmem:[%s993_s26 + $0x90] ss:$8 sps:$4 sm:$0xff]  }
  0x12   : > { %497 = vmatprep.subr.bf16.mxu0 %v943_v1  ;;  %849 = vmatprep.subr.bf16.mxu1 %v943_v1  ;;  %v899_v23 = vld [vmem:[%s993_s26 + $0x24] ss:$8 sps:$4 sm:$0xff]   ;;  %v903_v25 = vld [vmem:[%s993_s26 + $0x20] ss:$8 sps:$4 sm:$0xff]   ;;  %v905_v27 = vld [vmem:[%s993_s26 + $0x34] ss:$8 sps:$4 sm:$0xff]  }
  0x13   : > { %v901_v24 = vld [vmem:[%s993_s26 + $0xa4] ss:$8 sps:$4 sm:$0xff]   ;;  %v904_v26 = vld [vmem:[%s993_s26 + $0xa0] ss:$8 sps:$4 sm:$0xff]   ;;  %v907_v28 = vld [vmem:[%s993_s26 + $0xb4] ss:$8 sps:$4 sm:$0xff]  }
  0x14   : > { %v909_v29 = vld [vmem:[%s993_s26 + $0x30] ss:$8 sps:$4 sm:$0xff]   ;;  %v911_v31 = vld [vmem:[%s993_s26 + $0x44] ss:$8 sps:$4 sm:$0xff]   ;;  %v915_v33 = vld [vmem:[%s993_s26 + $0x40] ss:$8 sps:$4 sm:$0xff]  }
  0x15   : > { %498 = vmatpush1.bf16.msra.mxu0 %v879_v3  ;;  %859 = vmatpush1.bf16.msra.mxu1 %v879_v3  ;;  %v910_v30 = vld [vmem:[%s993_s26 + $0xb0] ss:$8 sps:$4 sm:$0xff]   ;;  %v913_v32 = vld [vmem:[%s993_s26 + $0xc4] ss:$8 sps:$4 sm:$0xff]   ;;  %v916_v34 = vld [vmem:[%s993_s26 + $0xc0] ss:$8 sps:$4 sm:$0xff]  }
  0x16   : > { %499 = vmatprep.subr.bf16.mxu0 %v943_v1  ;;  %850 = vmatprep.subr.bf16.mxu1 %v943_v1  ;;  %v917_v35 = vld [vmem:[%s993_s26 + $0x54] ss:$8 sps:$4 sm:$0xff]   ;;  %v921_v37 = vld [vmem:[%s993_s26 + $0x50] ss:$8 sps:$4 sm:$0xff]   ;;  %v923_v39 = vld [vmem:[%s993_s26 + $0x64] ss:$8 sps:$4 sm:$0xff]  }
  0x17   : > { %v919_v36 = vld [vmem:[%s993_s26 + $0xd4] ss:$8 sps:$4 sm:$0xff]   ;;  %v922_v38 = vld [vmem:[%s993_s26 + $0xd0] ss:$8 sps:$4 sm:$0xff]   ;;  %v925_v40 = vld [vmem:[%s993_s26 + $0xe4] ss:$8 sps:$4 sm:$0xff]  }
  0x18   : > { %v927_v41 = vld [vmem:[%s993_s26 + $0x60] ss:$8 sps:$4 sm:$0xff]   ;;  %v929_v43 = vld [vmem:[%s993_s26 + $0x74] ss:$8 sps:$4 sm:$0xff]   ;;  %v933_v45 = vld [vmem:[%s993_s26 + $0x70] ss:$8 sps:$4 sm:$0xff]  }
  0x19   : > { %500 = vmatpush1.bf16.msra.mxu0 %v880_v4  ;;  %860 = vmatpush1.bf16.msra.mxu1 %v880_v4  ;;  %v928_v42 = vld [vmem:[%s993_s26 + $0xe0] ss:$8 sps:$4 sm:$0xff]   ;;  %v931_v44 = vld [vmem:[%s993_s26 + $0xf4] ss:$8 sps:$4 sm:$0xff]   ;;  %v934_v46 = vld [vmem:[%s993_s26 + $0xf0] ss:$8 sps:$4 sm:$0xff]  }
  0x1a   : > { %501 = vmatprep.subr.bf16.mxu0 %v943_v1  ;;  %851 = vmatprep.subr.bf16.mxu1 %v943_v1  ;;  %v1064_v47 = vld [vmem:[%s1174_s2] ss:$0 sm:$0xff] }
  0x1d   : > { %502 = vmatpush1.bf16.msra.mxu0 %v881_v5  ;;  %861 = vmatpush1.bf16.msra.mxu1 %v881_v5 }
  0x1e   : > { %503 = vmatprep.subr.bf16.mxu0 %v943_v1  ;;  %852 = vmatprep.subr.bf16.mxu1 %v943_v1 }
  0x21   : > { %504 = vmatpush1.bf16.msra.mxu0 %v882_v8  ;;  %862 = vmatpush1.bf16.msra.mxu1 %v882_v8 }
  0x22   : > { %505 = vmatprep.subr.bf16.mxu0 %v943_v1  ;;  %853 = vmatprep.subr.bf16.mxu1 %v943_v1 }
  0x25   : > { %506 = vmatpush1.bf16.msra.mxu0 %v883_v9  ;;  %863 = vmatpush1.bf16.msra.mxu1 %v883_v9 }
  0x26   : > { %507 = vmatprep.subr.bf16.mxu0 %v943_v1  ;;  %854 = vmatprep.subr.bf16.mxu1 %v943_v1 }
  0x29   : > { %508 = vmatpush1.bf16.msra.mxu0 %v884_v12  ;;  %864 = vmatpush1.bf16.msra.mxu1 %v884_v12 }
  0x2a   : > { %521 = vmatprep.subr.bf16.mxu0 %v943_v1  ;;  %855 = vmatprep.subr.bf16.mxu1 %v943_v1 }
  0x2d   : > { %522 = vmatpush2.bf16.msra.mxu0 %v491_v15  ;;  %865 = vmatpush2.bf16.msra.mxu1 %v491_v15 }
  0x2e   : > { %523 = vmatprep.subr.bf16.mxu0 %v943_v1  ;;  %856 = vmatprep.subr.bf16.mxu1 %v943_v1 }
  0x31   : > { %524 = vmatpush2.bf16.msra.mxu0 %v886_v16  ;;  %866 = vmatpush2.bf16.msra.mxu1 %v886_v16 }
  0x34   : > { %526 = vmatmul.mubr.bf16.vlgmr.msra.gmra.mxu0 %v887_v17  ;;  %590 = vmatmul.mubr.bf16.vlgmr.msra.gmra.mxu1 %v890_v18 }
  0x35   : > { %829 = vmatprep.mubr.msk.bf16.mxu0 %vm437_vm0, %v893_v19  ;;  %837 = vmatprep.mubr.msk.bf16.mxu1 %vm437_vm0, %v895_v20 }
  0x3c   : > { %534 = vmatmul.mubr.bf16.gmra.mxu0 %v897_v21  ;;  %598 = vmatmul.mubr.bf16.gmra.mxu1 %v898_v22 }
  0x3d   : > { %830 = vmatprep.mubr.msk.bf16.mxu0 %vm437_vm0, %v899_v23  ;;  %838 = vmatprep.mubr.msk.bf16.mxu1 %vm437_vm0, %v901_v24 }
  0x44   : > { %542 = vmatmul.mubr.bf16.gmra.mxu0 %v903_v25  ;;  %606 = vmatmul.mubr.bf16.gmra.mxu1 %v904_v26 }
  0x45   : > { %831 = vmatprep.mubr.msk.bf16.mxu0 %vm437_vm0, %v905_v27  ;;  %839 = vmatprep.mubr.msk.bf16.mxu1 %vm437_vm0, %v907_v28 }
  0x4c   : > { %550 = vmatmul.mubr.bf16.gmra.mxu0 %v909_v29  ;;  %614 = vmatmul.mubr.bf16.gmra.mxu1 %v910_v30 }
  0x4d   : > { %832 = vmatprep.mubr.msk.bf16.mxu0 %vm437_vm0, %v911_v31  ;;  %840 = vmatprep.mubr.msk.bf16.mxu1 %vm437_vm0, %v913_v32 }
  0x54   : > { %558 = vmatmul.mubr.bf16.gmra.mxu0 %v915_v33  ;;  %622 = vmatmul.mubr.bf16.gmra.mxu1 %v916_v34 }
  0x55   : > { %833 = vmatprep.mubr.msk.bf16.mxu0 %vm437_vm0, %v917_v35  ;;  %841 = vmatprep.mubr.msk.bf16.mxu1 %vm437_vm0, %v919_v36 }
  0x5c   : > { %566 = vmatmul.mubr.bf16.gmra.mxu0 %v921_v37  ;;  %630 = vmatmul.mubr.bf16.gmra.mxu1 %v922_v38 }
  0x5d   : > { %834 = vmatprep.mubr.msk.bf16.mxu0 %vm437_vm0, %v923_v39  ;;  %842 = vmatprep.mubr.msk.bf16.mxu1 %vm437_vm0, %v925_v40 }
  0x64   : > { %574 = vmatmul.mubr.bf16.gmra.mxu0 %v927_v41  ;;  %638 = vmatmul.mubr.bf16.gmra.mxu1 %v928_v42 }
  0x65   : > { %835 = vmatprep.mubr.msk.bf16.mxu0 %vm437_vm0, %v929_v43  ;;  %843 = vmatprep.mubr.msk.bf16.mxu1 %vm437_vm0, %v931_v44 }
  0x6c   : > { %582 = vmatmul.mubr.bf16.gmra.mxu0 %v933_v45  ;;  %646 = vmatmul.mubr.bf16.gmra.mxu1 %v934_v46 }
  0xf4   : > { %v527_v48 = vpop.f32.mrf.mxu0  ;;  %v591_v49 = vpop.f32.mrf.mxu1 }
  0xf5   : > { %v528_v50 = vadd.f32 %v1064_v47, %v527_v48  ;;  %v592_v51 = vadd.f32 %v1064_v47, %v591_v49 }
  0xf6   : > { %v529_v52 = vpop.f32.mrf.mxu0  ;;  %v593_v53 = vpop.f32.mrf.mxu1 }
  0xf7   : > { %v654_v54 = vmax.f32 %v528_v50, 0.0  ;;  %v670_v55 = vmax.f32 %v592_v51, 0.0 }
  0xf8   : > { %v530_v56 = vpop.f32.mrf.mxu0  ;;  %v594_v57 = vpop.f32.mrf.mxu1 }
  0xf9   : > { %687 = vst.msk [vmem:[%s1073_s17] sm:$0xff] %vm686_vm3, %v654_v54  ;;  %703 = vst.msk [vmem:[%s1073_s17 + $0x80] sm:$0xff] %vm686_vm3, %v670_v55  ;;  %v531_v58 = vadd.f32 %v1064_v47, %v530_v56  ;;  %v595_v59 = vadd.f32 %v1064_v47, %v594_v57 }
  0xfa   : > { %v532_v60 = vpop.f32.mrf.mxu0  ;;  %v596_v61 = vpop.f32.mrf.mxu1 }
  0xfb   : > { %v655_v62 = vmax.f32 %v531_v58, 0.0  ;;  %v671_v63 = vmax.f32 %v595_v59, 0.0 }
  0xfc   : > { %v535_v0 = vpop.f32.mrf.mxu0  ;;  %v599_v1 = vpop.f32.mrf.mxu1 }
  0xfd   : > { %688 = vst.msk [vmem:[%s1073_s17 + $0x8] sm:$0xff] %vm686_vm3, %v655_v62  ;;  %704 = vst.msk [vmem:[%s1073_s17 + $0x88] sm:$0xff] %vm686_vm3, %v671_v63  ;;  %v536_v2 = vadd.f32 %v1064_v47, %v535_v0  ;;  %v600_v3 = vadd.f32 %v1064_v47, %v599_v1 }
  0xfe   : > { %v537_v4 = vpop.f32.mrf.mxu0  ;;  %v601_v5 = vpop.f32.mrf.mxu1 }
  0xff   : > { %v656_v6 = vmax.f32 %v536_v2, 0.0  ;;  %v672_v7 = vmax.f32 %v600_v3, 0.0 }
 0x100   : > { %v538_v8 = vpop.f32.mrf.mxu0  ;;  %v602_v9 = vpop.f32.mrf.mxu1 }
 0x101   : > { %689 = vst.msk [vmem:[%s1073_s17 + $0x10] sm:$0xff] %vm686_vm3, %v656_v6  ;;  %705 = vst.msk [vmem:[%s1073_s17 + $0x90] sm:$0xff] %vm686_vm3, %v672_v7  ;;  %v539_v10 = vadd.f32 %v1064_v47, %v538_v8  ;;  %v603_v11 = vadd.f32 %v1064_v47, %v602_v9 }
 0x102   : > { %v540_v12 = vpop.f32.mrf.mxu0  ;;  %v604_v13 = vpop.f32.mrf.mxu1 }
 0x103   : > { %v657_v14 = vmax.f32 %v539_v10, 0.0  ;;  %v673_v15 = vmax.f32 %v603_v11, 0.0 }
 0x104   : > { %v543_v16 = vpop.f32.mrf.mxu0  ;;  %v607_v17 = vpop.f32.mrf.mxu1 }
 0x105   : > { %690 = vst.msk [vmem:[%s1073_s17 + $0x18] sm:$0xff] %vm686_vm3, %v657_v14  ;;  %706 = vst.msk [vmem:[%s1073_s17 + $0x98] sm:$0xff] %vm686_vm3, %v673_v15  ;;  %v544_v18 = vadd.f32 %v1064_v47, %v543_v16  ;;  %v608_v19 = vadd.f32 %v1064_v47, %v607_v17 }
 0x106   : > { %v545_v20 = vpop.f32.mrf.mxu0  ;;  %v609_v21 = vpop.f32.mrf.mxu1 }
 0x107   : > { %v658_v22 = vmax.f32 %v544_v18, 0.0  ;;  %v674_v23 = vmax.f32 %v608_v19, 0.0 }
 0x108   : > { %v546_v24 = vpop.f32.mrf.mxu0  ;;  %v610_v25 = vpop.f32.mrf.mxu1 }
 0x109   : > { %691 = vst.msk [vmem:[%s1073_s17 + $0x20] sm:$0xff] %vm686_vm3, %v658_v22  ;;  %707 = vst.msk [vmem:[%s1073_s17 + $0xa0] sm:$0xff] %vm686_vm3, %v674_v23  ;;  %v547_v26 = vadd.f32 %v1064_v47, %v546_v24  ;;  %v611_v27 = vadd.f32 %v1064_v47, %v610_v25 }
 0x10a   : > { %v548_v28 = vpop.f32.mrf.mxu0  ;;  %v612_v29 = vpop.f32.mrf.mxu1 }
 0x10b   : > { %v659_v30 = vmax.f32 %v547_v26, 0.0  ;;  %v675_v31 = vmax.f32 %v611_v27, 0.0 }
 0x10c   : > { %v551_v32 = vpop.f32.mrf.mxu0  ;;  %v615_v33 = vpop.f32.mrf.mxu1 }
 0x10d   : > { %692 = vst.msk [vmem:[%s1073_s17 + $0x28] sm:$0xff] %vm686_vm3, %v659_v30  ;;  %708 = vst.msk [vmem:[%s1073_s17 + $0xa8] sm:$0xff] %vm686_vm3, %v675_v31  ;;  %v552_v34 = vadd.f32 %v1064_v47, %v551_v32  ;;  %v616_v35 = vadd.f32 %v1064_v47, %v615_v33 }
 0x10e   : > { %v553_v36 = vpop.f32.mrf.mxu0  ;;  %v617_v37 = vpop.f32.mrf.mxu1 }
 0x10f   : > { %v660_v38 = vmax.f32 %v552_v34, 0.0  ;;  %v676_v39 = vmax.f32 %v616_v35, 0.0 }
 0x110   : > { %v554_v40 = vpop.f32.mrf.mxu0  ;;  %v618_v41 = vpop.f32.mrf.mxu1 }
 0x111   : > { %693 = vst.msk [vmem:[%s1073_s17 + $0x30] sm:$0xff] %vm686_vm3, %v660_v38  ;;  %709 = vst.msk [vmem:[%s1073_s17 + $0xb0] sm:$0xff] %vm686_vm3, %v676_v39  ;;  %v555_v42 = vadd.f32 %v1064_v47, %v554_v40  ;;  %v619_v43 = vadd.f32 %v1064_v47, %v618_v41 }
 0x112   : > { %v556_v44 = vpop.f32.mrf.mxu0  ;;  %v620_v45 = vpop.f32.mrf.mxu1 }
 0x113   : > { %v661_v46 = vmax.f32 %v555_v42, 0.0  ;;  %v677_v48 = vmax.f32 %v619_v43, 0.0 }
 0x114   : > { %v559_v49 = vpop.f32.mrf.mxu0  ;;  %v623_v50 = vpop.f32.mrf.mxu1 }
 0x115   : > { %694 = vst.msk [vmem:[%s1073_s17 + $0x38] sm:$0xff] %vm686_vm3, %v661_v46  ;;  %710 = vst.msk [vmem:[%s1073_s17 + $0xb8] sm:$0xff] %vm686_vm3, %v677_v48  ;;  %v560_v51 = vadd.f32 %v1064_v47, %v559_v49  ;;  %v624_v52 = vadd.f32 %v1064_v47, %v623_v50 }
 0x116   : > { %v561_v53 = vpop.f32.mrf.mxu0  ;;  %v625_v54 = vpop.f32.mrf.mxu1 }
 0x117   : > { %v662_v55 = vmax.f32 %v560_v51, 0.0  ;;  %v678_v56 = vmax.f32 %v624_v52, 0.0 }
 0x118   : > { %v562_v57 = vpop.f32.mrf.mxu0  ;;  %v626_v58 = vpop.f32.mrf.mxu1 }
 0x119   : > { %695 = vst.msk [vmem:[%s1073_s17 + $0x40] sm:$0xff] %vm686_vm3, %v662_v55  ;;  %711 = vst.msk [vmem:[%s1073_s17 + $0xc0] sm:$0xff] %vm686_vm3, %v678_v56  ;;  %v563_v59 = vadd.f32 %v1064_v47, %v562_v57  ;;  %v627_v60 = vadd.f32 %v1064_v47, %v626_v58 }
 0x11a   : > { %v564_v61 = vpop.f32.mrf.mxu0  ;;  %v628_v62 = vpop.f32.mrf.mxu1 }
 0x11b   : > { %v663_v63 = vmax.f32 %v563_v59, 0.0  ;;  %v679_v0 = vmax.f32 %v627_v60, 0.0 }
 0x11c   : > { %v567_v1 = vpop.f32.mrf.mxu0  ;;  %v631_v2 = vpop.f32.mrf.mxu1 }
 0x11d   : > { %696 = vst.msk [vmem:[%s1073_s17 + $0x48] sm:$0xff] %vm686_vm3, %v663_v63  ;;  %712 = vst.msk [vmem:[%s1073_s17 + $0xc8] sm:$0xff] %vm686_vm3, %v679_v0  ;;  %v568_v3 = vadd.f32 %v1064_v47, %v567_v1  ;;  %v632_v4 = vadd.f32 %v1064_v47, %v631_v2 }
 0x11e   : > { %v569_v5 = vpop.f32.mrf.mxu0  ;;  %v633_v6 = vpop.f32.mrf.mxu1 }
 0x11f   : > { %v664_v7 = vmax.f32 %v568_v3, 0.0  ;;  %v680_v8 = vmax.f32 %v632_v4, 0.0 }
 0x120   : > { %v570_v9 = vpop.f32.mrf.mxu0  ;;  %v634_v10 = vpop.f32.mrf.mxu1 }
 0x121   : > { %697 = vst.msk [vmem:[%s1073_s17 + $0x50] sm:$0xff] %vm686_vm3, %v664_v7  ;;  %713 = vst.msk [vmem:[%s1073_s17 + $0xd0] sm:$0xff] %vm686_vm3, %v680_v8  ;;  %v571_v11 = vadd.f32 %v1064_v47, %v570_v9  ;;  %v635_v12 = vadd.f32 %v1064_v47, %v634_v10 }
 0x122   : > { %v572_v13 = vpop.f32.mrf.mxu0  ;;  %v636_v14 = vpop.f32.mrf.mxu1 }
 0x123   : > { %v665_v15 = vmax.f32 %v571_v11, 0.0  ;;  %v681_v16 = vmax.f32 %v635_v12, 0.0 }
 0x124   : > { %v575_v17 = vpop.f32.mrf.mxu0  ;;  %v639_v18 = vpop.f32.mrf.mxu1 }
 0x125   : > { %698 = vst.msk [vmem:[%s1073_s17 + $0x58] sm:$0xff] %vm686_vm3, %v665_v15  ;;  %714 = vst.msk [vmem:[%s1073_s17 + $0xd8] sm:$0xff] %vm686_vm3, %v681_v16  ;;  %v576_v19 = vadd.f32 %v1064_v47, %v575_v17  ;;  %v640_v20 = vadd.f32 %v1064_v47, %v639_v18 }
 0x126   : > { %v577_v21 = vpop.f32.mrf.mxu0  ;;  %v641_v22 = vpop.f32.mrf.mxu1 }
 0x127   : > { %v666_v23 = vmax.f32 %v576_v19, 0.0  ;;  %v682_v24 = vmax.f32 %v640_v20, 0.0 }
 0x128   : > { %v578_v25 = vpop.f32.mrf.mxu0  ;;  %v642_v26 = vpop.f32.mrf.mxu1 }
 0x129   : > { %699 = vst.msk [vmem:[%s1073_s17 + $0x60] sm:$0xff] %vm686_vm3, %v666_v23  ;;  %715 = vst.msk [vmem:[%s1073_s17 + $0xe0] sm:$0xff] %vm686_vm3, %v682_v24  ;;  %v579_v27 = vadd.f32 %v1064_v47, %v578_v25  ;;  %v643_v28 = vadd.f32 %v1064_v47, %v642_v26 }
 0x12a   : > { %v580_v29 = vpop.f32.mrf.mxu0  ;;  %v644_v30 = vpop.f32.mrf.mxu1 }
 0x12b   : > { %v667_v31 = vmax.f32 %v579_v27, 0.0  ;;  %v683_v32 = vmax.f32 %v643_v28, 0.0 }
 0x12c   : > { %v583_v33 = vpop.f32.mrf.mxu0  ;;  %v647_v34 = vpop.f32.mrf.mxu1 }
 0x12d   : > { %700 = vst.msk [vmem:[%s1073_s17 + $0x68] sm:$0xff] %vm686_vm3, %v667_v31  ;;  %716 = vst.msk [vmem:[%s1073_s17 + $0xe8] sm:$0xff] %vm686_vm3, %v683_v32  ;;  %v584_v35 = vadd.f32 %v1064_v47, %v583_v33  ;;  %v648_v36 = vadd.f32 %v1064_v47, %v647_v34 }
 0x12e   : > { %v585_v37 = vpop.f32.mrf.mxu0  ;;  %v649_v38 = vpop.f32.mrf.mxu1 }
 0x12f   : > { %v668_v39 = vmax.f32 %v584_v35, 0.0  ;;  %v684_v40 = vmax.f32 %v648_v36, 0.0 }
 0x130   : > { %v586_v41 = vpop.f32.mrf.mxu0  ;;  %v650_v42 = vpop.f32.mrf.mxu1 }
 0x131   : > { %701 = vst.msk [vmem:[%s1073_s17 + $0x70] sm:$0xff] %vm686_vm3, %v668_v39  ;;  %717 = vst.msk [vmem:[%s1073_s17 + $0xf0] sm:$0xff] %vm686_vm3, %v684_v40  ;;  %v587_v43 = vadd.f32 %v1064_v47, %v586_v41  ;;  %v651_v44 = vadd.f32 %v1064_v47, %v650_v42 }
 0x132   : > { %v588_v45 = vpop.f32.mrf.mxu0  ;;  %v652_v46 = vpop.f32.mrf.mxu1 }
 0x133   : > { %v669_v48 = vmax.f32 %v587_v43, 0.0  ;;  %v685_v49 = vmax.f32 %v651_v44, 0.0 }
 0x135   : > { %702 = vst.msk [vmem:[%s1073_s17 + $0x78] sm:$0xff] %vm686_vm3, %v669_v48  ;;  %718 = vst.msk [vmem:[%s1073_s17 + $0xf8] sm:$0xff] %vm686_vm3, %v685_v49 }
 0x136 PF: > { %s13_s12 = sadd.s32 1, %s941_s12  }
 0x137   : > { %p10_p4 = scmp.ge.s32.totalorder %s13_s12, 4  }
 0x139   :  { %12 = sbr.rel (!%p10_p4) target bundleno = 1 (0x1), region = 62 }

// kernel: bb_model_forward.10
= control target key start
LH: loop header
LB: loop body
LE: loop exit
PB: predicated region body
PF: predicated region fallthrough
CT: control target
= control target key end

     0   :  { %s443_s6 = smov 0   ;;  %s606_s0 = inlined_call_operand.vmem [shape: f32[8,9,9,64], index: 0, kind: input, shape index: {}]   ;;  %s607_s1 = inlined_call_operand.vmem [shape: f32[2,8,8,64], index: 1, kind: output, shape index: {}]  }
   0x1 LB: > { %s449_s7 = sadd.s32 4294967295, %s431_s6   ;;  %p408_p0 = scmp.ge.s32.totalorder %s431_s6, 1  ;;  %s431_s6 = sphi %s443_s6, %s11_s6  }
   0x2   : > { %p89_p1 = scmp.lt.s32.totalorder %s431_s6, 3 }
   0x4   : > { %p90_p2 = pnand %p408_p0, %p89_p1 }
   0x5   : > { %s409_s8 = sshll.u32 (!%p90_p2), %s449_s7, 2  ;;  %p117_p4 = scmp.lt.s32.totalorder (!%p90_p2), %s449_s7, 1 }
   0x6   : > { %93 = sbr.rel (%p90_p2) target bundleno = 56 (0x38), region = 24  ;;  %p111_p3 = scmp.lt.s32.totalorder (!%p90_p2), %s409_s8, 7 }
   0xb   : > { %s609_s8 = smov (!%p111_p3, %s409_s8), 7  ;;  %vm197_vm0 = vcmask 1046528   ;;  %vm340_vm1 = vcmask 523264   ;;  %s611_s7 = smov (!%p117_p4, %s449_s7), 1 }
   0xc   : > { %s416_s9 = smul.u32 144, %s609_s8  ;;  %s415_s13 = sshll.u32 %s611_s7, 6 }
   0xd   : > { %s546_s16 = scalar_lea.vmem %s607_s1, %s415_s13 }
   0xe   : > { %s457_s12 = scalar_lea.vmem %s606_s0, %s416_s9 }
   0xf   : > { %v122_v0 = vld [vmem:[%s457_s12] sm:$0xff]  ;;  %v123_v1 = vld [vmem:[%s457_s12 + $0x8] sm:$0x1]  ;;  %v462_v2 = vld [vmem:[%s457_s12 + $0x10] sm:$0xff] }
  0x10   : > { %v125_v3 = vld [vmem:[%s457_s12 + $0x18] sm:$0x1]  ;;  %v140_v4 = vld [vmem:[%s457_s12 + $0x90] sm:$0xff]  ;;  %v467_v5 = vld [vmem:[%s457_s12 + $0xa0] sm:$0xff]  ;;  %v198_v6 = vrot.slane %v122_v0, 1  ;;  %v199_v7 = vrot.slane %v123_v1, 1 }
  0x11   : > { %v149_v8 = vld [vmem:[%s457_s12 + $0x120] sm:$0xff]  ;;  %v150_v9 = vld [vmem:[%s457_s12 + $0x128] sm:$0x1]  ;;  %v151_v10 = vld [vmem:[%s457_s12 + $0x130] sm:$0xff]  ;;  %v173_v11 = vmax.f32 %v122_v0, %v140_v4  ;;  %v174_v12 = vmax.f32 %v462_v2, %v467_v5  ;;  %v201_v13 = vrot.slane %v462_v2, 1  ;;  %v202_v14 = vrot.slane %v125_v3, 1 }
  0x12   : > { %v165_v15 = vld [vmem:[%s457_s12 + $0x1b0] sm:$0xff]  ;;  %v200_v16 = vsel %vm197_vm0, %v198_v6, %v199_v7  ;;  %v270_v17 = vrot.slane %v149_v8, 1  ;;  %v271_v18 = vrot.slane %v150_v9, 1  ;;  %v273_v19 = vrot.slane %v151_v10, 1  ;;  %v126_v20 = vld [vmem:[%s457_s12 + $0x20] sm:$0xff] }
  0x13   : > { %v480_v21 = vsel %vm197_vm0, %v201_v13, %v202_v14  ;;  %v230_v22 = vmax.f32 %v173_v11, %v200_v16  ;;  %v127_v23 = vld [vmem:[%s457_s12 + $0x28] sm:$0x1]  ;;  %v484_v24 = vld [vmem:[%s457_s12 + $0xb0] sm:$0xff]  ;;  %v152_v25 = vld [vmem:[%s457_s12 + $0x138] sm:$0x1]  ;;  %v204_v26 = vrot.slane %v126_v20, 1 }
  0x14   : > { %v166_v27 = vld [vmem:[%s457_s12 + $0x1c0] sm:$0xff]  ;;  %v231_v28 = vmax.f32 %v174_v12, %v480_v21  ;;  %v175_v30 = vmax.f32 %v126_v20, %v484_v24  ;;  %v205_v31 = vrot.slane %v127_v23, 1  ;;  %v492_v32 = vld [vmem:[%s457_s12 + $0x30] sm:$0xff]  ;;  %v272_v34 = vsel %vm197_vm0, %v270_v17, %v271_v18  ;;  %v129_v37 = vld [vmem:[%s457_s12 + $0x38] sm:$0x1] }
  0x15   : > { %v153_v29 = vld [vmem:[%s457_s12 + $0x140] sm:$0xff]  ;;  %v238_v33 = vmax.f32 %v230_v22, %v149_v8  ;;  %v274_v35 = vrot.slane %v152_v25, 1  ;;  %v155_v39 = vld [vmem:[%s457_s12 + $0x150] sm:$0xff]  ;;  %v154_v42 = vld [vmem:[%s457_s12 + $0x148] sm:$0x1]  ;;  %v207_v44 = vrot.slane %v492_v32, 1 }
  0x16   : > { %v276_v36 = vrot.slane %v153_v29, 1  ;;  %v497_v38 = vld [vmem:[%s457_s12 + $0xc0] sm:$0xff]  ;;  %v239_v40 = vmax.f32 %v231_v28, %v151_v10  ;;  %v206_v41 = vsel %vm197_vm0, %v204_v26, %v205_v31  ;;  %v208_v49 = vrot.slane %v129_v37, 1  ;;  %v131_v50 = vld [vmem:[%s457_s12 + $0x48] sm:$0x1]  ;;  %v516_v51 = vld [vmem:[%s457_s12 + $0xd0] sm:$0xff] }
  0x17   : > { %v176_v43 = vmax.f32 %v492_v32, %v497_v38  ;;  %v506_v45 = vld [vmem:[%s457_s12 + $0x40] sm:$0xff]  ;;  %v246_v46 = vmax.f32 %v238_v33, %v165_v15  ;;  %v232_v47 = vmax.f32 %v175_v30, %v206_v41  ;;  %v275_v48 = vsel %vm197_vm0, %v273_v19, %v274_v35  ;;  %v167_v53 = vld [vmem:[%s457_s12 + $0x1d0] sm:$0xff]  ;;  %v156_v56 = vld [vmem:[%s457_s12 + $0x158] sm:$0x1] }
  0x18   : > { %v247_v52 = vmax.f32 %v239_v40, %v166_v27  ;;  %v277_v54 = vrot.slane %v154_v42, 1  ;;  %v279_v55 = vrot.slane %v155_v39, 1  ;;  %v157_v57 = vld [vmem:[%s457_s12 + $0x160] sm:$0xff]  ;;  %v177_v58 = vmax.f32 %v506_v45, %v516_v51  ;;  %v526_v63 = vld [vmem:[%s457_s12 + $0x50] sm:$0xff]  ;;  %v133_v12 = vld [vmem:[%s457_s12 + $0x58] sm:$0x1] }
  0x19   : > { %v302_v59 = vmax.f32 %v246_v46, %v272_v34  ;;  %v240_v60 = vmax.f32 %v232_v47, %v153_v29  ;;  %v209_v61 = vsel %vm197_vm0, %v207_v44, %v208_v49  ;;  %v210_v62 = vrot.slane %v506_v45, 1  ;;  %v529_v0 = vld [vmem:[%s457_s12 + $0xe0] sm:$0xff]  ;;  %v158_v16 = vld [vmem:[%s457_s12 + $0x168] sm:$0x1]  ;;  %v159_v23 = vld [vmem:[%s457_s12 + $0x170] sm:$0xff] }
  0x1a   : > { %v303_v1 = vmax.f32 %v247_v52, %v275_v48  ;;  %v233_v3 = vmax.f32 %v176_v43, %v209_v61  ;;  %v278_v4 = vsel %vm197_vm0, %v276_v36, %v277_v54  ;;  %v211_v6 = vrot.slane %v131_v50, 1  ;;  %v168_v9 = vld [vmem:[%s457_s12 + $0x1e0] sm:$0xff]  ;;  %v169_v26 = vld [vmem:[%s457_s12 + $0x1f0] sm:$0xff]  ;;  %v135_v34 = vld [vmem:[%s457_s12 + $0x68] sm:$0x1] }
  0x1b   : > { %v310_v7 = vmax.f32 %v302_v59, %v462_v2  ;;  %v248_v8 = vmax.f32 %v240_v60, %v167_v53  ;;  %v280_v10 = vrot.slane %v156_v56, 1  ;;  %v282_v11 = vrot.slane %v157_v57, 1  ;;  %v134_v33 = vld [vmem:[%s457_s12 + $0x60] sm:$0xff]  ;;  %v160_v40 = vld [vmem:[%s457_s12 + $0x178] sm:$0x1]  ;;  %v136_v46 = vld [vmem:[%s457_s12 + $0x70] sm:$0xff] }
  0x1c   : > { %v311_v13 = vmax.f32 %v303_v1, %v126_v20  ;;  %v241_v14 = vmax.f32 %v233_v3, %v155_v39  ;;  %v212_v15 = vsel %vm197_vm0, %v210_v62, %v211_v6  ;;  %v178_v17 = vmax.f32 %v526_v63, %v529_v0  ;;  %v161_v44 = vld [vmem:[%s457_s12 + $0x180] sm:$0xff]  ;;  %v137_v56 = vld [vmem:[%s457_s12 + $0x78] sm:$0x1] }
  0x1d   : > { %v318_v18 = vmax.f32 %v310_v7, %v467_v5  ;;  %v304_v19 = vmax.f32 %v248_v8, %v278_v4  ;;  %v234_v2 = vmax.f32 %v177_v58, %v212_v15  ;;  %v281_v22 = vsel %vm197_vm0, %v279_v55, %v280_v10  ;;  %v147_v47 = vld [vmem:[%s457_s12 + $0x100] sm:$0xff]  ;;  %v163_v4 = vld [vmem:[%s457_s12 + $0x190] sm:$0xff]  ;;  %v164_v6 = vld [vmem:[%s457_s12 + $0x198] sm:$0x1] }
  0x1e   : > { %v319_v20 = vmax.f32 %v311_v13, %v484_v24  ;;  %v249_v25 = vmax.f32 %v241_v14, %v168_v9  ;;  %v213_v5 = vrot.slane %v526_v63, 1  ;;  %v214_v27 = vrot.slane %v133_v12, 1  ;;  %v556_v24 = vld [vmem:[%s457_s12 + $0xf0] sm:$0xff]  ;;  %v170_v48 = vld [vmem:[%s457_s12 + $0x200] sm:$0xff] }
  0x1f   : > { %v332_v28 = vmax.f32 %v318_v18, %v480_v21  ;;  %v312_v29 = vmax.f32 %v304_v19, %v492_v32  ;;  %v242_v30 = vmax.f32 %v234_v2, %v157_v57  ;;  %v283_v31 = vrot.slane %v158_v16, 1  ;;  %v162_v57 = vld [vmem:[%s457_s12 + $0x188] sm:$0x1]  ;;  %v171_v8 = vld [vmem:[%s457_s12 + $0x210] sm:$0xff] }
  0x20   : > { %v333_v35 = vmax.f32 %v319_v20, %v206_v41  ;;  %v305_v36 = vmax.f32 %v249_v25, %v281_v22  ;;  %v215_v37 = vsel %vm197_vm0, %v213_v5, %v214_v27  ;;  %v285_v39 = vrot.slane %v159_v23, 1  ;;  %v172_v22 = vld [vmem:[%s457_s12 + $0x220] sm:$0xff] }
  0x21   : > { %341 = vst.msk [vmem:[%s546_s16] sm:$0xff] %vm340_vm1, %v332_v28  ;;  %v320_v21 = vmax.f32 %v312_v29, %v497_v38  ;;  %v250_v32 = vmax.f32 %v242_v30, %v169_v26  ;;  %v235_v42 = vmax.f32 %v178_v17, %v215_v37  ;;  %v284_v43 = vsel %vm197_vm0, %v282_v11, %v283_v31  ;;  %v138_v25 = vld [vmem:[%s457_s12 + $0x80] sm:$0xff]  ;;  %v139_v26 = vld [vmem:[%s457_s12 + $0x88] sm:$0x1] }
  0x22   : > { %342 = vst.msk [vmem:[%s546_s16 + $0x8] sm:$0xff] %vm340_vm1, %v333_v35  ;;  %v313_v41 = vmax.f32 %v305_v36, %v506_v45  ;;  %v179_v49 = vmax.f32 %v134_v33, %v556_v24  ;;  %v216_v50 = vrot.slane %v134_v33, 1  ;;  %v217_v52 = vrot.slane %v135_v34, 1  ;;  %v148_v35 = vld [vmem:[%s457_s12 + $0x110] sm:$0xff] }
  0x23   : > { %v334_v38 = vmax.f32 %v320_v21, %v209_v61  ;;  %v243_v53 = vmax.f32 %v235_v42, %v159_v23  ;;  %v306_v54 = vmax.f32 %v250_v32, %v284_v43  ;;  %v286_v55 = vrot.slane %v160_v40, 1 }
  0x24   : > { %v321_v58 = vmax.f32 %v313_v41, %v516_v51  ;;  %v218_v59 = vsel %vm197_vm0, %v216_v50, %v217_v52  ;;  %v288_v60 = vrot.slane %v161_v44, 1  ;;  %v180_v45 = vmax.f32 %v136_v46, %v147_v47 }
  0x25   : > { %343 = vst.msk [vmem:[%s546_s16 + $0x10] sm:$0xff] %vm340_vm1, %v334_v38  ;;  %v251_v62 = vmax.f32 %v243_v53, %v170_v48  ;;  %v314_v1 = vmax.f32 %v306_v54, %v526_v63  ;;  %v236_v61 = vmax.f32 %v179_v49, %v218_v59  ;;  %v287_v3 = vsel %vm197_vm0, %v285_v39, %v286_v55 }
  0x26   : > { %v335_v7 = vmax.f32 %v321_v58, %v212_v15  ;;  %v219_v9 = vrot.slane %v136_v46, 1  ;;  %v220_v51 = vrot.slane %v137_v56, 1  ;;  %v289_v10 = vrot.slane %v162_v57, 1 }
  0x27   : > { %v322_v11 = vmax.f32 %v314_v1, %v529_v0  ;;  %v244_v12 = vmax.f32 %v236_v61, %v161_v44  ;;  %v307_v13 = vmax.f32 %v251_v62, %v287_v3  ;;  %v291_v16 = vrot.slane %v163_v4, 1 }
  0x28   : > { %344 = vst.msk [vmem:[%s546_s16 + $0x18] sm:$0xff] %vm340_vm1, %v335_v7  ;;  %v221_v63 = vsel %vm197_vm0, %v219_v9, %v220_v51  ;;  %v290_v14 = vsel %vm197_vm0, %v288_v60, %v289_v10  ;;  %v292_v15 = vrot.slane %v164_v6, 1  ;;  %v328_v30 = vrot.slane %v138_v25, 1 }
  0x29   : > { %v336_v17 = vmax.f32 %v322_v11, %v215_v37  ;;  %v252_v18 = vmax.f32 %v244_v12, %v171_v8  ;;  %v315_v19 = vmax.f32 %v307_v13, %v134_v33  ;;  %v237_v2 = vmax.f32 %v180_v45, %v221_v63 }
  0x2a   : > { %v293_v5 = vsel %vm197_vm0, %v291_v16, %v292_v15  ;;  %v329_v31 = vrot.slane %v139_v26, 1 }
  0x2b   : > { %345 = vst.msk [vmem:[%s546_s16 + $0x20] sm:$0xff] %vm340_vm1, %v336_v17  ;;  %v323_v0 = vmax.f32 %v315_v19, %v556_v24  ;;  %v245_v23 = vmax.f32 %v237_v2, %v163_v4  ;;  %v308_v20 = vmax.f32 %v252_v18, %v290_v14 }
  0x2c   : > { %v330_v37 = vsel %vm197_vm0, %v328_v30, %v329_v31 }
  0x2d   : > { %v337_v27 = vmax.f32 %v323_v0, %v218_v59  ;;  %v253_v28 = vmax.f32 %v245_v23, %v172_v22  ;;  %v316_v29 = vmax.f32 %v308_v20, %v136_v46 }
  0x2f   : > { %346 = vst.msk [vmem:[%s546_s16 + $0x28] sm:$0xff] %vm340_vm1, %v337_v27  ;;  %v324_v33 = vmax.f32 %v316_v29, %v147_v47  ;;  %v309_v34 = vmax.f32 %v253_v28, %v293_v5 }
  0x31   : > { %v338_v36 = vmax.f32 %v324_v33, %v221_v63  ;;  %v317_v24 = vmax.f32 %v309_v34, %v138_v25 }
  0x33   : > { %347 = vst.msk [vmem:[%s546_s16 + $0x30] sm:$0xff] %vm340_vm1, %v338_v36  ;;  %v325_v39 = vmax.f32 %v317_v24, %v148_v35 }
  0x35   : > { %v339_v40 = vmax.f32 %v325_v39, %v330_v37 }
  0x37   : > { %348 = vst.msk [vmem:[%s546_s16 + $0x38] sm:$0xff] %vm340_vm1, %v339_v40 }
  0x38 PF: > { %s11_s6 = sadd.s32 1, %s431_s6  }
  0x39   : > { %p8_p5 = scmp.ge.s32.totalorder %s11_s6, 4  }
  0x3b   :  { %10 = sbr.rel (!%p8_p5) target bundleno = 1 (0x1), region = 54 }

// kernel: bb_model_forward.11
= control target key start
LH: loop header
LB: loop body
LE: loop exit
PB: predicated region body
PF: predicated region fallthrough
CT: control target
= control target key end

     0   :  { %s1871_s12 = smov 0   ;;  %s2275_s0 = inlined_call_operand.vmem [shape: f32[2,10,10,64], index: 0, kind: input, shape index: {}]   ;;  %s2276_s1 = inlined_call_operand.vmem [shape: bf16[9,64,64], index: 1, kind: input, shape index: {}]   ;;  %s2277_s2 = inlined_call_operand.vmem [shape: f32[1,64], index: 2, kind: input, shape index: {}]   ;;  %s2278_s3 = inlined_call_operand.vmem [shape: f32[2,64,64], index: 3, kind: output, shape index: {}]  }
   0x1 LB: > { %s1426_s13 = sadd.s32 4294967295, %s1849_s12   ;;  %p1430_p0 = scmp.ge.s32.totalorder %s1849_s12, 1  ;;  %s1849_s12 = sphi %s1871_s12, %s13_s12  }
   0x2   : > { %p137_p1 = scmp.lt.s32.totalorder %s1849_s12, 3 }
   0x4   : > { %p138_p2 = pnand %p1430_p0, %p137_p1 }
   0x6   : > { %141 = sbr.rel (%p138_p2) target bundleno = 299 (0x12b), region = 32 }
   0xb   : > { %v1807_v0 = vld [vmem:[%s2276_s1 + $0x38] sm:$0xff]   ;;  %p161_p3 = scmp.lt.s32.totalorder %s1426_s13, 1  ;;  %v1809_v2 = vld [vmem:[%s2276_s1 + $0x30] sm:$0xff]   ;;  %v1811_v4 = vld [vmem:[%s2276_s1 + $0x28] sm:$0xff]   ;;  %vm220_vm0 = vcmask 1046528   ;;  %vm290_vm1 = vcmask 523264  }
   0xc   : > { %v1808_v1 = vld [vmem:[%s2276_s1 + $0x18] sm:$0xff]   ;;  %1646 = vmatprep.subr.bf16.mxu0 %v1807_v0  ;;  %v1810_v3 = vld [vmem:[%s2276_s1 + $0x10] sm:$0xff]   ;;  %v1812_v5 = vld [vmem:[%s2276_s1 + $0x8] sm:$0xff]   ;;  %vm469_vm2 = vcmask 1045504  }
   0xd   : > { %s2282_s13 = smov (!%p161_p3, %s1426_s13), 1  ;;  %1662 = vmatprep.subr.bf16.mxu1 %v1808_v1  ;;  %1647 = vmatpush3.bf16.msra.mxu0 %v1807_v0  ;;  %v1813_v6 = vld [vmem:[%s2276_s1 + $0x20] sm:$0xff]   ;;  %v1815_v32 = vld [vmem:[%s2276_s1 + $0x58] sm:$0xff]   ;;  %v1817_v41 = vld [vmem:[%s2276_s1 + $0x50] sm:$0xff]  }
   0xe   : > { %1663 = vmatpush3.bf16.msra.mxu1 %v1808_v1  ;;  %1648 = vmatprep.subr.bf16.mxu0 %v1809_v2  ;;  %s1798_s24 = smul.u32 160, %s2282_s13  ;;  %v1814_v7 = vld [vmem:[%s2276_s1] sm:$0xff]   ;;  %v1816_v36 = vld [vmem:[%s2276_s1 + $0x78] sm:$0xff]   ;;  %v1818_v44 = vld [vmem:[%s2276_s1 + $0x70] sm:$0xff]   ;;  %s1573_s18 = sshll.u32 %s2282_s13, 6 }
   0xf   : > { %1664 = vmatprep.subr.bf16.mxu1 %v1810_v3  ;;  %v1819_v61 = vld [vmem:[%s2276_s1 + $0x48] sm:$0xff]   ;;  %s2254_s21 = scalar_lea.vmem %s2278_s3, %s1573_s18 }
  0x10   : > { %s1906_s4 = scalar_lea.vmem %s2275_s0, %s1798_s24  ;;  %v1820_v0 = vld [vmem:[%s2276_s1 + $0x68] sm:$0xff]  }
  0x11   : > { %1649 = vmatpush3.bf16.msra.mxu0 %v1809_v2  ;;  %v1912_v8 = vld [vmem:[%s1906_s4] sm:$0xff]  ;;  %v1915_v9 = vld [vmem:[%s1906_s4 + $0x8] sm:$0x3]  ;;  %v1918_v10 = vld [vmem:[%s1906_s4 + $0x10] sm:$0xff] }
  0x12   : > { %1665 = vmatpush3.bf16.msra.mxu1 %v1810_v3  ;;  %1650 = vmatprep.subr.bf16.mxu0 %v1811_v4  ;;  %v1921_v11 = vld [vmem:[%s1906_s4 + $0x18] sm:$0x3]  ;;  %v1924_v12 = vld [vmem:[%s1906_s4 + $0x20] sm:$0xff]  ;;  %v1927_v13 = vld [vmem:[%s1906_s4 + $0x28] sm:$0x3]  ;;  %v221_v14 = vrot.slane %v1912_v8, 1  ;;  %v192_v15 = vpack.c.bf16 %v1918_v10, %v1912_v8 }
  0x13   : > { %1666 = vmatprep.subr.bf16.mxu1 %v1812_v5  ;;  %v1933_v16 = vld [vmem:[%s1906_s4 + $0x30] sm:$0xff]  ;;  %v1936_v17 = vld [vmem:[%s1906_s4 + $0x38] sm:$0x3]  ;;  %v1939_v18 = vld [vmem:[%s1906_s4 + $0x40] sm:$0xff]  ;;  %v222_v19 = vrot.slane %v1915_v9, 1  ;;  %v224_v20 = vrot.slane %v1918_v10, 1 }
  0x14   : > { %v1944_v21 = vld [vmem:[%s1906_s4 + $0x48] sm:$0x3]  ;;  %v225_v22 = vrot.slane %v1921_v11, 1  ;;  %v227_v23 = vrot.slane %v1924_v12, 1  ;;  %v228_v24 = vrot.slane %v1927_v13, 1  ;;  %v230_v25 = vrot.slane %v1933_v16, 1  ;;  %1670 = vmatprep.mubr.msk.bf16.mxu1 %vm290_vm1, %v192_v15 }
  0x15   : > { %1651 = vmatpush3.bf16.msra.mxu0 %v1811_v4  ;;  %v223_v26 = vsel %vm220_vm0, %v221_v14, %v222_v19  ;;  %v231_v27 = vrot.slane %v1936_v17, 1  ;;  %v233_v28 = vrot.slane %v1939_v18, 1  ;;  %v234_v31 = vrot.slane %v1944_v21, 1  ;;  %v1997_v48 = vld [vmem:[%s1906_s4 + $0x50] sm:$0xff]  ;;  %v183_v49 = vld [vmem:[%s1906_s4 + $0x58] sm:$0x3] }
  0x16   : > { %1667 = vmatpush3.bf16.msra.mxu1 %v1812_v5  ;;  %1652 = vmatprep.subr.bf16.mxu0 %v1813_v6  ;;  %v1955_v29 = vsel %vm220_vm0, %v224_v20, %v225_v22  ;;  %v1958_v30 = vsel %vm220_vm0, %v227_v23, %v228_v24  ;;  %v470_v35 = vrot.slane %v1912_v8, 2  ;;  %v471_v38 = vrot.slane %v1915_v9, 2  ;;  %v2001_v50 = vld [vmem:[%s1906_s4 + $0x60] sm:$0xff]  ;;  %v2011_v54 = vld [vmem:[%s1906_s4 + $0x68] sm:$0x3]  ;;  %v2014_v55 = vld [vmem:[%s1906_s4 + $0x70] sm:$0xff] }
  0x17   : > { %1668 = vmatprep.subr.bf16.mxu1 %v1814_v7  ;;  %v1965_v33 = vsel %vm220_vm0, %v230_v25, %v231_v27  ;;  %v253_v34 = vpack.c.bf16 %v1955_v29, %v223_v26  ;;  %v474_v39 = vrot.slane %v1921_v11, 2  ;;  %v476_v40 = vrot.slane %v1924_v12, 2  ;;  %v2020_v57 = vld [vmem:[%s1906_s4 + $0x78] sm:$0x3]  ;;  %v1821_v8 = vld [vmem:[%s2276_s1 + $0x40] sm:$0xff]  }
  0x18   : > { %v1974_v37 = vpack.c.bf16 %v1965_v33, %v1958_v30  ;;  %v477_v42 = vrot.slane %v1927_v13, 2  ;;  %v1986_v43 = vpack.c.bf16 %v1933_v16, %v1924_v12  ;;  %v1992_v45 = vsel %vm220_vm0, %v233_v28, %v234_v31  ;;  %v1822_v9 = vld [vmem:[%s2276_s1 + $0x60] sm:$0xff]  }
  0x19   : > { %1653 = vmatpush3.bf16.msra.mxu0 %v1813_v6  ;;  %1654 = vmatprep.mubr.msk.bf16.mxu0 %vm290_vm1, %v253_v34  ;;  %v479_v46 = vrot.slane %v1933_v16, 2  ;;  %v480_v47 = vrot.slane %v1936_v17, 2  ;;  %v236_v51 = vrot.slane %v1997_v48, 1  ;;  %v237_v52 = vrot.slane %v183_v49, 1  ;;  %v1826_v34 = vld [vmem:[%s2276_s1 + $0xb0] sm:$0xff]  }
  0x1a   : > { %1669 = vmatpush3.bf16.msra.mxu1 %v1814_v7  ;;  %1678 = vmatprep.subr.bf16.mxu0 %v1815_v32  ;;  %v2008_v53 = vpack.c.bf16 %v1997_v48, %v1939_v18  ;;  %v473_v56 = vrot.slane %v1918_v10, 2  ;;  %v239_v58 = vrot.slane %v2001_v50, 1  ;;  %v240_v59 = vrot.slane %v2011_v54, 1 }
  0x1b   : > { %1694 = vmatprep.subr.bf16.mxu1 %v1816_v36  ;;  %v242_v60 = vrot.slane %v2014_v55, 1  ;;  %v2029_v62 = vsel %vm220_vm0, %v236_v51, %v237_v52  ;;  %v243_v63 = vrot.slane %v2020_v57, 1  ;;  %v472_v4 = vsel %vm469_vm2, %v470_v35, %v471_v38  ;;  %v2127_v38 = vld [vmem:[%s1906_s4 + $0x80] sm:$0xff] }
  0x1c   : > { %1655 = vmatmul.mubr.msk.bf16.vlgmr.msra.gmra.mxu0 %vm290_vm1, %v1974_v37  ;;  %v2037_v1 = vpack.c.bf16 %v2029_v62, %v1992_v45  ;;  %v2042_v2 = vsel %vm220_vm0, %v239_v58, %v240_v59  ;;  %v2049_v5 = vsel %vm469_vm2, %v473_v56, %v474_v39  ;;  %v2059_v7 = vpack.c.bf16 %v2014_v55, %v2001_v50  ;;  %v1827_v39 = vld [vmem:[%s2276_s1 + $0x88] sm:$0xff]  }
  0x1d   : > { %1671 = vmatmul.mubr.msk.bf16.vlgmr.msra.gmra.mxu1 %vm290_vm1, %v1986_v43  ;;  %1679 = vmatpush3.bf16.msra.mxu0 %v1815_v32  ;;  %v2045_v3 = vsel %vm220_vm0, %v242_v60, %v243_v63  ;;  %v502_v11 = vpack.c.bf16 %v2049_v5, %v472_v4  ;;  %v624_v13 = vpack.c.bf16 %v1924_v12, %v1918_v10  ;;  %v482_v14 = vrot.slane %v1939_v18, 2  ;;  %v1823_v10 = vld [vmem:[%s2276_s1 + $0x98] sm:$0xff]   ;;  %v1825_v32 = vld [vmem:[%s2276_s1 + $0x90] sm:$0xff]   ;;  %v1838_v4 = vld [vmem:[%s2276_s1 + $0xe0] sm:$0xff]  }
  0x1e   : > { %1695 = vmatpush3.bf16.msra.mxu1 %v1816_v36  ;;  %1680 = vmatprep.subr.bf16.mxu0 %v1817_v41  ;;  %v2055_v6 = vpack.c.bf16 %v2045_v3, %v2042_v2  ;;  %v483_v15 = vrot.slane %v1944_v21, 2  ;;  %v2073_v17 = vsel %vm469_vm2, %v476_v40, %v477_v42  ;;  %v2076_v19 = vsel %vm469_vm2, %v479_v46, %v480_v47  ;;  %v1824_v12 = vld [vmem:[%s2276_s1 + $0xb8] sm:$0xff]   ;;  %v1828_v40 = vld [vmem:[%s2276_s1 + $0xa8] sm:$0xff]   ;;  %v1830_v47 = vld [vmem:[%s2276_s1 + $0xa0] sm:$0xff]  }
  0x1f   : > { %1696 = vmatprep.subr.bf16.mxu1 %v1818_v44  ;;  %1674 = vmatprep.mubr.msk.bf16.mxu1 %vm290_vm1, %v2008_v53  ;;  %v485_v20 = vrot.slane %v1997_v48, 2  ;;  %v486_v22 = vrot.slane %v183_v49, 2  ;;  %v2091_v21 = vpack.c.bf16 %v2076_v19, %v2073_v17  ;;  %v488_v25 = vrot.slane %v2001_v50, 2  ;;  %v1831_v49 = vld [vmem:[%s2276_s1 + $0xd8] sm:$0xff]  }
  0x20   : > { %1658 = vmatprep.mubr.msk.bf16.mxu0 %vm290_vm1, %v2037_v1  ;;  %v2096_v23 = vsel %vm469_vm2, %v482_v14, %v483_v15  ;;  %v489_v26 = vrot.slane %v2011_v54, 2  ;;  %v625_v27 = vpack.c.bf16 %v1939_v18, %v1933_v16  ;;  %v491_v28 = vrot.slane %v2014_v55, 2 }
  0x21   : > { %1681 = vmatpush3.bf16.msra.mxu0 %v1817_v41  ;;  %v2099_v24 = vsel %vm469_vm2, %v485_v20, %v486_v22  ;;  %v492_v31 = vrot.slane %v2020_v57, 2  ;;  %v626_v16 = vpack.c.bf16 %v2001_v50, %v1997_v48  ;;  %v627_v42 = vpack.c.bf16 %v2127_v38, %v2014_v55  ;;  %v1833_v55 = vld [vmem:[%s2276_s1 + $0xd0] sm:$0xff]  }
  0x22   : > { %1697 = vmatpush3.bf16.msra.mxu1 %v1818_v44  ;;  %1682 = vmatprep.subr.bf16.mxu0 %v1819_v61  ;;  %v2115_v35 = vpack.c.bf16 %v2099_v24, %v2096_v23  ;;  %v490_v18 = vsel %vm469_vm2, %v488_v25, %v489_v26  ;;  %v1829_v44 = vld [vmem:[%s2276_s1 + $0x80] sm:$0xff]   ;;  %v752_v46 = vpack.c.bf16 %v1958_v30, %v1955_v29  ;;  %v189_v29 = vld [vmem:[%s1906_s4 + $0x88] sm:$0x3]  ;;  %v1832_v30 = vld [vmem:[%s2276_s1 + $0xf8] sm:$0xff]   ;;  %v748_v52 = vrot.slane %v2127_v38, 1 }
  0x23   : > { %1698 = vmatprep.subr.bf16.mxu1 %v1820_v0  ;;  %v2124_v36 = vsel %vm469_vm2, %v491_v28, %v492_v31  ;;  %v878_v48 = vpack.c.bf16 %v2073_v17, %v2049_v5  ;;  %v753_v50 = vpack.c.bf16 %v1992_v45, %v1965_v33  ;;  %v879_v51 = vpack.c.bf16 %v2096_v23, %v2076_v19  ;;  %v1834_v33 = vld [vmem:[%s2276_s1 + $0xf0] sm:$0xff]   ;;  %v1842_v17 = vld [vmem:[%s2276_s1 + $0x100] sm:$0xff]  }
  0x24   : > { %1659 = vmatmul.mubr.msk.bf16.gmra.mxu0 %vm290_vm1, %v2055_v6  ;;  %v2139_v41 = vpack.c.bf16 %v2124_v36, %v490_v18  ;;  %v749_v54 = vrot.slane %v189_v29, 1  ;;  %v874_v56 = vrot.slane %v2127_v38, 2  ;;  %v875_v57 = vrot.slane %v189_v29, 2  ;;  %v190_v5 = vld [vmem:[%s1906_s4 + $0x90] sm:$0xff] }
  0x25   : > { %1675 = vmatmul.mubr.msk.bf16.gmra.mxu1 %vm290_vm1, %v2059_v7  ;;  %1683 = vmatpush3.bf16.msra.mxu0 %v1819_v61  ;;  %v754_v45 = vpack.c.bf16 %v2042_v2, %v2029_v62  ;;  %v880_v58 = vpack.c.bf16 %v490_v18, %v2099_v24  ;;  %v1835_v61 = vld [vmem:[%s2276_s1 + $0xc8] sm:$0xff]   ;;  %v1837_v2 = vld [vmem:[%s2276_s1 + $0xc0] sm:$0xff]   ;;  %v1226_v14 = vrot.slane %v190_v5, 2 }
  0x26   : > { %1699 = vmatpush3.bf16.msra.mxu1 %v1820_v0  ;;  %1684 = vmatprep.subr.bf16.mxu0 %v1821_v8  ;;  %v750_v59 = vsel %vm220_vm0, %v748_v52, %v749_v54  ;;  %v2184_v60 = vsel %vm469_vm2, %v874_v56, %v875_v57  ;;  %v1836_v62 = vld [vmem:[%s2276_s1 + $0xe8] sm:$0xff]  }
  0x27   : > { %1700 = vmatprep.subr.bf16.mxu1 %v1822_v9  ;;  %1686 = vmatprep.mubr.msk.bf16.mxu0 %vm290_vm1, %v502_v11  ;;  %v755_v63 = vpack.c.bf16 %v750_v59, %v2045_v3  ;;  %v881_v0 = vpack.c.bf16 %v2184_v60, %v2124_v36  ;;  %v1839_v3 = vld [vmem:[%s2276_s1 + $0x118] sm:$0xff]   ;;  %v1112_v11 = vrot.slane %v190_v5, 1 }
  0x28   : > { %1702 = vmatprep.mubr.msk.bf16.mxu1 %vm290_vm1, %v624_v13 }
  0x29   : > { %1685 = vmatpush3.bf16.msra.mxu0 %v1821_v8  ;;  %v191_v8 = vld [vmem:[%s1906_s4 + $0x98] sm:$0x3] }
  0x2a   : > { %1701 = vmatpush3.bf16.msra.mxu1 %v1822_v9  ;;  %1710 = vmatprep.subr.bf16.mxu0 %v1823_v10  ;;  %v1840_v9 = vld [vmem:[%s2276_s1 + $0x110] sm:$0xff]   ;;  %v1113_v13 = vrot.slane %v191_v8, 1  ;;  %v1227_v15 = vrot.slane %v191_v8, 2 }
  0x2b   : > { %1726 = vmatprep.subr.bf16.mxu1 %v1824_v12 }
  0x2c   : > { %1687 = vmatmul.mubr.msk.bf16.vlgmr.msra.gmra.mxu0 %vm290_vm1, %v2091_v21 }
  0x2d   : > { %1703 = vmatmul.mubr.msk.bf16.vlgmr.msra.gmra.mxu1 %vm290_vm1, %v625_v27  ;;  %1711 = vmatpush3.bf16.msra.mxu0 %v1823_v10 }
  0x2e   : > { %1727 = vmatpush3.bf16.msra.mxu1 %v1824_v12  ;;  %1712 = vmatprep.subr.bf16.mxu0 %v1825_v32 }
  0x2f   : > { %1728 = vmatprep.subr.bf16.mxu1 %v1826_v34  ;;  %1690 = vmatprep.mubr.msk.bf16.mxu0 %vm290_vm1, %v2115_v35 }
  0x30   : > { %1706 = vmatprep.mubr.msk.bf16.mxu1 %vm290_vm1, %v626_v16 }
  0x31   : > { %1713 = vmatpush3.bf16.msra.mxu0 %v1825_v32 }
  0x32   : > { %1729 = vmatpush3.bf16.msra.mxu1 %v1826_v34  ;;  %1714 = vmatprep.subr.bf16.mxu0 %v1827_v39 }
  0x33   : > { %1730 = vmatprep.subr.bf16.mxu1 %v1828_v40 }
  0x34   : > { %1691 = vmatmul.mubr.msk.bf16.gmra.mxu0 %vm290_vm1, %v2139_v41 }
  0x35   : > { %1707 = vmatmul.mubr.msk.bf16.gmra.mxu1 %vm290_vm1, %v627_v42  ;;  %1715 = vmatpush3.bf16.msra.mxu0 %v1827_v39 }
  0x36   : > { %1731 = vmatpush3.bf16.msra.mxu1 %v1828_v40  ;;  %1716 = vmatprep.subr.bf16.mxu0 %v1829_v44 }
  0x37   : > { %1732 = vmatprep.subr.bf16.mxu1 %v1830_v47  ;;  %1718 = vmatprep.mubr.msk.bf16.mxu0 %vm290_vm1, %v752_v46 }
  0x38   : > { %1734 = vmatprep.mubr.msk.bf16.mxu1 %vm290_vm1, %v878_v48 }
  0x39   : > { %1717 = vmatpush3.bf16.msra.mxu0 %v1829_v44 }
  0x3a   : > { %1733 = vmatpush3.bf16.msra.mxu1 %v1830_v47  ;;  %1742 = vmatprep.subr.bf16.mxu0 %v1831_v49 }
  0x3b   : > { %1758 = vmatprep.subr.bf16.mxu1 %v1832_v30 }
  0x3c   : > { %1719 = vmatmul.mubr.msk.bf16.vlgmr.msra.gmra.mxu0 %vm290_vm1, %v753_v50 }
  0x3d   : > { %1735 = vmatmul.mubr.msk.bf16.vlgmr.msra.gmra.mxu1 %vm290_vm1, %v879_v51  ;;  %1743 = vmatpush3.bf16.msra.mxu0 %v1831_v49 }
  0x3e   : > { %1759 = vmatpush3.bf16.msra.mxu1 %v1832_v30  ;;  %1744 = vmatprep.subr.bf16.mxu0 %v1833_v55 }
  0x3f   : > { %1760 = vmatprep.subr.bf16.mxu1 %v1834_v33  ;;  %1722 = vmatprep.mubr.msk.bf16.mxu0 %vm290_vm1, %v754_v45 }
  0x40   : > { %1738 = vmatprep.mubr.msk.bf16.mxu1 %vm290_vm1, %v880_v58 }
  0x41   : > { %1745 = vmatpush3.bf16.msra.mxu0 %v1833_v55 }
  0x42   : > { %1761 = vmatpush3.bf16.msra.mxu1 %v1834_v33  ;;  %1746 = vmatprep.subr.bf16.mxu0 %v1835_v61 }
  0x43   : > { %1762 = vmatprep.subr.bf16.mxu1 %v1836_v62 }
  0x44   : > { %1723 = vmatmul.mubr.msk.bf16.gmra.mxu0 %vm290_vm1, %v755_v63 }
  0x45   : > { %1739 = vmatmul.mubr.msk.bf16.gmra.mxu1 %vm290_vm1, %v881_v0  ;;  %1747 = vmatpush3.bf16.msra.mxu0 %v1835_v61 }
  0x46   : > { %1763 = vmatpush3.bf16.msra.mxu1 %v1836_v62  ;;  %1748 = vmatprep.subr.bf16.mxu0 %v1837_v2 }
  0x47   : > { %1764 = vmatprep.subr.bf16.mxu1 %v1838_v4  ;;  %1750 = vmatprep.mubr.msk.bf16.mxu0 %vm290_vm1, %v1986_v43  ;;  %v1841_v43 = vld [vmem:[%s2276_s1 + $0x108] sm:$0xff]  }
  0x48   : > { %1766 = vmatprep.mubr.msk.bf16.mxu1 %vm290_vm1, %v1974_v37  ;;  %v1114_v37 = vsel %vm220_vm0, %v1112_v11, %v1113_v13 }
  0x49   : > { %1749 = vmatpush3.bf16.msra.mxu0 %v1837_v2 }
  0x4a   : > { %1765 = vmatpush3.bf16.msra.mxu1 %v1838_v4  ;;  %1774 = vmatprep.subr.bf16.mxu0 %v1839_v3 }
  0x4b   : > { %1790 = vmatprep.subr.bf16.mxu1 %v1839_v3 }
  0x4c   : > { %1751 = vmatmul.mubr.msk.bf16.vlgmr.msra.gmra.mxu0 %vm290_vm1, %v2008_v53  ;;  %v1000_v53 = vpack.c.bf16 %v190_v5, %v2127_v38 }
  0x4d   : > { %1767 = vmatmul.mubr.msk.bf16.vlgmr.msra.gmra.mxu1 %vm290_vm1, %v2037_v1  ;;  %1775 = vmatpush3.bf16.msra.mxu0 %v1839_v3  ;;  %v1116_v1 = vpack.c.bf16 %v1114_v37, %v750_v59 }
  0x4e   : > { %1794 = vmatpush3.bf16.msra.mxu1 %v1839_v3  ;;  %1776 = vmatprep.subr.bf16.mxu0 %v1840_v9 }
  0x4f   : > { %1791 = vmatprep.subr.bf16.mxu1 %v1840_v9  ;;  %1754 = vmatprep.mubr.msk.bf16.mxu0 %vm290_vm1, %v2059_v7 }
  0x50   : > { %1770 = vmatprep.mubr.msk.bf16.mxu1 %vm290_vm1, %v2055_v6  ;;  %v1228_v6 = vsel %vm469_vm2, %v1226_v14, %v1227_v15 }
  0x51   : > { %1777 = vmatpush3.bf16.msra.mxu0 %v1840_v9  ;;  %v1230_v7 = vpack.c.bf16 %v1228_v6, %v2184_v60 }
  0x52   : > { %1795 = vmatpush3.bf16.msra.mxu1 %v1840_v9  ;;  %1778 = vmatprep.subr.bf16.mxu0 %v1841_v43 }
  0x53   : > { %1792 = vmatprep.subr.bf16.mxu1 %v1841_v43 }
  0x54   : > { %1755 = vmatmul.mubr.msk.bf16.gmra.mxu0 %vm290_vm1, %v1000_v53 }
  0x55   : > { %1771 = vmatmul.mubr.msk.bf16.gmra.mxu1 %vm290_vm1, %v1116_v1  ;;  %1779 = vmatpush3.bf16.msra.mxu0 %v1841_v43 }
  0x56   : > { %1796 = vmatpush3.bf16.msra.mxu1 %v1841_v43  ;;  %1780 = vmatprep.subr.bf16.mxu0 %v1842_v17 }
  0x57   : > { %1793 = vmatprep.subr.bf16.mxu1 %v1842_v17  ;;  %1782 = vmatprep.mubr.msk.bf16.mxu0 %vm290_vm1, %v2091_v21 }
  0x58   : > { %1786 = vmatprep.mubr.msk.bf16.mxu1 %vm290_vm1, %v2139_v41 }
  0x59   : > { %1781 = vmatpush3.bf16.msra.mxu0 %v1842_v17 }
  0x5a   : > { %1797 = vmatpush3.bf16.msra.mxu1 %v1842_v17 }
  0x5c   : > { %1783 = vmatmul.mubr.msk.bf16.vlgmr.msra.gmra.mxu0 %vm290_vm1, %v2115_v35 }
  0x5d   : > { %1787 = vmatmul.mubr.msk.bf16.vlgmr.msra.gmra.mxu1 %vm290_vm1, %v1230_v7 }
  0xdc   : > { %v1656_v19 = vpop.f32.mrf.mxu0 }
  0xdd   : > { %v1672_v20 = vpop.f32.mrf.mxu1 }
  0xde   : > { %v337_v22 = vpop.f32.mrf.mxu0  ;;  %v447_v63 = vadd.f32 %v1672_v20, %v1656_v19 }
  0xdf   : > { %v438_v10 = vpop.f32.mrf.mxu1 }
  0xe0   : > { %v1657_v12 = vpop.f32.mrf.mxu0  ;;  %v439_v3 = vadd.f32 %v438_v10, %v337_v22 }
  0xe1   : > { %v1673_v23 = vpop.f32.mrf.mxu1 }
  0xe2   : > { %v340_v24 = vpop.f32.mrf.mxu0  ;;  %v450_v37 = vadd.f32 %v1673_v23, %v1657_v12 }
  0xe3   : > { %v441_v21 = vpop.f32.mrf.mxu1 }
  0xe4   : > { %v1660_v25 = vpop.f32.mrf.mxu0  ;;  %v442_v17 = vadd.f32 %v441_v21, %v340_v24 }
  0xe5   : > { %v1676_v26 = vpop.f32.mrf.mxu1 }
  0xe6   : > { %v353_v27 = vpop.f32.mrf.mxu0  ;;  %v463_v2 = vadd.f32 %v1676_v26, %v1660_v25 }
  0xe7   : > { %v454_v28 = vpop.f32.mrf.mxu1 }
  0xe8   : > { %v1661_v31 = vpop.f32.mrf.mxu0  ;;  %v455_v9 = vadd.f32 %v454_v28, %v353_v27 }
  0xe9   : > { %v1677_v32 = vpop.f32.mrf.mxu1 }
  0xea   : > { %v356_v34 = vpop.f32.mrf.mxu0  ;;  %v466_v1 = vadd.f32 %v1677_v32, %v1661_v31 }
  0xeb   : > { %v457_v16 = vpop.f32.mrf.mxu1 }
  0xec   : > { %v1688_v18 = vpop.f32.mrf.mxu0  ;;  %v458_v19 = vadd.f32 %v457_v16, %v356_v34 }
  0xed   : > { %v1704_v35 = vpop.f32.mrf.mxu1  ;;  %v618_v5 = vadd.f32 %v1688_v18, %v447_v63 }
  0xee   : > { %v585_v36 = vpop.f32.mrf.mxu0 }
  0xef   : > { %v707_v38 = vpop.f32.mrf.mxu1  ;;  %v616_v43 = vadd.f32 %v585_v36, %v439_v3  ;;  %v740_v6 = vadd.f32 %v1704_v35, %v618_v5 }
  0xf0   : > { %v1689_v39 = vpop.f32.mrf.mxu0 }
  0xf1   : > { %v1705_v40 = vpop.f32.mrf.mxu1  ;;  %v619_v7 = vadd.f32 %v1689_v39, %v450_v37  ;;  %v738_v22 = vadd.f32 %v707_v38, %v616_v43 }
  0xf2   : > { %v588_v41 = vpop.f32.mrf.mxu0 }
  0xf3   : > { %v710_v42 = vpop.f32.mrf.mxu1  ;;  %v617_v10 = vadd.f32 %v588_v41, %v442_v17  ;;  %v741_v36 = vadd.f32 %v1705_v40, %v619_v7 }
  0xf4   : > { %v1692_v44 = vpop.f32.mrf.mxu0 }
  0xf5   : > { %v1708_v46 = vpop.f32.mrf.mxu1  ;;  %v622_v11 = vadd.f32 %v1692_v44, %v463_v2  ;;  %v739_v35 = vadd.f32 %v710_v42, %v617_v10 }
  0xf6   : > { %v601_v47 = vpop.f32.mrf.mxu0 }
  0xf7   : > { %v723_v48 = vpop.f32.mrf.mxu1  ;;  %v620_v14 = vadd.f32 %v601_v47, %v455_v9  ;;  %v744_v20 = vadd.f32 %v1708_v46, %v622_v11 }
  0xf8   : > { %v1693_v49 = vpop.f32.mrf.mxu0 }
  0xf9   : > { %v1709_v29 = vpop.f32.mrf.mxu1  ;;  %v623_v25 = vadd.f32 %v1693_v49, %v466_v1  ;;  %v742_v28 = vadd.f32 %v723_v48, %v620_v14 }
  0xfa   : > { %v604_v30 = vpop.f32.mrf.mxu0 }
  0xfb   : > { %v726_v50 = vpop.f32.mrf.mxu1  ;;  %v621_v44 = vadd.f32 %v604_v30, %v458_v19  ;;  %v745_v47 = vadd.f32 %v1709_v29, %v623_v25 }
  0xfc   : > { %v1720_v51 = vpop.f32.mrf.mxu0 }
  0xfd   : > { %v1736_v52 = vpop.f32.mrf.mxu1  ;;  %v868_v18 = vadd.f32 %v1720_v51, %v740_v6  ;;  %v743_v46 = vadd.f32 %v726_v50, %v621_v44 }
  0xfe   : > { %v835_v54 = vpop.f32.mrf.mxu0 }
  0xff   : > { %v961_v55 = vpop.f32.mrf.mxu1  ;;  %v866_v31 = vadd.f32 %v835_v54, %v738_v22  ;;  %v994_v39 = vadd.f32 %v1736_v52, %v868_v18 }
 0x100   : > { %v1721_v56 = vpop.f32.mrf.mxu0 }
 0x101   : > { %v1737_v57 = vpop.f32.mrf.mxu1  ;;  %v869_v34 = vadd.f32 %v1721_v56, %v741_v36  ;;  %v992_v51 = vadd.f32 %v961_v55, %v866_v31 }
 0x102   : > { %v838_v33 = vpop.f32.mrf.mxu0 }
 0x103   : > { %v2244_v45 = vpop.f32.mrf.mxu1  ;;  %v867_v63 = vadd.f32 %v838_v33, %v739_v35  ;;  %v995_v3 = vadd.f32 %v1737_v57, %v869_v34 }
 0x104   : > { %2279 = vst [vmem:[#allocation2_spill] sm:$0xff] %v2244_v45  ;;  %v1724_v58 = vpop.f32.mrf.mxu0 }
 0x105   : > { %v1740_v59 = vpop.f32.mrf.mxu1  ;;  %v872_v12 = vadd.f32 %v1724_v58, %v744_v20 }
 0x106   : > { %v851_v60 = vpop.f32.mrf.mxu0 }
 0x107   : > { %v977_v61 = vpop.f32.mrf.mxu1  ;;  %v870_v24 = vadd.f32 %v851_v60, %v742_v28  ;;  %v998_v49 = vadd.f32 %v1740_v59, %v872_v12 }
 0x108   : > { %v1725_v62 = vpop.f32.mrf.mxu0 }
 0x109   : > { %v1741_v0 = vpop.f32.mrf.mxu1  ;;  %v873_v38 = vadd.f32 %v1725_v62, %v745_v47  ;;  %v996_v58 = vadd.f32 %v977_v61, %v870_v24  ;;  %v1570_v61 = vld [vmem:[%s2277_s2] ss:$0 sm:$0xff] }
 0x10a   : > { %v854_v4 = vpop.f32.mrf.mxu0 }
 0x10b   : > { %v980_v8 = vpop.f32.mrf.mxu1  ;;  %v871_v2 = vadd.f32 %v854_v4, %v743_v46  ;;  %v999_v42 = vadd.f32 %v1741_v0, %v873_v38  ;;  %v2280_v5 = vld [vmem:[#allocation2_spill] sm:$0xff] }
 0x10c   : > { %v1752_v13 = vpop.f32.mrf.mxu0  ;;  %v993_v50 = vadd.f32 %v2280_v5, %v867_v63 }
 0x10d   : > { %v1768_v53 = vpop.f32.mrf.mxu1  ;;  %v1104_v48 = vadd.f32 %v1752_v13, %v994_v39  ;;  %v997_v55 = vadd.f32 %v980_v8, %v871_v2 }
 0x10e   : > { %v1071_v15 = vpop.f32.mrf.mxu0 }
 0x10f   : > { %v1187_v45 = vpop.f32.mrf.mxu1  ;;  %v1102_v29 = vadd.f32 %v1071_v15, %v992_v51  ;;  %v1220_v59 = vadd.f32 %v1768_v53, %v1104_v48 }
 0x110   : > { %v1753_v26 = vpop.f32.mrf.mxu0 }
 0x111   : > { %v1769_v27 = vpop.f32.mrf.mxu1  ;;  %v1105_v62 = vadd.f32 %v1753_v26, %v995_v3  ;;  %v1218_v57 = vadd.f32 %v1187_v45, %v1102_v29 }
 0x112   : > { %v1074_v23 = vpop.f32.mrf.mxu0 }
 0x113   : > { %v1190_v32 = vpop.f32.mrf.mxu1  ;;  %v1103_v4 = vadd.f32 %v1074_v23, %v993_v50  ;;  %v1221_v53 = vadd.f32 %v1769_v27, %v1105_v62 }
 0x114   : > { %v1756_v21 = vpop.f32.mrf.mxu0 }
 0x115   : > { %v1772_v16 = vpop.f32.mrf.mxu1  ;;  %v1108_v40 = vadd.f32 %v1756_v21, %v998_v49  ;;  %v1219_v25 = vadd.f32 %v1190_v32, %v1103_v4 }
 0x116   : > { %v1087_v41 = vpop.f32.mrf.mxu0 }
 0x117   : > { %v1203_v30 = vpop.f32.mrf.mxu1  ;;  %v1106_v52 = vadd.f32 %v1087_v41, %v996_v58  ;;  %v1224_v33 = vadd.f32 %v1772_v16, %v1108_v40 }
 0x118   : > { %v1757_v54 = vpop.f32.mrf.mxu0 }
 0x119   : > { %v1773_v60 = vpop.f32.mrf.mxu1  ;;  %v1109_v11 = vadd.f32 %v1757_v54, %v999_v42  ;;  %v1222_v43 = vadd.f32 %v1203_v30, %v1106_v52 }
 0x11a   : > { %v1090_v56 = vpop.f32.mrf.mxu0 }
 0x11b   : > { %v1206_v9 = vpop.f32.mrf.mxu1  ;;  %v1107_v1 = vadd.f32 %v1090_v56, %v997_v55  ;;  %v1225_v7 = vadd.f32 %v1773_v60, %v1109_v11 }
 0x11c   : > { %v1784_v13 = vpop.f32.mrf.mxu0 }
 0x11d   : > { %v1334_v37 = vadd.f32 %v1784_v13, %v1220_v59  ;;  %v1788_v0 = vpop.f32.mrf.mxu1  ;;  %v1223_v27 = vadd.f32 %v1206_v9, %v1107_v1 }
 0x11e   : > { %v1338_v14 = vadd.f32 %v1788_v0, %v1224_v33  ;;  %v1301_v15 = vpop.f32.mrf.mxu0 }
 0x11f   : > { %v1349_v17 = vadd.f32 %v1570_v61, %v1334_v37  ;;  %v1332_v6 = vadd.f32 %v1301_v15, %v1218_v57  ;;  %v1317_v8 = vpop.f32.mrf.mxu1 }
 0x120   : > { %v1353_v45 = vadd.f32 %v1570_v61, %v1338_v14  ;;  %v1336_v19 = vadd.f32 %v1317_v8, %v1222_v43  ;;  %v1785_v20 = vpop.f32.mrf.mxu0 }
 0x121   : > { %v1357_v26 = vmax.f32 %v1349_v17, 0.0  ;;  %v1347_v22 = vadd.f32 %v1570_v61, %v1332_v6  ;;  %v1335_v10 = vadd.f32 %v1785_v20, %v1221_v53  ;;  %v1789_v18 = vpop.f32.mrf.mxu1 }
 0x122   : > { %v1361_v28 = vmax.f32 %v1353_v45, 0.0  ;;  %v1351_v44 = vadd.f32 %v1570_v61, %v1336_v19  ;;  %v1339_v12 = vadd.f32 %v1789_v18, %v1225_v7  ;;  %v1304_v23 = vpop.f32.mrf.mxu0 }
 0x123   : > { %1365 = vst.msk [vmem:[%s2254_s21 + $0x10] sm:$0xff] %vm290_vm1, %v1357_v26  ;;  %v1355_v36 = vmax.f32 %v1347_v22, 0.0  ;;  %v1350_v31 = vadd.f32 %v1570_v61, %v1335_v10  ;;  %v1333_v47 = vadd.f32 %v1304_v23, %v1219_v25  ;;  %v1320_v32 = vpop.f32.mrf.mxu1 }
 0x124   : > { %1369 = vst.msk [vmem:[%s2254_s21 + $0x30] sm:$0xff] %vm290_vm1, %v1361_v28  ;;  %v1359_v24 = vmax.f32 %v1351_v44, 0.0  ;;  %v1354_v21 = vadd.f32 %v1570_v61, %v1339_v12  ;;  %v1337_v35 = vadd.f32 %v1320_v32, %v1223_v27 }
 0x125   : > { %1363 = vst.msk [vmem:[%s2254_s21] sm:$0xff] %vm290_vm1, %v1355_v36  ;;  %v1358_v39 = vmax.f32 %v1350_v31, 0.0  ;;  %v1348_v34 = vadd.f32 %v1570_v61, %v1333_v47 }
 0x126   : > { %1367 = vst.msk [vmem:[%s2254_s21 + $0x20] sm:$0xff] %vm290_vm1, %v1359_v24  ;;  %v1362_v16 = vmax.f32 %v1354_v21, 0.0  ;;  %v1352_v46 = vadd.f32 %v1570_v61, %v1337_v35 }
 0x127   : > { %1366 = vst.msk [vmem:[%s2254_s21 + $0x18] sm:$0xff] %vm290_vm1, %v1358_v39  ;;  %v1356_v49 = vmax.f32 %v1348_v34, 0.0 }
 0x128   : > { %1370 = vst.msk [vmem:[%s2254_s21 + $0x38] sm:$0xff] %vm290_vm1, %v1362_v16  ;;  %v1360_v38 = vmax.f32 %v1352_v46, 0.0 }
 0x129   : > { %1364 = vst.msk [vmem:[%s2254_s21 + $0x8] sm:$0xff] %vm290_vm1, %v1356_v49 }
 0x12a   : > { %1368 = vst.msk [vmem:[%s2254_s21 + $0x28] sm:$0xff] %vm290_vm1, %v1360_v38 }
 0x12b PF: > { %s13_s12 = sadd.s32 1, %s1849_s12  }
 0x12c   : > { %p10_p4 = scmp.ge.s32.totalorder %s13_s12, 4  }
 0x12e   :  { %12 = sbr.rel (!%p10_p4) target bundleno = 1 (0x1), region = 70 }

// kernel: bb_model_forward.12
= control target key start
LH: loop header
LB: loop body
LE: loop exit
PB: predicated region body
PF: predicated region fallthrough
CT: control target
= control target key end

     0   :  { %s1954_s15 = smov 0   ;;  %s2378_s0 = inlined_call_operand.vmem [shape: f32[2,10,10,64], index: 0, kind: input, shape index: {}]   ;;  %s2379_s1 = inlined_call_operand.vmem [shape: bf16[9,64,64], index: 1, kind: input, shape index: {}]   ;;  %s2380_s2 = inlined_call_operand.vmem [shape: f32[1,64], index: 2, kind: input, shape index: {}]   ;;  %s2381_s3 = inlined_call_operand.vmem [shape: f32[2,64,64], index: 3, kind: input, shape index: {}]   ;;  %s2382_s4 = inlined_call_operand.vmem [shape: f32[2,64,64], index: 4, kind: output, shape index: {}]  }
   0x1 LB: > { %s1501_s16 = sadd.s32 4294967295, %s1927_s15   ;;  %p1505_p0 = scmp.ge.s32.totalorder %s1927_s15, 1  ;;  %s1927_s15 = sphi %s1954_s15, %s14_s15  }
   0x2   : > { %p172_p1 = scmp.lt.s32.totalorder %s1927_s15, 3 }
   0x4   : > { %p173_p2 = pnand %p1505_p0, %p172_p1 }
   0x6   : > { %176 = sbr.rel (%p173_p2) target bundleno = 301 (0x12d), region = 36 }
   0xb   : > { %v1885_v0 = vld [vmem:[%s2379_s1 + $0x38] sm:$0xff]   ;;  %p203_p3 = scmp.lt.s32.totalorder %s1501_s16, 1  ;;  %v1887_v2 = vld [vmem:[%s2379_s1 + $0x30] sm:$0xff]   ;;  %v1889_v4 = vld [vmem:[%s2379_s1 + $0x28] sm:$0xff]   ;;  %vm267_vm0 = vcmask 1046528   ;;  %vm337_vm1 = vcmask 523264  }
   0xc   : > { %v1886_v1 = vld [vmem:[%s2379_s1 + $0x18] sm:$0xff]   ;;  %1724 = vmatprep.subr.bf16.mxu0 %v1885_v0  ;;  %v1888_v3 = vld [vmem:[%s2379_s1 + $0x10] sm:$0xff]   ;;  %v1890_v5 = vld [vmem:[%s2379_s1 + $0x8] sm:$0xff]   ;;  %vm516_vm2 = vcmask 1045504  }
   0xd   : > { %s2386_s16 = smov (!%p203_p3, %s1501_s16), 1  ;;  %1740 = vmatprep.subr.bf16.mxu1 %v1886_v1  ;;  %1725 = vmatpush3.bf16.msra.mxu0 %v1885_v0  ;;  %v1891_v6 = vld [vmem:[%s2379_s1 + $0x20] sm:$0xff]   ;;  %v1893_v32 = vld [vmem:[%s2379_s1 + $0x58] sm:$0xff]   ;;  %v1895_v41 = vld [vmem:[%s2379_s1 + $0x50] sm:$0xff]  }
   0xe   : > { %1741 = vmatpush3.bf16.msra.mxu1 %v1886_v1  ;;  %1726 = vmatprep.subr.bf16.mxu0 %v1887_v2  ;;  %s1876_s27 = smul.u32 160, %s2386_s16  ;;  %v1892_v7 = vld [vmem:[%s2379_s1] sm:$0xff]   ;;  %v1894_v36 = vld [vmem:[%s2379_s1 + $0x78] sm:$0xff]   ;;  %v1896_v44 = vld [vmem:[%s2379_s1 + $0x70] sm:$0xff]   ;;  %s1650_s22 = sshll.u32 %s2386_s16, 6 }
   0xf   : > { %1742 = vmatprep.subr.bf16.mxu1 %v1888_v3  ;;  %v1897_v61 = vld [vmem:[%s2379_s1 + $0x48] sm:$0xff]   ;;  %s2339_s25 = scalar_lea.vmem %s2381_s3, %s1650_s22  ;;  %s2353_s30 = scalar_lea.vmem %s2382_s4, %s1650_s22 }
  0x10   : > { %s1989_s8 = scalar_lea.vmem %s2378_s0, %s1876_s27  ;;  %v1898_v0 = vld [vmem:[%s2379_s1 + $0x68] sm:$0xff]  }
  0x11   : > { %1727 = vmatpush3.bf16.msra.mxu0 %v1887_v2  ;;  %v1995_v8 = vld [vmem:[%s1989_s8] sm:$0xff]  ;;  %v1998_v9 = vld [vmem:[%s1989_s8 + $0x8] sm:$0x3]  ;;  %v2001_v10 = vld [vmem:[%s1989_s8 + $0x10] sm:$0xff] }
  0x12   : > { %1743 = vmatpush3.bf16.msra.mxu1 %v1888_v3  ;;  %1728 = vmatprep.subr.bf16.mxu0 %v1889_v4  ;;  %v2004_v11 = vld [vmem:[%s1989_s8 + $0x18] sm:$0x3]  ;;  %v2007_v12 = vld [vmem:[%s1989_s8 + $0x20] sm:$0xff]  ;;  %v2010_v13 = vld [vmem:[%s1989_s8 + $0x28] sm:$0x3]  ;;  %v268_v14 = vrot.slane %v1995_v8, 1  ;;  %v239_v15 = vpack.c.bf16 %v2001_v10, %v1995_v8 }
  0x13   : > { %1744 = vmatprep.subr.bf16.mxu1 %v1890_v5  ;;  %v2016_v16 = vld [vmem:[%s1989_s8 + $0x30] sm:$0xff]  ;;  %v2019_v17 = vld [vmem:[%s1989_s8 + $0x38] sm:$0x3]  ;;  %v2022_v18 = vld [vmem:[%s1989_s8 + $0x40] sm:$0xff]  ;;  %v269_v19 = vrot.slane %v1998_v9, 1  ;;  %v271_v20 = vrot.slane %v2001_v10, 1 }
  0x14   : > { %v2027_v21 = vld [vmem:[%s1989_s8 + $0x48] sm:$0x3]  ;;  %v272_v22 = vrot.slane %v2004_v11, 1  ;;  %v274_v23 = vrot.slane %v2007_v12, 1  ;;  %v275_v24 = vrot.slane %v2010_v13, 1  ;;  %v277_v25 = vrot.slane %v2016_v16, 1  ;;  %1748 = vmatprep.mubr.msk.bf16.mxu1 %vm337_vm1, %v239_v15 }
  0x15   : > { %1729 = vmatpush3.bf16.msra.mxu0 %v1889_v4  ;;  %v270_v26 = vsel %vm267_vm0, %v268_v14, %v269_v19  ;;  %v278_v27 = vrot.slane %v2019_v17, 1  ;;  %v280_v28 = vrot.slane %v2022_v18, 1  ;;  %v281_v31 = vrot.slane %v2027_v21, 1  ;;  %v2080_v48 = vld [vmem:[%s1989_s8 + $0x50] sm:$0xff]  ;;  %v230_v49 = vld [vmem:[%s1989_s8 + $0x58] sm:$0x3] }
  0x16   : > { %1745 = vmatpush3.bf16.msra.mxu1 %v1890_v5  ;;  %1730 = vmatprep.subr.bf16.mxu0 %v1891_v6  ;;  %v2038_v29 = vsel %vm267_vm0, %v271_v20, %v272_v22  ;;  %v2041_v30 = vsel %vm267_vm0, %v274_v23, %v275_v24  ;;  %v517_v35 = vrot.slane %v1995_v8, 2  ;;  %v518_v38 = vrot.slane %v1998_v9, 2  ;;  %v2084_v50 = vld [vmem:[%s1989_s8 + $0x60] sm:$0xff]  ;;  %v2094_v54 = vld [vmem:[%s1989_s8 + $0x68] sm:$0x3]  ;;  %v2097_v55 = vld [vmem:[%s1989_s8 + $0x70] sm:$0xff] }
  0x17   : > { %1746 = vmatprep.subr.bf16.mxu1 %v1892_v7  ;;  %v2048_v33 = vsel %vm267_vm0, %v277_v25, %v278_v27  ;;  %v300_v34 = vpack.c.bf16 %v2038_v29, %v270_v26  ;;  %v521_v39 = vrot.slane %v2004_v11, 2  ;;  %v523_v40 = vrot.slane %v2007_v12, 2  ;;  %v2103_v57 = vld [vmem:[%s1989_s8 + $0x78] sm:$0x3]  ;;  %v1899_v8 = vld [vmem:[%s2379_s1 + $0x40] sm:$0xff]  }
  0x18   : > { %v2057_v37 = vpack.c.bf16 %v2048_v33, %v2041_v30  ;;  %v524_v42 = vrot.slane %v2010_v13, 2  ;;  %v2069_v43 = vpack.c.bf16 %v2016_v16, %v2007_v12  ;;  %v2075_v45 = vsel %vm267_vm0, %v280_v28, %v281_v31  ;;  %v1900_v9 = vld [vmem:[%s2379_s1 + $0x60] sm:$0xff]  }
  0x19   : > { %1731 = vmatpush3.bf16.msra.mxu0 %v1891_v6  ;;  %1732 = vmatprep.mubr.msk.bf16.mxu0 %vm337_vm1, %v300_v34  ;;  %v526_v46 = vrot.slane %v2016_v16, 2  ;;  %v527_v47 = vrot.slane %v2019_v17, 2  ;;  %v283_v51 = vrot.slane %v2080_v48, 1  ;;  %v284_v52 = vrot.slane %v230_v49, 1  ;;  %v1904_v34 = vld [vmem:[%s2379_s1 + $0xb0] sm:$0xff]  }
  0x1a   : > { %1747 = vmatpush3.bf16.msra.mxu1 %v1892_v7  ;;  %1756 = vmatprep.subr.bf16.mxu0 %v1893_v32  ;;  %v2091_v53 = vpack.c.bf16 %v2080_v48, %v2022_v18  ;;  %v520_v56 = vrot.slane %v2001_v10, 2  ;;  %v286_v58 = vrot.slane %v2084_v50, 1  ;;  %v287_v59 = vrot.slane %v2094_v54, 1 }
  0x1b   : > { %1772 = vmatprep.subr.bf16.mxu1 %v1894_v36  ;;  %v289_v60 = vrot.slane %v2097_v55, 1  ;;  %v2112_v62 = vsel %vm267_vm0, %v283_v51, %v284_v52  ;;  %v290_v63 = vrot.slane %v2103_v57, 1  ;;  %v519_v4 = vsel %vm516_vm2, %v517_v35, %v518_v38  ;;  %v2210_v38 = vld [vmem:[%s1989_s8 + $0x80] sm:$0xff] }
  0x1c   : > { %1733 = vmatmul.mubr.msk.bf16.vlgmr.msra.gmra.mxu0 %vm337_vm1, %v2057_v37  ;;  %v2120_v1 = vpack.c.bf16 %v2112_v62, %v2075_v45  ;;  %v2125_v2 = vsel %vm267_vm0, %v286_v58, %v287_v59  ;;  %v2132_v5 = vsel %vm516_vm2, %v520_v56, %v521_v39  ;;  %v2142_v7 = vpack.c.bf16 %v2097_v55, %v2084_v50  ;;  %v1905_v39 = vld [vmem:[%s2379_s1 + $0x88] sm:$0xff]  }
  0x1d   : > { %1749 = vmatmul.mubr.msk.bf16.vlgmr.msra.gmra.mxu1 %vm337_vm1, %v2069_v43  ;;  %1757 = vmatpush3.bf16.msra.mxu0 %v1893_v32  ;;  %v2128_v3 = vsel %vm267_vm0, %v289_v60, %v290_v63  ;;  %v549_v11 = vpack.c.bf16 %v2132_v5, %v519_v4  ;;  %v671_v13 = vpack.c.bf16 %v2007_v12, %v2001_v10  ;;  %v529_v14 = vrot.slane %v2022_v18, 2  ;;  %v1901_v10 = vld [vmem:[%s2379_s1 + $0x98] sm:$0xff]   ;;  %v1903_v32 = vld [vmem:[%s2379_s1 + $0x90] sm:$0xff]   ;;  %v1916_v4 = vld [vmem:[%s2379_s1 + $0xe0] sm:$0xff]  }
  0x1e   : > { %1773 = vmatpush3.bf16.msra.mxu1 %v1894_v36  ;;  %1758 = vmatprep.subr.bf16.mxu0 %v1895_v41  ;;  %v2138_v6 = vpack.c.bf16 %v2128_v3, %v2125_v2  ;;  %v530_v15 = vrot.slane %v2027_v21, 2  ;;  %v2156_v17 = vsel %vm516_vm2, %v523_v40, %v524_v42  ;;  %v2159_v19 = vsel %vm516_vm2, %v526_v46, %v527_v47  ;;  %v1902_v12 = vld [vmem:[%s2379_s1 + $0xb8] sm:$0xff]   ;;  %v1906_v40 = vld [vmem:[%s2379_s1 + $0xa8] sm:$0xff]   ;;  %v1908_v47 = vld [vmem:[%s2379_s1 + $0xa0] sm:$0xff]  }
  0x1f   : > { %1774 = vmatprep.subr.bf16.mxu1 %v1896_v44  ;;  %1752 = vmatprep.mubr.msk.bf16.mxu1 %vm337_vm1, %v2091_v53  ;;  %v532_v20 = vrot.slane %v2080_v48, 2  ;;  %v533_v22 = vrot.slane %v230_v49, 2  ;;  %v2174_v21 = vpack.c.bf16 %v2159_v19, %v2156_v17  ;;  %v535_v25 = vrot.slane %v2084_v50, 2  ;;  %v1909_v49 = vld [vmem:[%s2379_s1 + $0xd8] sm:$0xff]  }
  0x20   : > { %1736 = vmatprep.mubr.msk.bf16.mxu0 %vm337_vm1, %v2120_v1  ;;  %v2179_v23 = vsel %vm516_vm2, %v529_v14, %v530_v15  ;;  %v536_v26 = vrot.slane %v2094_v54, 2  ;;  %v672_v27 = vpack.c.bf16 %v2022_v18, %v2016_v16  ;;  %v538_v28 = vrot.slane %v2097_v55, 2 }
  0x21   : > { %1759 = vmatpush3.bf16.msra.mxu0 %v1895_v41  ;;  %v2182_v24 = vsel %vm516_vm2, %v532_v20, %v533_v22  ;;  %v539_v31 = vrot.slane %v2103_v57, 2  ;;  %v673_v16 = vpack.c.bf16 %v2084_v50, %v2080_v48  ;;  %v674_v42 = vpack.c.bf16 %v2210_v38, %v2097_v55  ;;  %v1911_v55 = vld [vmem:[%s2379_s1 + $0xd0] sm:$0xff]  }
  0x22   : > { %1775 = vmatpush3.bf16.msra.mxu1 %v1896_v44  ;;  %1760 = vmatprep.subr.bf16.mxu0 %v1897_v61  ;;  %v2198_v35 = vpack.c.bf16 %v2182_v24, %v2179_v23  ;;  %v537_v18 = vsel %vm516_vm2, %v535_v25, %v536_v26  ;;  %v1907_v44 = vld [vmem:[%s2379_s1 + $0x80] sm:$0xff]   ;;  %v799_v46 = vpack.c.bf16 %v2041_v30, %v2038_v29  ;;  %v236_v29 = vld [vmem:[%s1989_s8 + $0x88] sm:$0x3]  ;;  %v1910_v30 = vld [vmem:[%s2379_s1 + $0xf8] sm:$0xff]   ;;  %v795_v52 = vrot.slane %v2210_v38, 1 }
  0x23   : > { %1776 = vmatprep.subr.bf16.mxu1 %v1898_v0  ;;  %v2207_v36 = vsel %vm516_vm2, %v538_v28, %v539_v31  ;;  %v925_v48 = vpack.c.bf16 %v2156_v17, %v2132_v5  ;;  %v800_v50 = vpack.c.bf16 %v2075_v45, %v2048_v33  ;;  %v926_v51 = vpack.c.bf16 %v2179_v23, %v2159_v19  ;;  %v1912_v33 = vld [vmem:[%s2379_s1 + $0xf0] sm:$0xff]   ;;  %v1920_v17 = vld [vmem:[%s2379_s1 + $0x100] sm:$0xff]  }
  0x24   : > { %1737 = vmatmul.mubr.msk.bf16.gmra.mxu0 %vm337_vm1, %v2138_v6  ;;  %v2222_v41 = vpack.c.bf16 %v2207_v36, %v537_v18  ;;  %v796_v54 = vrot.slane %v236_v29, 1  ;;  %v921_v56 = vrot.slane %v2210_v38, 2  ;;  %v922_v57 = vrot.slane %v236_v29, 2  ;;  %v237_v5 = vld [vmem:[%s1989_s8 + $0x90] sm:$0xff] }
  0x25   : > { %1753 = vmatmul.mubr.msk.bf16.gmra.mxu1 %vm337_vm1, %v2142_v7  ;;  %1761 = vmatpush3.bf16.msra.mxu0 %v1897_v61  ;;  %v801_v45 = vpack.c.bf16 %v2125_v2, %v2112_v62  ;;  %v927_v58 = vpack.c.bf16 %v537_v18, %v2182_v24  ;;  %v1913_v61 = vld [vmem:[%s2379_s1 + $0xc8] sm:$0xff]   ;;  %v1915_v2 = vld [vmem:[%s2379_s1 + $0xc0] sm:$0xff]   ;;  %v1273_v14 = vrot.slane %v237_v5, 2 }
  0x26   : > { %1777 = vmatpush3.bf16.msra.mxu1 %v1898_v0  ;;  %1762 = vmatprep.subr.bf16.mxu0 %v1899_v8  ;;  %v797_v59 = vsel %vm267_vm0, %v795_v52, %v796_v54  ;;  %v2267_v60 = vsel %vm516_vm2, %v921_v56, %v922_v57  ;;  %v1914_v62 = vld [vmem:[%s2379_s1 + $0xe8] sm:$0xff]  }
  0x27   : > { %1778 = vmatprep.subr.bf16.mxu1 %v1900_v9  ;;  %1764 = vmatprep.mubr.msk.bf16.mxu0 %vm337_vm1, %v549_v11  ;;  %v802_v63 = vpack.c.bf16 %v797_v59, %v2128_v3  ;;  %v928_v0 = vpack.c.bf16 %v2267_v60, %v2207_v36  ;;  %v1917_v3 = vld [vmem:[%s2379_s1 + $0x118] sm:$0xff]   ;;  %v1159_v11 = vrot.slane %v237_v5, 1 }
  0x28   : > { %1780 = vmatprep.mubr.msk.bf16.mxu1 %vm337_vm1, %v671_v13 }
  0x29   : > { %1763 = vmatpush3.bf16.msra.mxu0 %v1899_v8  ;;  %v238_v8 = vld [vmem:[%s1989_s8 + $0x98] sm:$0x3] }
  0x2a   : > { %1779 = vmatpush3.bf16.msra.mxu1 %v1900_v9  ;;  %1788 = vmatprep.subr.bf16.mxu0 %v1901_v10  ;;  %v1918_v9 = vld [vmem:[%s2379_s1 + $0x110] sm:$0xff]   ;;  %v1160_v13 = vrot.slane %v238_v8, 1  ;;  %v1274_v15 = vrot.slane %v238_v8, 2 }
  0x2b   : > { %1804 = vmatprep.subr.bf16.mxu1 %v1902_v12 }
  0x2c   : > { %1765 = vmatmul.mubr.msk.bf16.vlgmr.msra.gmra.mxu0 %vm337_vm1, %v2174_v21 }
  0x2d   : > { %1781 = vmatmul.mubr.msk.bf16.vlgmr.msra.gmra.mxu1 %vm337_vm1, %v672_v27  ;;  %1789 = vmatpush3.bf16.msra.mxu0 %v1901_v10 }
  0x2e   : > { %1805 = vmatpush3.bf16.msra.mxu1 %v1902_v12  ;;  %1790 = vmatprep.subr.bf16.mxu0 %v1903_v32 }
  0x2f   : > { %1806 = vmatprep.subr.bf16.mxu1 %v1904_v34  ;;  %1768 = vmatprep.mubr.msk.bf16.mxu0 %vm337_vm1, %v2198_v35 }
  0x30   : > { %1784 = vmatprep.mubr.msk.bf16.mxu1 %vm337_vm1, %v673_v16 }
  0x31   : > { %1791 = vmatpush3.bf16.msra.mxu0 %v1903_v32 }
  0x32   : > { %1807 = vmatpush3.bf16.msra.mxu1 %v1904_v34  ;;  %1792 = vmatprep.subr.bf16.mxu0 %v1905_v39 }
  0x33   : > { %1808 = vmatprep.subr.bf16.mxu1 %v1906_v40 }
  0x34   : > { %1769 = vmatmul.mubr.msk.bf16.gmra.mxu0 %vm337_vm1, %v2222_v41 }
  0x35   : > { %1785 = vmatmul.mubr.msk.bf16.gmra.mxu1 %vm337_vm1, %v674_v42  ;;  %1793 = vmatpush3.bf16.msra.mxu0 %v1905_v39 }
  0x36   : > { %1809 = vmatpush3.bf16.msra.mxu1 %v1906_v40  ;;  %1794 = vmatprep.subr.bf16.mxu0 %v1907_v44 }
  0x37   : > { %1810 = vmatprep.subr.bf16.mxu1 %v1908_v47  ;;  %1796 = vmatprep.mubr.msk.bf16.mxu0 %vm337_vm1, %v799_v46 }
  0x38   : > { %1812 = vmatprep.mubr.msk.bf16.mxu1 %vm337_vm1, %v925_v48 }
  0x39   : > { %1795 = vmatpush3.bf16.msra.mxu0 %v1907_v44 }
  0x3a   : > { %1811 = vmatpush3.bf16.msra.mxu1 %v1908_v47  ;;  %1820 = vmatprep.subr.bf16.mxu0 %v1909_v49 }
  0x3b   : > { %1836 = vmatprep.subr.bf16.mxu1 %v1910_v30 }
  0x3c   : > { %1797 = vmatmul.mubr.msk.bf16.vlgmr.msra.gmra.mxu0 %vm337_vm1, %v800_v50 }
  0x3d   : > { %1813 = vmatmul.mubr.msk.bf16.vlgmr.msra.gmra.mxu1 %vm337_vm1, %v926_v51  ;;  %1821 = vmatpush3.bf16.msra.mxu0 %v1909_v49 }
  0x3e   : > { %1837 = vmatpush3.bf16.msra.mxu1 %v1910_v30  ;;  %1822 = vmatprep.subr.bf16.mxu0 %v1911_v55 }
  0x3f   : > { %1838 = vmatprep.subr.bf16.mxu1 %v1912_v33  ;;  %1800 = vmatprep.mubr.msk.bf16.mxu0 %vm337_vm1, %v801_v45 }
  0x40   : > { %1816 = vmatprep.mubr.msk.bf16.mxu1 %vm337_vm1, %v927_v58 }
  0x41   : > { %1823 = vmatpush3.bf16.msra.mxu0 %v1911_v55 }
  0x42   : > { %1839 = vmatpush3.bf16.msra.mxu1 %v1912_v33  ;;  %1824 = vmatprep.subr.bf16.mxu0 %v1913_v61 }
  0x43   : > { %1840 = vmatprep.subr.bf16.mxu1 %v1914_v62 }
  0x44   : > { %1801 = vmatmul.mubr.msk.bf16.gmra.mxu0 %vm337_vm1, %v802_v63 }
  0x45   : > { %1817 = vmatmul.mubr.msk.bf16.gmra.mxu1 %vm337_vm1, %v928_v0  ;;  %1825 = vmatpush3.bf16.msra.mxu0 %v1913_v61 }
  0x46   : > { %1841 = vmatpush3.bf16.msra.mxu1 %v1914_v62  ;;  %1826 = vmatprep.subr.bf16.mxu0 %v1915_v2 }
  0x47   : > { %1842 = vmatprep.subr.bf16.mxu1 %v1916_v4  ;;  %1828 = vmatprep.mubr.msk.bf16.mxu0 %vm337_vm1, %v2069_v43  ;;  %v1919_v43 = vld [vmem:[%s2379_s1 + $0x108] sm:$0xff]  }
  0x48   : > { %1844 = vmatprep.mubr.msk.bf16.mxu1 %vm337_vm1, %v2057_v37  ;;  %v1161_v37 = vsel %vm267_vm0, %v1159_v11, %v1160_v13 }
  0x49   : > { %1827 = vmatpush3.bf16.msra.mxu0 %v1915_v2 }
  0x4a   : > { %1843 = vmatpush3.bf16.msra.mxu1 %v1916_v4  ;;  %1852 = vmatprep.subr.bf16.mxu0 %v1917_v3 }
  0x4b   : > { %1868 = vmatprep.subr.bf16.mxu1 %v1917_v3 }
  0x4c   : > { %1829 = vmatmul.mubr.msk.bf16.vlgmr.msra.gmra.mxu0 %vm337_vm1, %v2091_v53  ;;  %v1047_v53 = vpack.c.bf16 %v237_v5, %v2210_v38 }
  0x4d   : > { %1845 = vmatmul.mubr.msk.bf16.vlgmr.msra.gmra.mxu1 %vm337_vm1, %v2120_v1  ;;  %1853 = vmatpush3.bf16.msra.mxu0 %v1917_v3  ;;  %v1163_v1 = vpack.c.bf16 %v1161_v37, %v797_v59 }
  0x4e   : > { %1872 = vmatpush3.bf16.msra.mxu1 %v1917_v3  ;;  %1854 = vmatprep.subr.bf16.mxu0 %v1918_v9 }
  0x4f   : > { %1869 = vmatprep.subr.bf16.mxu1 %v1918_v9  ;;  %1832 = vmatprep.mubr.msk.bf16.mxu0 %vm337_vm1, %v2142_v7 }
  0x50   : > { %1848 = vmatprep.mubr.msk.bf16.mxu1 %vm337_vm1, %v2138_v6  ;;  %v1275_v6 = vsel %vm516_vm2, %v1273_v14, %v1274_v15 }
  0x51   : > { %1855 = vmatpush3.bf16.msra.mxu0 %v1918_v9  ;;  %v1277_v7 = vpack.c.bf16 %v1275_v6, %v2267_v60 }
  0x52   : > { %1873 = vmatpush3.bf16.msra.mxu1 %v1918_v9  ;;  %1856 = vmatprep.subr.bf16.mxu0 %v1919_v43 }
  0x53   : > { %1870 = vmatprep.subr.bf16.mxu1 %v1919_v43 }
  0x54   : > { %1833 = vmatmul.mubr.msk.bf16.gmra.mxu0 %vm337_vm1, %v1047_v53 }
  0x55   : > { %1849 = vmatmul.mubr.msk.bf16.gmra.mxu1 %vm337_vm1, %v1163_v1  ;;  %1857 = vmatpush3.bf16.msra.mxu0 %v1919_v43 }
  0x56   : > { %1874 = vmatpush3.bf16.msra.mxu1 %v1919_v43  ;;  %1858 = vmatprep.subr.bf16.mxu0 %v1920_v17 }
  0x57   : > { %1871 = vmatprep.subr.bf16.mxu1 %v1920_v17  ;;  %1860 = vmatprep.mubr.msk.bf16.mxu0 %vm337_vm1, %v2174_v21 }
  0x58   : > { %1864 = vmatprep.mubr.msk.bf16.mxu1 %vm337_vm1, %v2222_v41 }
  0x59   : > { %1859 = vmatpush3.bf16.msra.mxu0 %v1920_v17 }
  0x5a   : > { %1875 = vmatpush3.bf16.msra.mxu1 %v1920_v17 }
  0x5c   : > { %1861 = vmatmul.mubr.msk.bf16.vlgmr.msra.gmra.mxu0 %vm337_vm1, %v2198_v35 }
  0x5d   : > { %1865 = vmatmul.mubr.msk.bf16.vlgmr.msra.gmra.mxu1 %vm337_vm1, %v1277_v7 }
  0xdc   : > { %v1734_v19 = vpop.f32.mrf.mxu0 }
  0xdd   : > { %v1750_v20 = vpop.f32.mrf.mxu1 }
  0xde   : > { %v384_v22 = vpop.f32.mrf.mxu0  ;;  %v494_v63 = vadd.f32 %v1750_v20, %v1734_v19 }
  0xdf   : > { %v485_v10 = vpop.f32.mrf.mxu1 }
  0xe0   : > { %v1735_v12 = vpop.f32.mrf.mxu0  ;;  %v486_v3 = vadd.f32 %v485_v10, %v384_v22 }
  0xe1   : > { %v1751_v23 = vpop.f32.mrf.mxu1 }
  0xe2   : > { %v387_v24 = vpop.f32.mrf.mxu0  ;;  %v497_v37 = vadd.f32 %v1751_v23, %v1735_v12 }
  0xe3   : > { %v488_v21 = vpop.f32.mrf.mxu1 }
  0xe4   : > { %v1738_v25 = vpop.f32.mrf.mxu0  ;;  %v489_v17 = vadd.f32 %v488_v21, %v387_v24 }
  0xe5   : > { %v1754_v26 = vpop.f32.mrf.mxu1 }
  0xe6   : > { %v400_v27 = vpop.f32.mrf.mxu0  ;;  %v510_v2 = vadd.f32 %v1754_v26, %v1738_v25 }
  0xe7   : > { %v501_v28 = vpop.f32.mrf.mxu1 }
  0xe8   : > { %v1739_v31 = vpop.f32.mrf.mxu0  ;;  %v502_v9 = vadd.f32 %v501_v28, %v400_v27 }
  0xe9   : > { %v1755_v32 = vpop.f32.mrf.mxu1 }
  0xea   : > { %v403_v34 = vpop.f32.mrf.mxu0  ;;  %v513_v1 = vadd.f32 %v1755_v32, %v1739_v31 }
  0xeb   : > { %v504_v16 = vpop.f32.mrf.mxu1 }
  0xec   : > { %v1766_v18 = vpop.f32.mrf.mxu0  ;;  %v505_v19 = vadd.f32 %v504_v16, %v403_v34 }
  0xed   : > { %v1782_v35 = vpop.f32.mrf.mxu1  ;;  %v665_v5 = vadd.f32 %v1766_v18, %v494_v63 }
  0xee   : > { %v632_v36 = vpop.f32.mrf.mxu0 }
  0xef   : > { %v754_v38 = vpop.f32.mrf.mxu1  ;;  %v663_v43 = vadd.f32 %v632_v36, %v486_v3  ;;  %v787_v6 = vadd.f32 %v1782_v35, %v665_v5 }
  0xf0   : > { %v1767_v39 = vpop.f32.mrf.mxu0 }
  0xf1   : > { %v1783_v40 = vpop.f32.mrf.mxu1  ;;  %v666_v7 = vadd.f32 %v1767_v39, %v497_v37  ;;  %v785_v22 = vadd.f32 %v754_v38, %v663_v43 }
  0xf2   : > { %v635_v41 = vpop.f32.mrf.mxu0 }
  0xf3   : > { %v757_v42 = vpop.f32.mrf.mxu1  ;;  %v664_v10 = vadd.f32 %v635_v41, %v489_v17  ;;  %v788_v36 = vadd.f32 %v1783_v40, %v666_v7 }
  0xf4   : > { %v1770_v44 = vpop.f32.mrf.mxu0 }
  0xf5   : > { %v1786_v46 = vpop.f32.mrf.mxu1  ;;  %v669_v11 = vadd.f32 %v1770_v44, %v510_v2  ;;  %v786_v35 = vadd.f32 %v757_v42, %v664_v10 }
  0xf6   : > { %v648_v47 = vpop.f32.mrf.mxu0 }
  0xf7   : > { %v770_v48 = vpop.f32.mrf.mxu1  ;;  %v667_v14 = vadd.f32 %v648_v47, %v502_v9  ;;  %v791_v20 = vadd.f32 %v1786_v46, %v669_v11 }
  0xf8   : > { %v1771_v49 = vpop.f32.mrf.mxu0 }
  0xf9   : > { %v1787_v29 = vpop.f32.mrf.mxu1  ;;  %v670_v25 = vadd.f32 %v1771_v49, %v513_v1  ;;  %v789_v28 = vadd.f32 %v770_v48, %v667_v14  ;;  %v1404_v1 = vld [vmem:[%s2339_s25 + $0x10] sm:$0xff] }
  0xfa   : > { %v651_v30 = vpop.f32.mrf.mxu0 }
  0xfb   : > { %v773_v50 = vpop.f32.mrf.mxu1  ;;  %v668_v44 = vadd.f32 %v651_v30, %v505_v19  ;;  %v792_v47 = vadd.f32 %v1787_v29, %v670_v25 }
  0xfc   : > { %v1798_v51 = vpop.f32.mrf.mxu0 }
  0xfd   : > { %v1814_v52 = vpop.f32.mrf.mxu1  ;;  %v915_v18 = vadd.f32 %v1798_v51, %v787_v6  ;;  %v790_v46 = vadd.f32 %v773_v50, %v668_v44  ;;  %v1408_v6 = vld [vmem:[%s2339_s25 + $0x30] sm:$0xff]  ;;  %v1406_v44 = vld [vmem:[%s2339_s25 + $0x20] sm:$0xff] }
  0xfe   : > { %v882_v54 = vpop.f32.mrf.mxu0 }
  0xff   : > { %v1008_v55 = vpop.f32.mrf.mxu1  ;;  %v913_v31 = vadd.f32 %v882_v54, %v785_v22  ;;  %v1041_v34 = vadd.f32 %v1814_v52, %v915_v18 }
 0x100   : > { %v1799_v56 = vpop.f32.mrf.mxu0 }
 0x101   : > { %v2327_v57 = vpop.f32.mrf.mxu1  ;;  %v916_v16 = vadd.f32 %v1799_v56, %v788_v36  ;;  %v1039_v51 = vadd.f32 %v1008_v55, %v913_v31 }
 0x102   : > { %v885_v33 = vpop.f32.mrf.mxu0 }
 0x103   : > { %v2329_v45 = vpop.f32.mrf.mxu1  ;;  %v914_v48 = vadd.f32 %v885_v33, %v786_v35  ;;  %v1042_v42 = vadd.f32 %v2327_v57, %v916_v16  ;;  %v1409_v16 = vld [vmem:[%s2339_s25 + $0x38] sm:$0xff] }
 0x104   : > { %2383 = vst [vmem:[#allocation2_spill] sm:$0xff] %v2329_v45  ;;  %v1802_v58 = vpop.f32.mrf.mxu0 }
 0x105   : > { %v1818_v59 = vpop.f32.mrf.mxu1  ;;  %v919_v12 = vadd.f32 %v1802_v58, %v791_v20 }
 0x106   : > { %v898_v60 = vpop.f32.mrf.mxu0 }
 0x107   : > { %v1024_v61 = vpop.f32.mrf.mxu1  ;;  %v917_v24 = vadd.f32 %v898_v60, %v789_v28  ;;  %v1045_v38 = vadd.f32 %v1818_v59, %v919_v12 }
 0x108   : > { %v1803_v62 = vpop.f32.mrf.mxu0 }
 0x109   : > { %v1819_v0 = vpop.f32.mrf.mxu1  ;;  %v920_v41 = vadd.f32 %v1803_v62, %v792_v47  ;;  %v1043_v40 = vadd.f32 %v1024_v61, %v917_v24  ;;  %v1405_v47 = vld [vmem:[%s2339_s25 + $0x18] sm:$0xff] }
 0x10a   : > { %v901_v4 = vpop.f32.mrf.mxu0 }
 0x10b   : > { %v1027_v8 = vpop.f32.mrf.mxu1  ;;  %v918_v54 = vadd.f32 %v901_v4, %v790_v46  ;;  %v1046_v56 = vadd.f32 %v1819_v0, %v920_v41  ;;  %v2384_v59 = vld [vmem:[#allocation2_spill] sm:$0xff] }
 0x10c   : > { %v1830_v13 = vpop.f32.mrf.mxu0  ;;  %v1040_v62 = vadd.f32 %v2384_v59, %v914_v48  ;;  %v1647_v0 = vld [vmem:[%s2380_s2] ss:$0 sm:$0xff] }
 0x10d   : > { %v1846_v53 = vpop.f32.mrf.mxu1  ;;  %v1151_v30 = vadd.f32 %v1830_v13, %v1041_v34  ;;  %v1044_v61 = vadd.f32 %v1027_v8, %v918_v54  ;;  %v1407_v54 = vld [vmem:[%s2339_s25 + $0x28] sm:$0xff] }
 0x10e   : > { %v1118_v15 = vpop.f32.mrf.mxu0 }
 0x10f   : > { %v1234_v45 = vpop.f32.mrf.mxu1  ;;  %v1149_v60 = vadd.f32 %v1118_v15, %v1039_v51  ;;  %v1267_v3 = vadd.f32 %v1846_v53, %v1151_v30  ;;  %v1403_v51 = vld [vmem:[%s2339_s25 + $0x8] sm:$0xff] }
 0x110   : > { %v1831_v26 = vpop.f32.mrf.mxu0 }
 0x111   : > { %v1847_v27 = vpop.f32.mrf.mxu1  ;;  %v1152_v55 = vadd.f32 %v1831_v26, %v1042_v42  ;;  %v1265_v9 = vadd.f32 %v1234_v45, %v1149_v60  ;;  %v1402_v45 = vld [vmem:[%s2339_s25] sm:$0xff] }
 0x112   : > { %v1121_v23 = vpop.f32.mrf.mxu0 }
 0x113   : > { %v1237_v32 = vpop.f32.mrf.mxu1  ;;  %v1150_v11 = vadd.f32 %v1121_v23, %v1040_v62  ;;  %v1268_v8 = vadd.f32 %v1847_v27, %v1152_v55 }
 0x114   : > { %v1834_v21 = vpop.f32.mrf.mxu0 }
 0x115   : > { %v1850_v39 = vpop.f32.mrf.mxu1  ;;  %v1155_v63 = vadd.f32 %v1834_v21, %v1045_v38  ;;  %v1266_v10 = vadd.f32 %v1237_v32, %v1150_v11 }
 0x116   : > { %v1134_v49 = vpop.f32.mrf.mxu0 }
 0x117   : > { %v1250_v58 = vpop.f32.mrf.mxu1  ;;  %v1153_v2 = vadd.f32 %v1134_v49, %v1043_v40  ;;  %v1271_v57 = vadd.f32 %v1850_v39, %v1155_v63 }
 0x118   : > { %v1835_v29 = vpop.f32.mrf.mxu0 }
 0x119   : > { %v1851_v52 = vpop.f32.mrf.mxu1  ;;  %v1156_v4 = vadd.f32 %v1835_v29, %v1046_v56  ;;  %v1269_v43 = vadd.f32 %v1250_v58, %v1153_v2 }
 0x11a   : > { %v1137_v50 = vpop.f32.mrf.mxu0 }
 0x11b   : > { %v1253_v33 = vpop.f32.mrf.mxu1  ;;  %v1154_v53 = vadd.f32 %v1137_v50, %v1044_v61  ;;  %v1272_v20 = vadd.f32 %v1851_v52, %v1156_v4 }
 0x11c   : > { %v1862_v5 = vpop.f32.mrf.mxu0 }
 0x11d   : > { %v1381_v13 = vadd.f32 %v1862_v5, %v1267_v3  ;;  %v1866_v37 = vpop.f32.mrf.mxu1  ;;  %v1270_v36 = vadd.f32 %v1253_v33, %v1154_v53 }
 0x11e   : > { %v1385_v14 = vadd.f32 %v1866_v37, %v1271_v57  ;;  %v1348_v15 = vpop.f32.mrf.mxu0 }
 0x11f   : > { %v1396_v17 = vadd.f32 %v1647_v0, %v1381_v13  ;;  %v1379_v7 = vadd.f32 %v1348_v15, %v1265_v9  ;;  %v1364_v19 = vpop.f32.mrf.mxu1 }
 0x120   : > { %v1400_v25 = vadd.f32 %v1647_v0, %v1385_v14  ;;  %v1383_v26 = vadd.f32 %v1364_v19, %v1269_v43  ;;  %v1863_v22 = vpop.f32.mrf.mxu0 }
 0x121   : > { %v1412_v18 = vadd.f32 %v1404_v1, %v1396_v17  ;;  %v1394_v28 = vadd.f32 %v1647_v0, %v1379_v7  ;;  %v1382_v12 = vadd.f32 %v1863_v22, %v1268_v8  ;;  %v1867_v23 = vpop.f32.mrf.mxu1 }
 0x122   : > { %v1416_v27 = vadd.f32 %v1408_v6, %v1400_v25  ;;  %v1398_v31 = vadd.f32 %v1647_v0, %v1383_v26  ;;  %v1386_v24 = vadd.f32 %v1867_v23, %v1272_v20  ;;  %v1351_v32 = vpop.f32.mrf.mxu0 }
 0x123   : > { %v1420_v21 = vmax.f32 %v1412_v18, 0.0  ;;  %v1410_v35 = vadd.f32 %v1402_v45, %v1394_v28  ;;  %v1397_v34 = vadd.f32 %v1647_v0, %v1382_v12  ;;  %v1380_v39 = vadd.f32 %v1351_v32, %v1266_v10  ;;  %v1367_v46 = vpop.f32.mrf.mxu1 }
 0x124   : > { %v1424_v38 = vmax.f32 %v1416_v27, 0.0  ;;  %v1414_v41 = vadd.f32 %v1406_v44, %v1398_v31  ;;  %v1401_v49 = vadd.f32 %v1647_v0, %v1386_v24  ;;  %v1384_v48 = vadd.f32 %v1367_v46, %v1270_v36 }
 0x125   : > { %1428 = vst.msk [vmem:[%s2353_s30 + $0x10] sm:$0xff] %vm337_vm1, %v1420_v21  ;;  %v1418_v30 = vmax.f32 %v1410_v35, 0.0  ;;  %v1413_v58 = vadd.f32 %v1405_v47, %v1397_v34  ;;  %v1395_v40 = vadd.f32 %v1647_v0, %v1380_v39 }
 0x126   : > { %1432 = vst.msk [vmem:[%s2353_s30 + $0x30] sm:$0xff] %vm337_vm1, %v1424_v38  ;;  %v1422_v63 = vmax.f32 %v1414_v41, 0.0  ;;  %v1417_v29 = vadd.f32 %v1409_v16, %v1401_v49  ;;  %v1399_v42 = vadd.f32 %v1647_v0, %v1384_v48 }
 0x127   : > { %1426 = vst.msk [vmem:[%s2353_s30] sm:$0xff] %vm337_vm1, %v1418_v30  ;;  %v1421_v60 = vmax.f32 %v1413_v58, 0.0  ;;  %v1411_v52 = vadd.f32 %v1403_v51, %v1395_v40 }
 0x128   : > { %1430 = vst.msk [vmem:[%s2353_s30 + $0x20] sm:$0xff] %vm337_vm1, %v1422_v63  ;;  %v1425_v56 = vmax.f32 %v1417_v29, 0.0  ;;  %v1415_v2 = vadd.f32 %v1407_v54, %v1399_v42 }
 0x129   : > { %1429 = vst.msk [vmem:[%s2353_s30 + $0x18] sm:$0xff] %vm337_vm1, %v1421_v60  ;;  %v1419_v50 = vmax.f32 %v1411_v52, 0.0 }
 0x12a   : > { %1433 = vst.msk [vmem:[%s2353_s30 + $0x38] sm:$0xff] %vm337_vm1, %v1425_v56  ;;  %v1423_v59 = vmax.f32 %v1415_v2, 0.0 }
 0x12b   : > { %1427 = vst.msk [vmem:[%s2353_s30 + $0x8] sm:$0xff] %vm337_vm1, %v1419_v50 }
 0x12c   : > { %1431 = vst.msk [vmem:[%s2353_s30 + $0x28] sm:$0xff] %vm337_vm1, %v1423_v59 }
 0x12d PF: > { %s14_s15 = sadd.s32 1, %s1927_s15  }
 0x12e   : > { %p11_p4 = scmp.ge.s32.totalorder %s14_s15, 4  }
 0x130   :  { %13 = sbr.rel (!%p11_p4) target bundleno = 1 (0x1), region = 77 }

// kernel: bb_model_forward.17
= control target key start
LH: loop header
LB: loop body
LE: loop exit
PB: predicated region body
PF: predicated region fallthrough
CT: control target
= control target key end

     0   :  { %v221_v0 = vmov 0.0   ;;  %vm222_vm0 = vmmov 0   ;;  %vm46_vm1 = vcmask 523264   ;;  %vm109_vm2 = vcmask 1041409   ;;  %s347_s1 = inlined_call_operand.vmem [shape: f32[64,8], index: 1, kind: input, shape index: {}]   ;;  %s348_s0 = inlined_call_operand.vmem [shape: f32[2,64,64], index: 0, kind: input, shape index: {}]   ;;  %s349_s2 = inlined_call_operand.vmem [shape: f32[1,8], index: 2, kind: input, shape index: {}]   ;;  %s350_s3 = inlined_call_operand.vmem [shape: f32[2,8], index: 3, kind: output, shape index: {}]  }
   0x1   :  { %200 = vmatprep.subr.mxu0 %v221_v0  ;;  %v99_v1 = vld [vmem:[%s347_s1 + $0x38] sm:$0xff]  ;;  %v98_v2 = vld [vmem:[%s347_s1 + $0x30] sm:$0xff]  ;;  %216 = vmatprep.mubr.msk.f32.mxu0 %vm222_vm0, %v221_v0  ;;  %v97_v3 = vld [vmem:[%s347_s1 + $0x28] sm:$0xff]  ;;  %vm183_vm3 = vcmask 58368  }
   0x2   :  { %201 = vmatpush3.msra.mxu0 %v99_v1  ;;  %v14_v4 = vld [vmem:[%s348_s0] sm:$0xff]  ;;  %v15_v5 = vld [vmem:[%s348_s0 + $0x8] sm:$0xff]  ;;  %v16_v6 = vld [vmem:[%s348_s0 + $0x10] sm:$0xff] }
   0x3   :  { %202 = vmatprep.subr.mxu0 %v221_v0  ;;  %v96_v7 = vld [vmem:[%s347_s1 + $0x20] sm:$0xff]  ;;  %v17_v8 = vld [vmem:[%s348_s0 + $0x18] sm:$0xff]  ;;  %v30_v9 = vmax.f32 %v14_v4, 0.0  ;;  %v23_v12 = vld [vmem:[%s348_s0 + $0x48] sm:$0xff]  ;;  %v31_v13 = vmax.f32 %v15_v5, 0.0  ;;  %v32_v14 = vmax.f32 %v16_v6, 0.0 }
   0x4   :  { %203 = vmatpush3.msra.mxu0 %v98_v2  ;;  %v95_v10 = vld [vmem:[%s347_s1 + $0x18] sm:$0xff]  ;;  %v22_v11 = vld [vmem:[%s348_s0 + $0x40] sm:$0xff]  ;;  %v24_v16 = vld [vmem:[%s348_s0 + $0x50] sm:$0xff]  ;;  %v33_v20 = vmax.f32 %v17_v8, 0.0  ;;  %v39_v22 = vmax.f32 %v23_v12, 0.0 }
   0x5   :  { %204 = vmatprep.subr.mxu0 %v221_v0  ;;  %v18_v15 = vld [vmem:[%s348_s0 + $0x20] sm:$0xff]  ;;  %v25_v17 = vld [vmem:[%s348_s0 + $0x58] sm:$0xff]  ;;  %v19_v18 = vld [vmem:[%s348_s0 + $0x28] sm:$0xff]  ;;  %v38_v21 = vmax.f32 %v22_v11, 0.0  ;;  %v40_v23 = vmax.f32 %v24_v16, 0.0  ;;  %v47_v25 = vsel %vm46_vm1, %v30_v9, 0.0 }
   0x6   :  { %205 = vmatpush3.msra.mxu0 %v97_v3  ;;  %v26_v19 = vld [vmem:[%s348_s0 + $0x60] sm:$0xff]  ;;  %v94_v24 = vld [vmem:[%s347_s1 + $0x10] sm:$0xff]  ;;  %v34_v26 = vmax.f32 %v18_v15, 0.0  ;;  %v41_v27 = vmax.f32 %v25_v17, 0.0  ;;  %v48_v28 = vsel %vm46_vm1, %v31_v13, 0.0  ;;  %v50_v29 = vsel %vm46_vm1, %v32_v14, 0.0 }
   0x7   :  { %206 = vmatprep.subr.mxu0 %v221_v0  ;;  %v93_v30 = vld [vmem:[%s347_s1 + $0x8] sm:$0xff]  ;;  %v20_v31 = vld [vmem:[%s348_s0 + $0x30] sm:$0xff]  ;;  %v35_v33 = vmax.f32 %v19_v18, 0.0  ;;  %v42_v34 = vmax.f32 %v26_v19, 0.0  ;;  %v49_v35 = vadd.f32 %v48_v28, %v47_v25  ;;  %v52_v36 = vsel %vm46_vm1, %v33_v20, 0.0  ;;  %v92_v40 = vld [vmem:[%s347_s1] sm:$0xff] }
   0x8   :  { %207 = vmatpush3.msra.mxu0 %v96_v7  ;;  %v27_v32 = vld [vmem:[%s348_s0 + $0x68] sm:$0xff]  ;;  %v68_v37 = vsel %vm46_vm1, %v38_v21, 0.0  ;;  %v69_v38 = vsel %vm46_vm1, %v39_v22, 0.0  ;;  %v71_v39 = vsel %vm46_vm1, %v40_v23, 0.0  ;;  %v21_v41 = vld [vmem:[%s348_s0 + $0x38] sm:$0xff]  ;;  %v28_v42 = vld [vmem:[%s348_s0 + $0x70] sm:$0xff] }
   0x9   :  { %208 = vmatprep.subr.mxu0 %v221_v0  ;;  %v51_v43 = vadd.f32 %v50_v29, %v49_v35  ;;  %v70_v44 = vadd.f32 %v69_v38, %v68_v37  ;;  %v36_v45 = vmax.f32 %v20_v31, 0.0  ;;  %v43_v46 = vmax.f32 %v27_v32, 0.0  ;;  %v29_v49 = vld [vmem:[%s348_s0 + $0x78] sm:$0xff]  ;;  %v189_v22 = vld [vmem:[%s349_s2] ss:$0 sm:$0xff] }
   0xa   :  { %209 = vmatpush3.msra.mxu0 %v95_v10  ;;  %v54_v47 = vsel %vm46_vm1, %v34_v26, 0.0  ;;  %v73_v48 = vsel %vm46_vm1, %v41_v27, 0.0  ;;  %v37_v52 = vmax.f32 %v21_v41, 0.0  ;;  %v44_v53 = vmax.f32 %v28_v42, 0.0 }
   0xb   :  { %210 = vmatprep.subr.mxu0 %v221_v0  ;;  %v53_v50 = vadd.f32 %v52_v36, %v51_v43  ;;  %v72_v51 = vadd.f32 %v71_v39, %v70_v44  ;;  %v56_v54 = vsel %vm46_vm1, %v35_v33, 0.0  ;;  %v75_v55 = vsel %vm46_vm1, %v42_v34, 0.0 }
   0xc   :  { %211 = vmatpush3.msra.mxu0 %v94_v24  ;;  %v45_v58 = vmax.f32 %v29_v49, 0.0  ;;  %v58_v59 = vsel %vm46_vm1, %v36_v45, 0.0  ;;  %v77_v60 = vsel %vm46_vm1, %v43_v46, 0.0  ;;  %v60_v63 = vsel %vm46_vm1, %v37_v52, 0.0 }
   0xd   :  { %212 = vmatprep.subr.mxu0 %v221_v0  ;;  %v55_v56 = vadd.f32 %v54_v47, %v53_v50  ;;  %v74_v57 = vadd.f32 %v73_v48, %v72_v51 }
   0xe   :  { %213 = vmatpush3.msra.mxu0 %v93_v30  ;;  %v81_v3 = vsel %vm46_vm1, %v45_v58, 0.0 }
   0xf   :  { %214 = vmatprep.subr.mxu0 %v221_v0  ;;  %v57_v61 = vadd.f32 %v56_v54, %v55_v56  ;;  %v76_v62 = vadd.f32 %v75_v55, %v74_v57  ;;  %v79_v0 = vsel %vm46_vm1, %v44_v53, 0.0 }
  0x10   :  { %215 = vmatpush3.msra.mxu0 %v92_v40 }
  0x11   :  { %v59_v1 = vadd.f32 %v58_v59, %v57_v61  ;;  %v78_v2 = vadd.f32 %v77_v60, %v76_v62 }
  0x13   :  { %v61_v4 = vadd.f32 %v60_v63, %v59_v1  ;;  %v80_v5 = vadd.f32 %v79_v0, %v78_v2 }
  0x15   :  { %v62_v6 = vrot.slane %v61_v4, 4  ;;  %v82_v7 = vadd.f32 %v81_v3, %v80_v5 }
  0x17   :  { %v63_v8 = vadd.f32 %v62_v6, %v61_v4  ;;  %v83_v9 = vrot.slane %v82_v7, 4 }
  0x19   :  { %v64_v10 = vrot.slane %v63_v8, 2  ;;  %v84_v11 = vadd.f32 %v83_v9, %v82_v7 }
  0x1b   :  { %v65_v12 = vadd.f32 %v64_v10, %v63_v8  ;;  %v85_v13 = vrot.slane %v84_v11, 2 }
  0x1d   :  { %v66_v14 = vrot.slane %v65_v12, 1  ;;  %v86_v15 = vadd.f32 %v85_v13, %v84_v11 }
  0x1f   :  { %v67_v16 = vadd.f32 %v66_v14, %v65_v12  ;;  %v87_v17 = vrot.slane %v86_v15, 1 }
  0x21   :  { %v88_v18 = vadd.f32 %v87_v17, %v86_v15  ;;  %v90_v19 = vmul.f32 0.015625, %v67_v16 }
  0x23   :  { %v91_v20 = vmul.f32 0.015625, %v88_v18 }
  0x25   :  { %v110_v21 = vsel %vm109_vm2, %v91_v20, %v90_v19 }
  0x26   :  { %217 = vmatmul.mubr.msk.f32.vlgmr.msra.gmra.mxu0 %vm46_vm1, %v110_v21 }
  0xe6   :  { %v179_v23 = vpop.f32.mrf.mxu0 }
  0xe7   :  { %v180_v24 = vadd.f32 %v189_v22, %v179_v23 }
  0xe8   :  { %v218_v25 = vpop.f32.mrf.mxu0 }
  0xe9   :  { %184 = vst.msk [vmem:[%s350_s3] sm:$0x3] %vm183_vm3, %v180_v24 }

</bundles_post_ra>
